<compile_context>
chip_gen: v5e
topology: v5e:2x2
jax: 0.10.0
libtpu: 0.0.40
codegen_flags: <defaults>
</compile_context>

<pallas_src>
import functools

import numpy as np
import jax
import jax.numpy as jnp
from jax.experimental import pallas as pl
from jax.experimental.pallas import tpu as pltpu


def _ffm_kernel(idx_ref, tab_ref, o_ref, *, num_fields, embed_dim, pairs):
    """All pairwise field interactions for one batch tile.

    idx_ref : (b_tile, F)   int32 VMEM  -- offset-shifted category indices
    tab_ref : (V_pad, F*D)  f32   VMEM  -- stacked tables, field-major lanes:
                                           tab[:, f*D:(f+1)*D] == tables[f]
    o_ref   : (b_tile, P*D) f32   VMEM  -- lane-dense output tile
    """
    b_tile = o_ref.shape[0]
    v_pad = tab_ref.shape[0]
    d = embed_dim

    idx = idx_ref[...]                                   # (b_tile, F) int32
    tab = tab_ref[...]                                   # (V_pad, F*D) f32
    lane = jax.lax.broadcasted_iota(jnp.int32, (b_tile, v_pad), 1)

    # Vectorized gather on the MXU: one-hot(idx[:, g]) @ tab gives, for every
    # table f at lanes [f*D:(f+1)*D], xs[f][:, g] = tables[f][idx[:, g]].
    embs = []
    for g in range(num_fields):                          # F is small & static
        onehot = (lane == idx[:, g:g + 1]).astype(tab.dtype)   # (b_tile, V_pad)
        embs.append(
            jnp.dot(onehot, tab,
                    preferred_element_type=jnp.float32,
                    precision=jax.lax.Precision.HIGHEST))       # (b_tile, F*D)

    # ix_k = xs[j][:, i] * xs[i][:, j] for every pair k = (i, j), i < j.
    prods = []
    for (i, j) in pairs:
        a = embs[i][:, j * d:(j + 1) * d]                # tables[j][idx[:, i]]
        c = embs[j][:, i * d:(i + 1) * d]                # tables[i][idx[:, j]]
        prods.append(a * c)

    # Single lane-dense store of the whole (b_tile, P*D) tile.
    o_ref[...] = jnp.concatenate(prods, axis=-1).astype(o_ref.dtype)


def ffm_forward(x, tables, offsets, *, b_tile=128):
    """FFM pairwise interactions.

    x: (B, F) int32, tables: (F, V, D) f32, offsets: (F,) int32.
    Returns (B, P, D) with P = F*(F-1)/2, matching torch.stack(ix, dim=1).
    """
    F_, V, D = tables.shape
    B = x.shape[0]
    assert b_tile % 8 == 0, "batch tile must be sublane aligned"

    pairs = tuple((i, j) for i in range(F_ - 1) for j in range(i + 1, F_))
    P = len(pairs)
    PD = P * D

    # Offset shift only (O(B*F) int32 adds); the gather itself is in-kernel.
    idx = (x + offsets[None, :]).astype(jnp.int32)       # (B, F)

    # Pad batch to a multiple of b_tile; padded rows read table row 0 (valid)
    # and are sliced away below.
    B_pad = ((B + b_tile - 1) // b_tile) * b_tile
    if B_pad != B:
        idx = jnp.pad(idx, ((0, B_pad - B), (0, 0)))

    # Stacked tables -> (V, F*D), field-major on the lane axis; pad vocab rows
    # to a multiple of 128 so the one-hot gather maps cleanly onto the MXU.
    t_all = jnp.transpose(tables, (1, 0, 2)).reshape(V, F_ * D)
    V_pad = ((max(V, 1) + 127) // 128) * 128
    if V_pad != V:
        t_all = jnp.pad(t_all, ((0, V_pad - V), (0, 0)))

    grid = (B_pad // b_tile,)

    itemsize = jnp.dtype(tables.dtype).itemsize
    # Resident tables (double-buffer worst case) + double-buffered idx/out
    # tiles + slack for intermediates.
    vmem_needed = (2 * V_pad * F_ * D * itemsize
                   + 2 * (b_tile * F_ * 4 + b_tile * PD * itemsize)
                   + (4 << 20))
    vmem_limit = int(min(max(vmem_needed, 16 << 20), 48 << 20))
    # TODO(synk): for vocabularies whose stacked table exceeds the VMEM budget
    # (esp. v7x's 64 MiB), move tables to memory_space=pl.ANY and DMA-gather
    # only the needed rows (manual double-buffering), or switch to bf16 tables.

    kernel = functools.partial(_ffm_kernel, num_fields=F_, embed_dim=D,
                               pairs=pairs)

    out = pl.pallas_call(
        kernel,
        out_shape=jax.ShapeDtypeStruct((B_pad, PD), tables.dtype),
        grid_spec=pltpu.PrefetchScalarGridSpec(
            num_scalar_prefetch=0,
            grid=grid,
            in_specs=[
                # Per-tile indices as a normal VMEM-blocked int32 input
                # (no SMEM scalar prefetch -> no SMEM padding blowup).
                pl.BlockSpec((b_tile, F_), lambda b: (b, 0)),
                # Whole stacked table; constant block index -> stays resident.
                pl.BlockSpec((V_pad, F_ * D), lambda b: (0, 0)),
            ],
            out_specs=pl.BlockSpec((b_tile, PD), lambda b: (b, 0)),
        ),
        compiler_params=pltpu.CompilerParams(
            dimension_semantics=("parallel",),   # batch tiles independent
            vmem_limit_bytes=vmem_limit,
        ),
    )(idx, t_all)

    # Free contiguous reshape; matches torch.stack(ix, dim=1) layout (B, P, D).
    return out[:B].reshape(B, P, D)


def ffm_reference(x, tables, offsets):
    """Pure-JAX reference mirroring the PyTorch forward exactly."""
    F_ = tables.shape[0]
    idx = x + offsets[None, :]
    xs = [tables[i][idx] for i in range(F_)]             # each (B, F, D)
    ix = []
    for i in range(F_ - 1):
        for j in range(i + 1, F_):
            ix.append(xs[j][:, i] * xs[i][:, j])
    return jnp.stack(ix, axis=1)                         # (B, P, D)


def init_params(key, field_dims, embed_dim):
    """Deterministic xavier_uniform-style init of the F stacked tables."""
    V = int(np.sum(field_dims))
    F_ = len(field_dims)
    bound = float(np.sqrt(6.0 / (V + embed_dim)))        # xavier_uniform (V, D)
    tables = jax.random.uniform(key, (F_, V, embed_dim),
                                minval=-bound, maxval=bound, dtype=jnp.float32)
    offsets = jnp.asarray(np.concatenate(([0], np.cumsum(field_dims)[:-1])),
                          dtype=jnp.int32)
    return tables, offsets


if __name__ == "__main__":
    field_dims = (8, 6, 4, 10)      # F = 4 fields, V = 28 total categories
    embed_dim = 32
    batch = 200                     # pads to 256 -> two 128-row grid steps

    key = jax.random.PRNGKey(0)
    k_w, k_x = jax.random.split(key)

    tables, offsets = init_params(k_w, field_dims, embed_dim)

    # Per-field indices in [0, field_dims[f]).
    keys_x = jax.random.split(k_x, len(field_dims))
    cols = [jax.random.randint(keys_x[f], (batch,), 0, field_dims[f],
                               dtype=jnp.int32)
            for f in range(len(field_dims))]
    x = jnp.stack(cols, axis=1)     # (B, F) int32

    out = jax.block_until_ready(ffm_forward(x, tables, offsets, b_tile=128))
    ref = jax.block_until_ready(ffm_reference(x, tables, offsets))

    # One-hot gather runs on the MXU at HIGHEST precision -> f32-accurate.
    np.testing.assert_allclose(np.asarray(out), np.asarray(ref),
                               rtol=1e-4, atol=1e-5)

    P = len(field_dims) * (len(field_dims) - 1) // 2
    assert out.shape == (batch, P, embed_dim)
    print("KERNEL_OK")
</pallas_src>

<mosaic_0001>
module attributes {stable_mosaic.version = 11 : i64} {
  func.func @_ffm_kernel(%arg0: i32, %arg1: memref<128x4xi32, #tpu.memory_space<vmem>>, %arg2: memref<128x128xf32, #tpu.memory_space<vmem>>, %arg3: memref<128x192xf32, #tpu.memory_space<vmem>>) attributes {dimension_semantics = [#tpu.dimension_semantics<parallel>], iteration_bounds = array<i64: 2>, scalar_prefetch = 0 : i64, scratch_operands = 0 : i64, tpu.core_type = #tpu.core_type<tc>, window_params = [{transform_indices = @transform_0, window_bounds = array<i64: 128, 4>}, {pipeline_mode = #tpu.pipeline_mode<synchronous>, transform_indices = @transform_1, window_bounds = array<i64: 128, 128>}, {transform_indices = @transform_2, window_bounds = array<i64: 128, 192>}]} {
    %c0 = arith.constant 0 : index
    %c0_0 = arith.constant 0 : index
    %0 = vector.load %arg1[%c0, %c0_0] : memref<128x4xi32, #tpu.memory_space<vmem>>, vector<128x4xi32>
    %c0_1 = arith.constant 0 : index
    %c0_2 = arith.constant 0 : index
    %1 = vector.load %arg2[%c0_1, %c0_2] : memref<128x128xf32, #tpu.memory_space<vmem>>, vector<128x128xf32>
    %2 = tpu.iota {dimensions = array<i32: 1>} : vector<128x128xi32>
    %3 = vector.extract_strided_slice %0 {offsets = [0, 0], sizes = [128, 1], strides = [1, 1]} : vector<128x4xi32> to vector<128x1xi32>
    %4 = vector.broadcast %3 : vector<128x1xi32> to vector<128x128xi32>
    %5 = arith.cmpi eq, %2, %4 : vector<128x128xi32>
    %6 = arith.extui %5 : vector<128x128xi1> to vector<128x128xi32>
    %7 = arith.sitofp %6 : vector<128x128xi32> to vector<128x128xf32>
    %cst = arith.constant dense<0.000000e+00> : vector<128x128xf32>
    %8 = tpu.matmul %7, %1, %cst {dimension_numbers = #tpu.dot_dimension_numbers<[1], [0], [0], [1], [0, 0, 1, 1], [], []>, precision = #tpu.contract_precision<fp32>} : vector<128x128xf32>, vector<128x128xf32>, vector<128x128xf32> -> vector<128x128xf32>
    %9 = vector.extract_strided_slice %0 {offsets = [0, 1], sizes = [128, 1], strides = [1, 1]} : vector<128x4xi32> to vector<128x1xi32>
    %10 = vector.broadcast %9 : vector<128x1xi32> to vector<128x128xi32>
    %11 = arith.cmpi eq, %2, %10 : vector<128x128xi32>
    %12 = arith.extui %11 : vector<128x128xi1> to vector<128x128xi32>
    %13 = arith.sitofp %12 : vector<128x128xi32> to vector<128x128xf32>
    %cst_3 = arith.constant dense<0.000000e+00> : vector<128x128xf32>
    %14 = tpu.matmul %13, %1, %cst_3 {dimension_numbers = #tpu.dot_dimension_numbers<[1], [0], [0], [1], [0, 0, 1, 1], [], []>, precision = #tpu.contract_precision<fp32>} : vector<128x128xf32>, vector<128x128xf32>, vector<128x128xf32> -> vector<128x128xf32>
    %15 = vector.extract_strided_slice %0 {offsets = [0, 2], sizes = [128, 1], strides = [1, 1]} : vector<128x4xi32> to vector<128x1xi32>
    %16 = vector.broadcast %15 : vector<128x1xi32> to vector<128x128xi32>
    %17 = arith.cmpi eq, %2, %16 : vector<128x128xi32>
    %18 = arith.extui %17 : vector<128x128xi1> to vector<128x128xi32>
    %19 = arith.sitofp %18 : vector<128x128xi32> to vector<128x128xf32>
    %cst_4 = arith.constant dense<0.000000e+00> : vector<128x128xf32>
    %20 = tpu.matmul %19, %1, %cst_4 {dimension_numbers = #tpu.dot_dimension_numbers<[1], [0], [0], [1], [0, 0, 1, 1], [], []>, precision = #tpu.contract_precision<fp32>} : vector<128x128xf32>, vector<128x128xf32>, vector<128x128xf32> -> vector<128x128xf32>
    %21 = vector.extract_strided_slice %0 {offsets = [0, 3], sizes = [128, 1], strides = [1, 1]} : vector<128x4xi32> to vector<128x1xi32>
    %22 = vector.broadcast %21 : vector<128x1xi32> to vector<128x128xi32>
    %23 = arith.cmpi eq, %2, %22 : vector<128x128xi32>
    %24 = arith.extui %23 : vector<128x128xi1> to vector<128x128xi32>
    %25 = arith.sitofp %24 : vector<128x128xi32> to vector<128x128xf32>
    %cst_5 = arith.constant dense<0.000000e+00> : vector<128x128xf32>
    %26 = tpu.matmul %25, %1, %cst_5 {dimension_numbers = #tpu.dot_dimension_numbers<[1], [0], [0], [1], [0, 0, 1, 1], [], []>, precision = #tpu.contract_precision<fp32>} : vector<128x128xf32>, vector<128x128xf32>, vector<128x128xf32> -> vector<128x128xf32>
    %27 = vector.extract_strided_slice %8 {offsets = [0, 32], sizes = [128, 32], strides = [1, 1]} : vector<128x128xf32> to vector<128x32xf32>
    %28 = vector.extract_strided_slice %14 {offsets = [0, 0], sizes = [128, 32], strides = [1, 1]} : vector<128x128xf32> to vector<128x32xf32>
    %29 = arith.mulf %27, %28 : vector<128x32xf32>
    %30 = vector.extract_strided_slice %8 {offsets = [0, 64], sizes = [128, 32], strides = [1, 1]} : vector<128x128xf32> to vector<128x32xf32>
    %31 = vector.extract_strided_slice %20 {offsets = [0, 0], sizes = [128, 32], strides = [1, 1]} : vector<128x128xf32> to vector<128x32xf32>
    %32 = arith.mulf %30, %31 : vector<128x32xf32>
    %33 = vector.extract_strided_slice %8 {offsets = [0, 96], sizes = [128, 32], strides = [1, 1]} : vector<128x128xf32> to vector<128x32xf32>
    %34 = vector.extract_strided_slice %26 {offsets = [0, 0], sizes = [128, 32], strides = [1, 1]} : vector<128x128xf32> to vector<128x32xf32>
    %35 = arith.mulf %33, %34 : vector<128x32xf32>
    %36 = vector.extract_strided_slice %14 {offsets = [0, 64], sizes = [128, 32], strides = [1, 1]} : vector<128x128xf32> to vector<128x32xf32>
    %37 = vector.extract_strided_slice %20 {offsets = [0, 32], sizes = [128, 32], strides = [1, 1]} : vector<128x128xf32> to vector<128x32xf32>
    %38 = arith.mulf %36, %37 : vector<128x32xf32>
    %39 = vector.extract_strided_slice %14 {offsets = [0, 96], sizes = [128, 32], strides = [1, 1]} : vector<128x128xf32> to vector<128x32xf32>
    %40 = vector.extract_strided_slice %26 {offsets = [0, 32], sizes = [128, 32], strides = [1, 1]} : vector<128x128xf32> to vector<128x32xf32>
    %41 = arith.mulf %39, %40 : vector<128x32xf32>
    %42 = vector.extract_strided_slice %20 {offsets = [0, 96], sizes = [128, 32], strides = [1, 1]} : vector<128x128xf32> to vector<128x32xf32>
    %43 = vector.extract_strided_slice %26 {offsets = [0, 64], sizes = [128, 32], strides = [1, 1]} : vector<128x128xf32> to vector<128x32xf32>
    %44 = arith.mulf %42, %43 : vector<128x32xf32>
    %45 = tpu.concatenate %29, %32, %35, %38, %41, %44 in 1 : vector<128x32xf32>, vector<128x32xf32>, vector<128x32xf32>, vector<128x32xf32>, vector<128x32xf32>, vector<128x32xf32> -> vector<128x192xf32>
    %c0_6 = arith.constant 0 : index
    %c0_7 = arith.constant 0 : index
    %46 = vector.load %arg3[%c0_6, %c0_7] : memref<128x192xf32, #tpu.memory_space<vmem>>, vector<128x192xf32>
    tpu.vector_store %arg3[%c0_6, %c0_7], %45 {strides = array<i32>} : memref<128x192xf32, #tpu.memory_space<vmem>>, vector<128x192xf32>,
    return
  }
  func.func @transform_0(%arg0: i32) -> (i32, i32) {
    %c0_i32 = arith.constant 0 : i32
    %c0_i32_0 = arith.constant 0 : i32
    return %arg0, %c0_i32 : i32, i32
  }
  func.func @transform_1(%arg0: i32) -> (i32, i32) {
    %c0_i32 = arith.constant 0 : i32
    %c0_i32_0 = arith.constant 0 : i32
    %c0_i32_1 = arith.constant 0 : i32
    return %c0_i32, %c0_i32_0 : i32, i32
  }
  func.func @transform_2(%arg0: i32) -> (i32, i32) {
    %c0_i32 = arith.constant 0 : i32
    %c0_i32_0 = arith.constant 0 : i32
    return %arg0, %c0_i32 : i32, i32
  }
}

</mosaic_0001>

<bundles_post_ra>
// kernel: tpu_custom_call.1
= control target key start
LH: loop header
LB: loop body
LE: loop exit
PB: predicated region body
PF: predicated region fallthrough
CT: control target
= control target key end

     0   :  { %s5110_s9 = smov 0   ;;  %s8480_s0 = inlined_call_operand.vmem [shape: s32[256,4], index: 0, kind: input, shape index: {}]   ;;  %s8481_s1 = inlined_call_operand.vmem [shape: f32[128,128], index: 1, kind: input, shape index: {}]   ;;  %s8482_s2 = inlined_call_operand.vmem [shape: f32[256,192], index: 2, kind: output, shape index: {}]  }
   0x1 LB: > { %s4764_s10 = sadd.s32 4294967295, %s5084_s9   ;;  %p4768_p0 = scmp.ge.s32.totalorder %s5084_s9, 1  ;;  %s5084_s9 = sphi %s5110_s9, %s12_s9  }
   0x2   : > { %p113_p1 = scmp.lt.s32.totalorder %s5084_s9, 3 }
   0x4   : > { %p114_p2 = pnand %p4768_p0, %p113_p1 }
   0x6   : > { %117 = sbr.rel (%p114_p2) target bundleno = 1371 (0x55b), region = 28 }
   0xb   : > { %s4769_s11 = sshll.u32 %s4764_s10, 4  ;;  %v5086_v0 = vmov 0   ;;  %v180_v7 = vld [vmem:[%s8481_s1 + $0x78] sm:$0xff]  ;;  %v179_v9 = vld [vmem:[%s8481_s1 + $0x70] sm:$0xff]  ;;  %v178_v10 = vld [vmem:[%s8481_s1 + $0x68] sm:$0xff]  ;;  %s5093_s23 = smov 96  }
   0xc   : > { %5051 = vset.pattern.permute.xlu1 %v5086_v0  ;;  %5050 = vset.pattern.permute.xlu0 %v5086_v0  ;;  %p137_p3 = scmp.lt.s32.totalorder %s4769_s11, 31  ;;  %v5152_v8 = vand.u32 4294901760, %v180_v7  ;;  %v177_v11 = vld [vmem:[%s8481_s1 + $0x60] sm:$0xff]  ;;  %v5164_v12 = vand.u32 4294901760, %v179_v9  ;;  %v5166_v13 = vand.u32 4294901760, %v178_v10  ;;  %v176_v15 = vld [vmem:[%s8481_s1 + $0x58] sm:$0xff] }
   0xd   : > { %5052 = vset.pattern.permute.xlu2 %v5086_v0  ;;  %v5168_v14 = vand.u32 4294901760, %v177_v11  ;;  %v5177_v17 = vand.u32 4294901760, %v176_v15  ;;  %v175_v35 = vld [vmem:[%s8481_s1 + $0x50] sm:$0xff]  ;;  %v174_v36 = vld [vmem:[%s8481_s1 + $0x48] sm:$0xff]  ;;  %v173_v37 = vld [vmem:[%s8481_s1 + $0x40] sm:$0xff]  ;;  %s5094_s24 = smov 64  }
   0xe   : > { %s9175_s11 = smov (!%p137_p3, %s4769_s11), 31  ;;  %v5174_v16 = vsub.f32 %v180_v7, %v5152_v8  ;;  %731 = vmatpush.msra.mxu3 %v5152_v8  ;;  %280 = vmatpush.msra.mxu0 %v5152_v8  ;;  %v5181_v18 = vsub.f32 %v179_v9, %v5164_v12  ;;  %v5184_v19 = vsub.f32 %v178_v10, %v5166_v13  ;;  %v5249_v40 = vand.u32 4294901760, %v175_v35  ;;  %v172_v41 = vld [vmem:[%s8481_s1 + $0x38] sm:$0xff]  ;;  %v171_v62 = vld [vmem:[%s8481_s1 + $0x30] sm:$0xff]  ;;  %v170_v63 = vld [vmem:[%s8481_s1 + $0x28] sm:$0xff] }
   0xf   : > { %s4770_s12 = sshll.u32 %s9175_s11, 3  ;;  %v5187_v20 = vsub.f32 %v177_v11, %v5168_v14  ;;  %v5201_v24 = vsub.f32 %v176_v15, %v5177_v17  ;;  %v5259_v43 = vand.u32 4294901760, %v174_v36  ;;  %v5261_v44 = vand.u32 4294901760, %v173_v37  ;;  %v169_v0 = vld [vmem:[%s8481_s1 + $0x20] sm:$0xff]  ;;  %v168_v15 = vld [vmem:[%s8481_s1 + $0x18] sm:$0xff]  ;;  %s5032_s25 = sshll.u32 %s9175_s11, 4 }
  0x10   : > { %s5124_s15 = scalar_lea.vmem %s8480_s0, %s4770_s12  ;;  %8746 = vst [vmem:[#allocation2_spill] sm:$0xff] %v5174_v16  ;;  %v5196_v23 = vand.u32 4294901760, %v5174_v16  ;;  %603 = vmatpush.msra.mxu2 %v5174_v16  ;;  %733 = vmatpush.msra.mxu3 %v5164_v12  ;;  %v5204_v25 = vand.u32 4294901760, %v5181_v18  ;;  %v5207_v26 = vand.u32 4294901760, %v5184_v19  ;;  %v5263_v45 = vand.u32 4294901760, %v172_v41  ;;  %s8292_s28 = scalar_lea.vmem %s8482_s2, %s5032_s25 }
  0x11   : > { %v5127_v1 = vld [vmem:[%s5124_s15 + $0x10] sm:$0xff]  ;;  %v5130_v2 = vld [vmem:[%s5124_s15] sm:$0xff]  ;;  %v5139_v4 = vld [vmem:[%s5124_s15 + $0x18] sm:$0xff]  ;;  %8747 = vst [vmem:[#allocation3_spill] sm:$0xff] %v5181_v18  ;;  %v5210_v27 = vand.u32 4294901760, %v5187_v20  ;;  %282 = vmatpush.msra.mxu0 %v5164_v12  ;;  %v5220_v30 = vand.u32 4294901760, %v5201_v24  ;;  %v5266_v46 = vsub.f32 %v175_v35, %v5249_v40  ;;  %v5281_v50 = vsub.f32 %v174_v36, %v5259_v43 }
  0x12   : > { %190 = vperm.xlu1 %5051, %v5127_v1   ;;  %184 = vperm.xlu0 %5050, %v5130_v2   ;;  %v5135_v3 = vld [vmem:[%s5124_s15 + $0x20] sm:$0xff]  ;;  %v5142_v5 = vld [vmem:[%s5124_s15 + $0x8] sm:$0xff]  ;;  %8748 = vst [vmem:[#allocation4_spill] sm:$0xff] %v5184_v19  ;;  %v5190_v21 = vld [vmem:[%s5124_s15 + $0x38] sm:$0xff]  ;;  %v443_v29 = vsub.f32 %v5174_v16, %v5196_v23  ;;  %v449_v31 = vsub.f32 %v5181_v18, %v5204_v25  ;;  %v5333_v9 = vand.u32 4294901760, %v171_v62  ;;  %v5335_v10 = vand.u32 4294901760, %v170_v63 }
  0x13   : > { %196 = vperm.xlu2 %5052, %v5135_v3   ;;  %v5145_v6 = vld [vmem:[%s5124_s15 + $0x28] sm:$0xff]  ;;  %8749 = vst [vmem:[#allocation5_spill] sm:$0xff] %v5187_v20  ;;  %v5193_v22 = vld [vmem:[%s5124_s15 + $0x30] sm:$0xff]  ;;  %v5214_v28 = vld [vmem:[%s5124_s15 + $0x40] sm:$0xff]  ;;  %606 = vmatpush.msra.mxu2 %v5181_v18  ;;  %v455_v32 = vsub.f32 %v5184_v19, %v5207_v26  ;;  %v461_v34 = vsub.f32 %v5187_v20, %v5210_v27  ;;  %v5290_v53 = vand.u32 4294901760, %v5266_v46  ;;  %v5301_v56 = vand.u32 4294901760, %v5281_v50 }
  0x14   : > { %8750 = vst [vmem:[#allocation6_spill] sm:$0xff] %v5196_v23  ;;  %735 = vmatpush.msra.mxu3 %v5166_v13  ;;  %v5229_v33 = vand.u32 4294901760, %v443_v29  ;;  %v5245_v38 = vand.u32 4294901760, %v449_v31  ;;  %v467_v39 = vsub.f32 %v5201_v24, %v5220_v30  ;;  %284 = vmatpush.msra.mxu0 %v5166_v13  ;;  %v5271_v47 = vld [vmem:[%s5124_s15 + $0x50] sm:$0xff]  ;;  %v5274_v48 = vld [vmem:[%s5124_s15 + $0x48] sm:$0xff]  ;;  %v5284_v51 = vsub.f32 %v173_v37, %v5261_v44  ;;  %v5295_v54 = vld [vmem:[%s5124_s15 + $0x58] sm:$0xff] }
  0x15   : > { %8751 = vst [vmem:[#allocation7_spill] sm:$0xff] %v5201_v24  ;;  %609 = vmatpush.msra.mxu2 %v5184_v19  ;;  %v5256_v42 = vand.u32 4294901760, %v455_v32  ;;  %v5277_v49 = vand.u32 4294901760, %v461_v34  ;;  %v5287_v52 = vsub.f32 %v172_v41, %v5263_v45  ;;  %v473_v59 = vsub.f32 %v5266_v46, %v5290_v53  ;;  %v5362_v37 = vld [vmem:[%s5124_s15 + $0x68] sm:$0xff]  ;;  %v5426_v19 = vld [vmem:[%s5124_s15 + $0x78] sm:$0xff] }
  0x16   : > { %8752 = vst [vmem:[#allocation8_spill] sm:$0xff] %v5204_v25  ;;  %737 = vmatpush.msra.mxu3 %v5168_v14  ;;  %445 = vmatpush.msra.mxu1 %v5229_v33  ;;  %v5298_v55 = vand.u32 4294901760, %v467_v39  ;;  %v5305_v57 = vand.u32 4294901760, %v5284_v51  ;;  %v479_v60 = vsub.f32 %v5281_v50, %v5301_v56  ;;  %v5337_v11 = vand.u32 4294901760, %v169_v0  ;;  %v5365_v39 = vld [vmem:[%s5124_s15 + $0x60] sm:$0xff] }
  0x17   : > { %8753 = vst [vmem:[#allocation9_spill] sm:$0xff] %v5207_v26  ;;  %612 = vmatpush.msra.mxu2 %v5187_v20  ;;  %286 = vmatpush.msra.mxu0 %v5168_v14  ;;  %v5308_v58 = vand.u32 4294901760, %v5287_v52  ;;  %v5330_v7 = vand.u32 4294901760, %v473_v59  ;;  %v5348_v32 = vand.u32 4294901760, %v168_v15  ;;  %v5351_v34 = vsub.f32 %v171_v62, %v5333_v9 }
  0x18   : > { %8754 = vst [vmem:[#allocation10_spill] sm:$0xff] %v5210_v27  ;;  %739 = vmatpush.msra.mxu3 %v5177_v17  ;;  %451 = vmatpush.msra.mxu1 %v5245_v38  ;;  %v485_v61 = vsub.f32 %v5284_v51, %v5305_v57  ;;  %v5343_v29 = vand.u32 4294901760, %v479_v60  ;;  %v5356_v35 = vsub.f32 %v170_v63, %v5335_v10 }
  0x19   : > { %8755 = vst [vmem:[#allocation11_spill] sm:$0xff] %v5220_v30  ;;  %615 = vmatpush.msra.mxu2 %v5201_v24  ;;  %288 = vmatpush.msra.mxu0 %v5177_v17  ;;  %v491_v31 = vsub.f32 %v5287_v52, %v5308_v58  ;;  %v5359_v36 = vsub.f32 %v169_v0, %v5337_v11  ;;  %v5375_v60 = vand.u32 4294901760, %v5351_v34 }
  0x1a   : > { %193 = vperm.xlu1 %5051, %v5139_v4   ;;  %187 = vperm.xlu0 %5050, %v5142_v5   ;;  %8756 = vst [vmem:[#allocation12_spill] sm:$0xff] %v5266_v46  ;;  %v5368_v41 = vand.u32 4294901760, %v485_v61  ;;  %v5372_v59 = vsub.f32 %v168_v15, %v5348_v32  ;;  %v5378_v62 = vand.u32 4294901760, %v5356_v35  ;;  %v5386_v61 = vld [vmem:[%s5124_s15 + $0x70] sm:$0xff] }
  0x1b   : > { %199 = vperm.xlu2 %5052, %v5145_v6   ;;  %8757 = vst [vmem:[#allocation13_spill] sm:$0xff] %v5281_v50  ;;  %741 = vmatpush.msra.mxu3 %v5249_v40  ;;  %v5383_v63 = vand.u32 4294901760, %v5359_v36  ;;  %v5389_v0 = vand.u32 4294901760, %v491_v31 }
  0x1c   : > { %8758 = vst [vmem:[#allocation14_spill] sm:$0xff] %v5284_v51  ;;  %457 = vmatpush.msra.mxu1 %v5256_v42  ;;  %618 = vmatpush.msra.mxu2 %v5266_v46  ;;  %v5393_v15 = vand.u32 4294901760, %v5372_v59 }
  0x1d   : > { %8759 = vst [vmem:[#allocation15_spill] sm:$0xff] %v5287_v52  ;;  %743 = vmatpush.msra.mxu3 %v5259_v43  ;;  %290 = vmatpush.msra.mxu0 %v5249_v40  ;;  %v509_v31 = vsub.f32 %v5359_v36, %v5383_v63 }
  0x1e   : > { %8760 = vst [vmem:[#allocation16_spill] sm:$0xff] %v5290_v53  ;;  %463 = vmatpush.msra.mxu1 %v5277_v49  ;;  %621 = vmatpush.msra.mxu2 %v5281_v50  ;;  %v167_v50 = vld [vmem:[%s8481_s1 + $0x10] sm:$0xff]  ;;  %v515_v20 = vsub.f32 %v5372_v59, %v5393_v15 }
  0x1f   : > { %8761 = vst [vmem:[#allocation17_spill] sm:$0xff] %v5301_v56  ;;  %745 = vmatpush.msra.mxu3 %v5261_v44  ;;  %292 = vmatpush.msra.mxu0 %v5259_v43 }
  0x20   : > { %8762 = vst [vmem:[#allocation18_spill] sm:$0xff] %v5305_v57  ;;  %469 = vmatpush.msra.mxu1 %v5298_v55  ;;  %624 = vmatpush.msra.mxu2 %v5284_v51  ;;  %v503_v51 = vsub.f32 %v5356_v35, %v5378_v62 }
  0x21   : > { %8763 = vst [vmem:[#allocation19_spill] sm:$0xff] %v5308_v58  ;;  %747 = vmatpush.msra.mxu3 %v5263_v45  ;;  %294 = vmatpush.msra.mxu0 %v5261_v44 }
  0x22   : > { %205 = vperm.xlu1 %5051, %v5190_v21   ;;  %202 = vperm.xlu0 %5050, %v5193_v22   ;;  %8764 = vst [vmem:[#allocation20_spill] sm:$0xff] %v5351_v34  ;;  %v5415_v24 = vand.u32 4294901760, %v503_v51 }
  0x23   : > { %208 = vperm.xlu2 %5052, %v5214_v28   ;;  %8765 = vst [vmem:[#allocation21_spill] sm:$0xff] %v5356_v35  ;;  %475 = vmatpush.msra.mxu1 %v5330_v7 }
  0x24   : > { %8766 = vst [vmem:[#allocation22_spill] sm:$0xff] %v5359_v36  ;;  %627 = vmatpush.msra.mxu2 %v5287_v52  ;;  %v497_v52 = vsub.f32 %v5351_v34, %v5375_v60  ;;  %749 = vmatpush.msra.mxu3 %v5333_v9 }
  0x25   : > { %8767 = vst [vmem:[#allocation23_spill] sm:$0xff] %v5372_v59  ;;  %481 = vmatpush.msra.mxu1 %v5343_v29  ;;  %296 = vmatpush.msra.mxu0 %v5263_v45 }
  0x26   : > { %8768 = vst [vmem:[#allocation24_spill] sm:$0xff] %v5375_v60  ;;  %630 = vmatpush.msra.mxu2 %v5351_v34  ;;  %v5409_v46 = vand.u32 4294901760, %v497_v52  ;;  %v5412_v34 = vand.u32 4294901760, %v167_v50  ;;  %751 = vmatpush.msra.mxu3 %v5335_v10 }
  0x27   : > { %8769 = vst [vmem:[#allocation25_spill] sm:$0xff] %v5378_v62  ;;  %487 = vmatpush.msra.mxu1 %v5368_v41  ;;  %298 = vmatpush.msra.mxu0 %v5333_v9 }
  0x28   : > { %8770 = vst [vmem:[#allocation26_spill] sm:$0xff] %v5383_v63  ;;  %633 = vmatpush.msra.mxu2 %v5356_v35  ;;  %v5423_v52 = vsub.f32 %v167_v50, %v5412_v34  ;;  %v5429_v35 = vand.u32 4294901760, %v509_v31  ;;  %753 = vmatpush.msra.mxu3 %v5337_v11  ;;  %v5087_v50 = vmov 1  }
  0x29   : > { %8771 = vst [vmem:[#allocation27_spill] sm:$0xff] %v5393_v15  ;;  %493 = vmatpush.msra.mxu1 %v5389_v0  ;;  %300 = vmatpush.msra.mxu0 %v5335_v10 }
  0x2a   : > { %214 = vperm.xlu1 %5051, %v5271_v47   ;;  %211 = vperm.xlu0 %5050, %v5274_v48   ;;  %8772 = vst [vmem:[#allocation28_spill] sm:$0xff] %v5423_v52  ;;  %v5433_v51 = vand.u32 4294901760, %v5423_v52 }
  0x2b   : > { %217 = vperm.xlu2 %5052, %v5295_v54   ;;  %636 = vmatpush.msra.mxu2 %v5359_v36  ;;  %8773 = vst [vmem:[#allocation29_spill] sm:$0xff] %v5429_v35  ;;  %v5438_v36 = vand.u32 4294901760, %v515_v20 }
  0x2c   : > { %499 = vmatpush.msra.mxu1 %v5409_v46  ;;  %8774 = vst [vmem:[#allocation30_spill] sm:$0xff] %v5433_v51  ;;  %v521_v31 = vsub.f32 %v5423_v52, %v5433_v51  ;;  %755 = vmatpush.msra.mxu3 %v5348_v32 }
  0x2d   : > { %639 = vmatpush.msra.mxu2 %v5372_v59  ;;  %8775 = vst [vmem:[#allocation31_spill] sm:$0xff] %v5438_v36  ;;  %302 = vmatpush.msra.mxu0 %v5337_v11 }
  0x2e   : > { %505 = vmatpush.msra.mxu1 %v5415_v24  ;;  %v5446_v18 = vand.u32 4294901760, %v521_v31  ;;  %757 = vmatpush.msra.mxu3 %v5412_v34 }
  0x2f   : > { %642 = vmatpush.msra.mxu2 %v5423_v52  ;;  %304 = vmatpush.msra.mxu0 %v5348_v32 }
  0x30   : > { %511 = vmatpush.msra.mxu1 %v5429_v35  ;;  %8776 = vst [vmem:[#allocation32_spill] sm:$0xff] %v5446_v18 }
  0x31   : > { %306 = vmatpush.msra.mxu0 %v5412_v34 }
  0x32   : > { %223 = vperm.xlu1 %5051, %v5362_v37   ;;  %220 = vperm.xlu0 %5050, %v5365_v39  }
  0x33   : > { %226 = vperm.xlu2 %5052, %v5386_v61   ;;  %517 = vmatpush.msra.mxu1 %v5438_v36 }
  0x35   : > { %523 = vmatpush.msra.mxu1 %v5446_v18 }
  0x3a   : > { %229 = vperm.xlu0 %5050, %v5426_v19   ;;  %5053 = vset.pattern.permute.xlu1 %v5087_v50 }
  0x3b   : > { %1086 = vperm.xlu1 %5053, %v5130_v2   ;;  %5054 = vset.pattern.permute.xlu2 %v5087_v50  ;;  %v166_v2 = vld [vmem:[%s8481_s1 + $0x8] sm:$0xff] }
  0x3c   : > { %1089 = vperm.xlu2 %5054, %v5142_v5   ;;  %v5466_v5 = vand.u32 4294901760, %v166_v2 }
  0x3e   : > { %8777 = vst [vmem:[#allocation33_spill] sm:$0xff] %v5466_v5  ;;  %v5470_v20 = vsub.f32 %v166_v2, %v5466_v5  ;;  %759 = vmatpush.msra.mxu3 %v5466_v5  ;;  %308 = vmatpush.msra.mxu0 %v5466_v5 }
  0x40   : > { %8778 = vst [vmem:[#allocation34_spill] sm:$0xff] %v5470_v20  ;;  %645 = vmatpush.msra.mxu2 %v5470_v20 }
  0x42   : > { %5055 = vset.pattern.permute.xlu0 %v5087_v50 }
  0x43   : > { %1095 = vperm.xlu1 %5053, %v5139_v4   ;;  %1092 = vperm.xlu0 %5055, %v5127_v1   ;;  %v5477_v1 = vand.u32 4294901760, %v5470_v20 }
  0x44   : > { %1098 = vperm.xlu2 %5054, %v5135_v3  }
  0x45   : > { %8779 = vst [vmem:[#allocation35_spill] sm:$0xff] %v5477_v1  ;;  %v527_v3 = vsub.f32 %v5470_v20, %v5477_v1 }
  0x47   : > { %v5482_v4 = vand.u32 4294901760, %v527_v3 }
  0x49   : > { %8780 = vst [vmem:[#allocation36_spill] sm:$0xff] %v5482_v4  ;;  %529 = vmatpush.msra.mxu1 %v5482_v4 }
  0x4b   : > { %1101 = vperm.xlu1 %5053, %v5145_v6   ;;  %1107 = vperm.xlu0 %5055, %v5190_v21   ;;  %v165_v6 = vld [vmem:[%s8481_s1] sm:$0xff] }
  0x4c   : > { %1104 = vperm.xlu2 %5054, %v5193_v22   ;;  %v5489_v21 = vand.u32 4294901760, %v165_v6 }
  0x4e   : > { %8781 = vst [vmem:[#allocation37_spill] sm:$0xff] %v5489_v21  ;;  %v5494_v22 = vsub.f32 %v165_v6, %v5489_v21  ;;  %761 = vmatpush.msra.mxu3 %v5489_v21  ;;  %310 = vmatpush.msra.mxu0 %v5489_v21 }
  0x50   : > { %8782 = vst [vmem:[#allocation38_spill] sm:$0xff] %v5494_v22  ;;  %862 = vmatpush.msrb.mxu0 %v5196_v23  ;;  %1347 = vmatpush.msrb.mxu3 %v5229_v33 }
  0x51   : > { %648 = vmatpush.msra.mxu2 %v5494_v22 }
  0x52   : > { %866 = vmatpush.msrb.mxu0 %v5204_v25  ;;  %1353 = vmatpush.msrb.mxu3 %v5245_v38 }
  0x53   : > { %1110 = vperm.xlu1 %5053, %v5214_v28   ;;  %1116 = vperm.xlu0 %5055, %v5271_v47   ;;  %v5501_v28 = vand.u32 4294901760, %v5494_v22 }
  0x54   : > { %1113 = vperm.xlu2 %5054, %v5274_v48   ;;  %1182 = vmatpush.msrb.mxu2 %v5152_v8 }
  0x55   : > { %8783 = vst [vmem:[#allocation39_spill] sm:$0xff] %v5501_v28  ;;  %v533_v47 = vsub.f32 %v5494_v22, %v5501_v28  ;;  %870 = vmatpush.msrb.mxu0 %v5207_v26  ;;  %1359 = vmatpush.msrb.mxu3 %v5256_v42 }
  0x56   : > { %1184 = vmatpush.msrb.mxu2 %v5164_v12 }
  0x57   : > { %v5512_v48 = vand.u32 4294901760, %v533_v47  ;;  %874 = vmatpush.msrb.mxu0 %v5210_v27  ;;  %1365 = vmatpush.msrb.mxu3 %v5277_v49 }
  0x58   : > { %1186 = vmatpush.msrb.mxu2 %v5166_v13 }
  0x59   : > { %8784 = vst [vmem:[#allocation40_spill] sm:$0xff] %v5512_v48  ;;  %535 = vmatpush.msra.mxu1 %v5512_v48  ;;  %878 = vmatpush.msrb.mxu0 %v5220_v30 }
  0x5a   : > { %1188 = vmatpush.msrb.mxu2 %v5168_v14  ;;  %1371 = vmatpush.msrb.mxu3 %v5298_v55 }
  0x5b   : > { %1119 = vperm.xlu1 %5053, %v5295_v54   ;;  %1125 = vperm.xlu0 %5055, %v5362_v37  }
  0x5c   : > { %1122 = vperm.xlu2 %5054, %v5365_v39   ;;  %989 = vmatpush.msrb.mxu1 %v5152_v8  ;;  %v8505_v39 = vmov 1.0  }
  0x5d   : > { %1190 = vmatpush.msrb.mxu2 %v5177_v17  ;;  %882 = vmatpush.msrb.mxu0 %v5290_v53 }
  0x5e   : > { %991 = vmatpush.msrb.mxu1 %v5164_v12  ;;  %1377 = vmatpush.msrb.mxu3 %v5330_v7 }
  0x5f   : > { %1192 = vmatpush.msrb.mxu2 %v5249_v40  ;;  %886 = vmatpush.msrb.mxu0 %v5301_v56 }
  0x60   : > { %993 = vmatpush.msrb.mxu1 %v5166_v13  ;;  %1383 = vmatpush.msrb.mxu3 %v5343_v29 }
  0x61   : > { %1194 = vmatpush.msrb.mxu2 %v5259_v43  ;;  %890 = vmatpush.msrb.mxu0 %v5305_v57 }
  0x62   : > { %995 = vmatpush.msrb.mxu1 %v5168_v14  ;;  %1389 = vmatpush.msrb.mxu3 %v5368_v41 }
  0x63   : > { %1128 = vperm.xlu1 %5053, %v5386_v61   ;;  %1196 = vmatpush.msrb.mxu2 %v5261_v44  ;;  %v8511_v61 = vmov 0.0  }
  0x64   : > { %1131 = vperm.xlu2 %5054, %v5426_v19   ;;  %997 = vmatpush.msrb.mxu1 %v5177_v17  ;;  %v181_v19 = vlaneseq }
  0x65   : > { %894 = vmatpush.msrb.mxu0 %v5308_v58  ;;  %1198 = vmatpush.msrb.mxu2 %v5263_v45 }
  0x66   : > { %999 = vmatpush.msrb.mxu1 %v5249_v40  ;;  %1395 = vmatpush.msrb.mxu3 %v5389_v0  ;;  %v5572_v54 = vand.u32 127, %v181_v19 }
  0x67   : > { %898 = vmatpush.msrb.mxu0 %v5375_v60  ;;  %1200 = vmatpush.msrb.mxu2 %v5333_v9 }
  0x68   : > { %1001 = vmatpush.msrb.mxu1 %v5259_v43  ;;  %1401 = vmatpush.msrb.mxu3 %v5409_v46 }
  0x69   : > { %902 = vmatpush.msrb.mxu0 %v5378_v62  ;;  %1202 = vmatpush.msrb.mxu2 %v5335_v10 }
  0x6a   : > { %1003 = vmatpush.msrb.mxu1 %v5261_v44  ;;  %1407 = vmatpush.msrb.mxu3 %v5415_v24 }
  0x6b   : > { %906 = vmatpush.msrb.mxu0 %v5383_v63  ;;  %1204 = vmatpush.msrb.mxu2 %v5337_v11 }
  0x6c   : > { %1005 = vmatpush.msrb.mxu1 %v5263_v45  ;;  %1413 = vmatpush.msrb.mxu3 %v5429_v35  ;;  %v8795_v35 = vld [vmem:[#allocation20_spill] sm:$0xff] }
  0x6d   : > { %910 = vmatpush.msrb.mxu0 %v5393_v15  ;;  %1206 = vmatpush.msrb.mxu2 %v5348_v32 }
  0x6e   : > { %1007 = vmatpush.msrb.mxu1 %v5333_v9  ;;  %1419 = vmatpush.msrb.mxu3 %v5438_v36 }
  0x6f   : > { %914 = vmatpush.msrb.mxu0 %v5433_v51  ;;  %1208 = vmatpush.msrb.mxu2 %v5412_v34 }
  0x70   : > { %1009 = vmatpush.msrb.mxu1 %v5335_v10  ;;  %1425 = vmatpush.msrb.mxu3 %v5446_v18  ;;  %v8791_v18 = vld [vmem:[#allocation12_spill] sm:$0xff] }
  0x71   : > { %918 = vmatpush.msrb.mxu0 %v5477_v1  ;;  %1210 = vmatpush.msrb.mxu2 %v5466_v5 }
  0x72   : > { %1011 = vmatpush.msrb.mxu1 %v5337_v11  ;;  %1431 = vmatpush.msrb.mxu3 %v5482_v4 }
  0x73   : > { %922 = vmatpush.msrb.mxu0 %v5501_v28  ;;  %1212 = vmatpush.msrb.mxu2 %v5489_v21 }
  0x74   : > { %1013 = vmatpush.msrb.mxu1 %v5348_v32  ;;  %1437 = vmatpush.msrb.mxu3 %v5512_v48 }
  0x76   : > { %1015 = vmatpush.msrb.mxu1 %v5412_v34 }
  0x78   : > { %1017 = vmatpush.msrb.mxu1 %v5466_v5 }
  0x7a   : > { %1019 = vmatpush.msrb.mxu1 %v5489_v21 }
  0x84   : > { %v5575_v37 = vpop.permute.xlu0 %184  ;;  %v5589_v2 = vpop.permute.xlu1 %190 }
  0x85   : > { %vm231_vm0 = vcmp.eq.s32.totalorder %v5572_v54, %v5575_v37  ;;  %vm233_vm1 = vcmp.eq.s32.totalorder %v5572_v54, %v5589_v2 }
  0x86   : > { %4790 = vmatmul.msk.f32.vlgmr.msra.gmra.mxu1 %vm231_vm0, %v8505_v39  ;;  %v4774_v50 = vsel %vm231_vm0, 1.0, %v8511_v61 }
  0x87   : > { %v312_v31 = vsub.f32 %v4774_v50, %v4774_v50  ;;  %1633 = vmatpush.msra.mxu1 %v5152_v8 }
  0x89   : > { %651 = vmatmul.f32.vlgmr.msra.gmra.mxu2 %v312_v31  ;;  %v313_v3 = vand.u32 4294901760, %v312_v31  ;;  %1635 = vmatpush.msra.mxu1 %v5164_v12 }
  0x8a   : > { %1764 = vmatpush.msra.mxu2 %v5196_v23  ;;  %v8785_v23 = vld [vmem:[#allocation3_spill] sm:$0xff] }
  0x8b   : > { %765 = vmatmul.f32.vlgmr.msra.gmra.mxu3 %v313_v3  ;;  %v314_v6 = vsub.f32 %v312_v31, %v313_v3  ;;  %1637 = vmatpush.msra.mxu1 %v5166_v13  ;;  %v4776_v31 = vsel %vm233_vm1, 1.0, %v8511_v61 }
  0x8c   : > { %v5596_v47 = vpop.permute.xlu0 %187  ;;  %1891 = vmatpush.msra.mxu3 %v5152_v8  ;;  %1768 = vmatpush.msra.mxu2 %v5204_v25  ;;  %v5620_v25 = vpop.permute.xlu1 %193 }
  0x8d   : > { %vm232_vm2 = vcmp.eq.s32.totalorder %v5572_v54, %v5596_v47  ;;  %v315_v19 = vand.u32 4294901760, %v314_v6  ;;  %1639 = vmatpush.msra.mxu1 %v5168_v14  ;;  %vm234_vm3 = vcmp.eq.s32.totalorder %v5572_v54, %v5620_v25 }
  0x8e   : > { %4791 = vmatmul.msk.f32.gmra.mxu1 %vm232_vm2, %v8505_v39  ;;  %v4775_v50 = vsel %vm232_vm2, 1.0, %v8511_v61  ;;  %1893 = vmatpush.msra.mxu3 %v5164_v12  ;;  %v328_v39 = vsub.f32 %v4776_v31, %v4776_v31 }
  0x8f   : > { %316 = vmatmul.f32.vlgmr.msra.gmra.mxu0 %v315_v19  ;;  %v320_v3 = vsub.f32 %v4775_v50, %v4775_v50  ;;  %1772 = vmatpush.msra.mxu2 %v5207_v26  ;;  %v8786_v50 = vld [vmem:[#allocation4_spill] sm:$0xff]  ;;  %v8787_v26 = vmov 1.0  }
  0x90   : > { %1505 = vmatpush.msra.mxu0 %v5174_v16  ;;  %1895 = vmatpush.msra.mxu3 %v5166_v13  ;;  %v329_v61 = vand.u32 4294901760, %v328_v39 }
  0x91   : > { %656 = vmatmul.f32.gmra.mxu2 %v320_v3  ;;  %v321_v6 = vand.u32 4294901760, %v320_v3  ;;  %1641 = vmatpush.msra.mxu1 %v5177_v17 }
  0x92   : > { %1508 = vmatpush.msra.mxu0 %v8785_v23  ;;  %1776 = vmatpush.msra.mxu2 %v5210_v27  ;;  %v8788_v27 = vmov 0.0   ;;  %v330_v48 = vsub.f32 %v328_v39, %v329_v61 }
  0x93   : > { %771 = vmatmul.f32.gmra.mxu3 %v321_v6  ;;  %v322_v19 = vsub.f32 %v320_v3, %v321_v6  ;;  %1643 = vmatpush.msra.mxu1 %v5249_v40  ;;  %v4777_v3 = vsel %vm234_vm3, 1.0, %v8788_v27  ;;  %v8789_v6 = vld [vmem:[#allocation5_spill] sm:$0xff] }
  0x94   : > { %1511 = vmatpush.msra.mxu0 %v8786_v50  ;;  %1897 = vmatpush.msra.mxu3 %v5168_v14  ;;  %v336_v4 = vsub.f32 %v4777_v3, %v4777_v3 }
  0x95   : > { %v323_v31 = vand.u32 4294901760, %v322_v19  ;;  %1780 = vmatpush.msra.mxu2 %v5220_v30  ;;  %1645 = vmatpush.msra.mxu1 %v5259_v43  ;;  %v5641_v19 = vpop.permute.xlu2 %196  ;;  %v8790_v30 = vld [vmem:[#allocation7_spill] sm:$0xff] }
  0x96   : > { %4792 = vmatmul.msk.f32.gmra.mxu1 %vm233_vm1, %v8787_v26  ;;  %1514 = vmatpush.msra.mxu0 %v8789_v6  ;;  %vm235_vm4 = vcmp.eq.s32.totalorder %v5572_v54, %v5641_v19  ;;  %v337_v36 = vand.u32 4294901760, %v336_v4  ;;  %v8819_v19 = vld [vmem:[#allocation38_spill] sm:$0xff] }
  0x97   : > { %324 = vmatmul.f32.gmra.mxu0 %v323_v31  ;;  %1899 = vmatpush.msra.mxu3 %v5177_v17  ;;  %v8792_v31 = vld [vmem:[#allocation13_spill] sm:$0xff] }
  0x98   : > { %1517 = vmatpush.msra.mxu0 %v8790_v30  ;;  %1784 = vmatpush.msra.mxu2 %v5290_v53  ;;  %v331_v53 = vand.u32 4294901760, %v330_v48  ;;  %v8794_v48 = vld [vmem:[#allocation15_spill] sm:$0xff]  ;;  %v338_v3 = vsub.f32 %v336_v4, %v337_v36 }
  0x99   : > { %661 = vmatmul.f32.gmra.mxu2 %v328_v39  ;;  %1901 = vmatpush.msra.mxu3 %v5249_v40  ;;  %v4778_v39 = vsel %vm235_vm4, 1.0, %v8788_v27 }
  0x9a   : > { %1520 = vmatpush.msra.mxu0 %v8791_v18  ;;  %1788 = vmatpush.msra.mxu2 %v5301_v56 }
  0x9b   : > { %777 = vmatmul.f32.gmra.mxu3 %v329_v61  ;;  %1647 = vmatpush.msra.mxu1 %v5261_v44  ;;  %v8793_v61 = vld [vmem:[#allocation14_spill] sm:$0xff] }
  0x9c   : > { %1523 = vmatpush.msra.mxu0 %v8792_v31  ;;  %1903 = vmatpush.msra.mxu3 %v5259_v43 }
  0x9d   : > { %1792 = vmatpush.msra.mxu2 %v5305_v57  ;;  %1649 = vmatpush.msra.mxu1 %v5263_v45  ;;  %v344_v57 = vsub.f32 %v4778_v39, %v4778_v39  ;;  %v5668_v56 = vpop.permute.xlu2 %199  ;;  %v8796_v39 = vld [vmem:[#allocation21_spill] sm:$0xff] }
  0x9e   : > { %4793 = vmatmul.msk.f32.gmra.mxu1 %vm234_vm3, %v8787_v26  ;;  %1526 = vmatpush.msra.mxu0 %v8793_v61  ;;  %vm236_vm5 = vcmp.eq.s32.totalorder %v5572_v54, %v5668_v56 }
  0x9f   : > { %332 = vmatmul.f32.gmra.mxu0 %v331_v53  ;;  %1905 = vmatpush.msra.mxu3 %v5261_v44  ;;  %v339_v53 = vand.u32 4294901760, %v338_v3  ;;  %v5689_v3 = vpop.permute.xlu0 %202 }
  0xa0   : > { %1796 = vmatpush.msra.mxu2 %v5308_v58  ;;  %1529 = vmatpush.msra.mxu0 %v8794_v48  ;;  %8797 = vst [vmem:[#allocation41_spill] sm:$0xff] %v5689_v3  ;;  %vm237_vm6 = vcmp.eq.s32.totalorder %v5572_v54, %v5689_v3 }
  0xa1   : > { %666 = vmatmul.f32.gmra.mxu2 %v336_v4  ;;  %1907 = vmatpush.msra.mxu3 %v5263_v45  ;;  %v345_v4 = vand.u32 4294901760, %v344_v57 }
  0xa2   : > { %1800 = vmatpush.msra.mxu2 %v5375_v60  ;;  %1532 = vmatpush.msra.mxu0 %v8795_v35 }
  0xa3   : > { %783 = vmatmul.f32.gmra.mxu3 %v337_v36  ;;  %1651 = vmatpush.msra.mxu1 %v5333_v9  ;;  %v4779_v36 = vsel %vm236_vm5, 1.0, %v8788_v27  ;;  %v346_v60 = vsub.f32 %v344_v57, %v345_v4 }
  0xa4   : > { %1909 = vmatpush.msra.mxu3 %v5333_v9  ;;  %1804 = vmatpush.msra.mxu2 %v5378_v62  ;;  %v8798_v62 = vld [vmem:[#allocation22_spill] sm:$0xff]  ;;  %v352_v58 = vsub.f32 %v4779_v36, %v4779_v36 }
  0xa5   : > { %1535 = vmatpush.msra.mxu0 %v8796_v39  ;;  %1653 = vmatpush.msra.mxu1 %v5335_v10 }
  0xa6   : > { %4794 = vmatmul.msk.f32.gmra.mxu1 %vm235_vm4, %v8787_v26  ;;  %1911 = vmatpush.msra.mxu3 %v5335_v10 }
  0xa7   : > { %340 = vmatmul.f32.gmra.mxu0 %v339_v53  ;;  %1808 = vmatpush.msra.mxu2 %v5383_v63  ;;  %v347_v53 = vand.u32 4294901760, %v346_v60  ;;  %v353_v63 = vand.u32 4294901760, %v352_v58  ;;  %v5713_v60 = vpop.permute.xlu1 %205 }
  0xa8   : > { %1538 = vmatpush.msra.mxu0 %v8798_v62  ;;  %1913 = vmatpush.msra.mxu3 %v5337_v11  ;;  %8799 = vst [vmem:[#allocation42_spill] sm:$0xff] %v5713_v60  ;;  %vm238_vm7 = vcmp.eq.s32.totalorder %v5572_v54, %v5713_v60 }
  0xa9   : > { %671 = vmatmul.f32.gmra.mxu2 %v344_v57  ;;  %1655 = vmatpush.msra.mxu1 %v5337_v11  ;;  %v4780_v57 = vsel %vm237_vm6, 1.0, %v8788_v27 }
  0xaa   : > { %1812 = vmatpush.msra.mxu2 %v5393_v15  ;;  %1541 = vmatpush.msra.mxu0 %v5372_v59  ;;  %v360_v36 = vsub.f32 %v4780_v57, %v4780_v57 }
  0xab   : > { %789 = vmatmul.f32.gmra.mxu3 %v345_v4  ;;  %1657 = vmatpush.msra.mxu1 %v5348_v32  ;;  %v354_v4 = vsub.f32 %v352_v58, %v353_v63 }
  0xac   : > { %1915 = vmatpush.msra.mxu3 %v5348_v32  ;;  %1816 = vmatpush.msra.mxu2 %v5433_v51 }
  0xad   : > { %1544 = vmatpush.msra.mxu0 %v5423_v52  ;;  %1659 = vmatpush.msra.mxu1 %v5412_v34 }
  0xae   : > { %4795 = vmatmul.msk.f32.gmra.mxu1 %vm236_vm5, %v8787_v26  ;;  %1917 = vmatpush.msra.mxu3 %v5412_v34 }
  0xaf   : > { %348 = vmatmul.f32.gmra.mxu0 %v347_v53  ;;  %1820 = vmatpush.msra.mxu2 %v5477_v1  ;;  %v355_v53 = vand.u32 4294901760, %v354_v4  ;;  %v361_v1 = vand.u32 4294901760, %v360_v36  ;;  %v5756_v60 = vpop.permute.xlu1 %214 }
  0xb0   : > { %1547 = vmatpush.msra.mxu0 %v5470_v20  ;;  %1919 = vmatpush.msra.mxu3 %v5466_v5  ;;  %8802 = vst [vmem:[#allocation45_spill] sm:$0xff] %v5756_v60  ;;  %vm241_vm10 = vcmp.eq.s32.totalorder %v5572_v54, %v5756_v60 }
  0xb1   : > { %676 = vmatmul.f32.gmra.mxu2 %v352_v58  ;;  %1661 = vmatpush.msra.mxu1 %v5466_v5  ;;  %v4781_v58 = vsel %vm238_vm7, 1.0, %v8788_v27  ;;  %v362_v57 = vsub.f32 %v360_v36, %v361_v1 }
  0xb2   : > { %1824 = vmatpush.msra.mxu2 %v5501_v28  ;;  %1550 = vmatpush.msra.mxu0 %v5494_v22  ;;  %v5732_v28 = vpop.permute.xlu2 %208 }
  0xb3   : > { %795 = vmatmul.f32.gmra.mxu3 %v353_v63  ;;  %1663 = vmatpush.msra.mxu1 %v5489_v21  ;;  %v368_v63 = vsub.f32 %v4781_v58, %v4781_v58  ;;  %8800 = vst [vmem:[#allocation43_spill] sm:$0xff] %v5732_v28  ;;  %vm239_vm8 = vcmp.eq.s32.totalorder %v5572_v54, %v5732_v28  ;;  %v363_v4 = vand.u32 4294901760, %v362_v57 }
  0xb4   : > { %1921 = vmatpush.msra.mxu3 %v5489_v21 }
  0xb5   : > { %v369_v51 = vand.u32 4294901760, %v368_v63 }
  0xb6   : > { %4796 = vmatmul.msk.f32.gmra.mxu1 %vm237_vm6, %v8787_v26 }
  0xb7   : > { %356 = vmatmul.f32.gmra.mxu0 %v355_v53  ;;  %v4782_v53 = vsel %vm239_vm8, 1.0, %v8788_v27  ;;  %v370_v58 = vsub.f32 %v368_v63, %v369_v51  ;;  %v5792_v60 = vpop.permute.xlu1 %223 }
  0xb8   : > { %v376_v15 = vsub.f32 %v4782_v53, %v4782_v53  ;;  %8805 = vst [vmem:[#allocation48_spill] sm:$0xff] %v5792_v60  ;;  %vm8568_vm13 = vcmp.eq.s32.totalorder %v5572_v54, %v5792_v60 }
  0xb9   : > { %681 = vmatmul.f32.gmra.mxu2 %v360_v36  ;;  %v5744_v36 = vpop.permute.xlu0 %211 }
  0xba   : > { %8801 = vst [vmem:[#allocation44_spill] sm:$0xff] %v5744_v36  ;;  %vm240_vm9 = vcmp.eq.s32.totalorder %v5572_v54, %v5744_v36  ;;  %v377_v57 = vand.u32 4294901760, %v376_v15  ;;  %v5768_v28 = vpop.permute.xlu2 %217 }
  0xbb   : > { %801 = vmatmul.f32.gmra.mxu3 %v361_v1  ;;  %v371_v1 = vand.u32 4294901760, %v370_v58  ;;  %8803 = vst [vmem:[#allocation46_spill] sm:$0xff] %v5768_v28  ;;  %vm242_vm11 = vcmp.eq.s32.totalorder %v5572_v54, %v5768_v28 }
  0xbe   : > { %4797 = vmatmul.msk.f32.gmra.mxu1 %vm238_vm7, %v8787_v26 }
  0xbf   : > { %364 = vmatmul.f32.gmra.mxu0 %v363_v4  ;;  %v4783_v4 = vsel %vm240_vm9, 1.0, %v8788_v27  ;;  %v5818_v3 = vpop.permute.xlu1 %1086 }
  0xc0   : > { %v384_v53 = vsub.f32 %v4783_v4, %v4783_v4 }
  0xc1   : > { %686 = vmatmul.f32.gmra.mxu2 %v368_v63  ;;  %v378_v63 = vsub.f32 %v376_v15, %v377_v57 }
  0xc2   : > { %v385_v58 = vand.u32 4294901760, %v384_v53  ;;  %v5804_v28 = vpop.permute.xlu2 %226 }
  0xc3   : > { %807 = vmatmul.f32.gmra.mxu3 %v369_v51  ;;  %v379_v51 = vand.u32 4294901760, %v378_v63  ;;  %8806 = vst [vmem:[#allocation49_spill] sm:$0xff] %v5804_v28  ;;  %vm8575_vm14 = vcmp.eq.s32.totalorder %v5572_v54, %v5804_v28 }
  0xc6   : > { %4798 = vmatmul.msk.f32.gmra.mxu1 %vm239_vm8, %v8787_v26 }
  0xc7   : > { %372 = vmatmul.f32.gmra.mxu0 %v371_v1  ;;  %v4784_v1 = vsel %vm241_vm10, 1.0, %v8788_v27 }
  0xc8   : > { %v392_v4 = vsub.f32 %v4784_v1, %v4784_v1 }
  0xc9   : > { %691 = vmatmul.f32.gmra.mxu2 %v376_v15  ;;  %v386_v15 = vsub.f32 %v384_v53, %v385_v58 }
  0xca   : > { %v393_v63 = vand.u32 4294901760, %v392_v4  ;;  %v5838_v60 = vpop.permute.xlu2 %1089 }
  0xcb   : > { %813 = vmatmul.f32.gmra.mxu3 %v377_v57  ;;  %v387_v57 = vand.u32 4294901760, %v386_v15 }
  0xcc   : > { %v394_v1 = vsub.f32 %v392_v4, %v393_v63 }
  0xce   : > { %4799 = vmatmul.msk.f32.gmra.mxu1 %vm240_vm9, %v8787_v26 }
  0xcf   : > { %380 = vmatmul.f32.gmra.mxu0 %v379_v51  ;;  %v4785_v51 = vsel %vm242_vm11, 1.0, %v8788_v27 }
  0xd0   : > { %v400_v36 = vsub.f32 %v4785_v51, %v4785_v51 }
  0xd1   : > { %696 = vmatmul.f32.gmra.mxu2 %v384_v53  ;;  %v5780_v53 = vpop.permute.xlu0 %220 }
  0xd2   : > { %8804 = vst [vmem:[#allocation47_spill] sm:$0xff] %v5780_v53  ;;  %vm8565_vm12 = vcmp.eq.s32.totalorder %v5572_v54, %v5780_v53  ;;  %v401_v15 = vand.u32 4294901760, %v400_v36 }
  0xd3   : > { %819 = vmatmul.f32.gmra.mxu3 %v385_v58  ;;  %v395_v58 = vand.u32 4294901760, %v394_v1 }
  0xd6   : > { %4800 = vmatmul.msk.f32.gmra.mxu1 %vm241_vm10, %v8787_v26 }
  0xd7   : > { %388 = vmatmul.f32.gmra.mxu0 %v387_v57  ;;  %v4786_v57 = vsel %vm8565_vm12, 1.0, %v8788_v27 }
  0xd8   : > { %v408_v51 = vsub.f32 %v4786_v57, %v4786_v57 }
  0xd9   : > { %701 = vmatmul.f32.gmra.mxu2 %v392_v4  ;;  %v402_v4 = vsub.f32 %v400_v36, %v401_v15  ;;  %v5816_v53 = vpop.permute.xlu0 %229 }
  0xda   : > { %v409_v1 = vand.u32 4294901760, %v408_v51  ;;  %8807 = vst [vmem:[#allocation50_spill] sm:$0xff] %v5816_v53  ;;  %vm8582_vm15 = vcmp.eq.s32.totalorder %v5572_v54, %v5816_v53 }
  0xdb   : > { %825 = vmatmul.f32.gmra.mxu3 %v393_v63  ;;  %v403_v63 = vand.u32 4294901760, %v402_v4 }
  0xde   : > { %4801 = vmatmul.msk.f32.gmra.mxu1 %vm242_vm11, %v8787_v26 }
  0xdf   : > { %396 = vmatmul.f32.gmra.mxu0 %v395_v58  ;;  %v4787_v58 = vsel %vm8568_vm13, 1.0, %v8788_v27 }
  0xe0   : > { %v416_v57 = vsub.f32 %v4787_v58, %v4787_v58 }
  0xe1   : > { %706 = vmatmul.f32.gmra.mxu2 %v400_v36  ;;  %v410_v36 = vsub.f32 %v408_v51, %v409_v1 }
  0xe2   : > { %v417_v4 = vand.u32 4294901760, %v416_v57 }
  0xe3   : > { %831 = vmatmul.f32.gmra.mxu3 %v401_v15  ;;  %v411_v15 = vand.u32 4294901760, %v410_v36 }
  0xe6   : > { %4802 = vmatmul.msk.f32.gmra.mxu1 %vm8565_vm12, %v8787_v26  ;;  %vm1133_vm12 = vcmp.eq.s32.totalorder %v5572_v54, %v5818_v3 }
  0xe7   : > { %404 = vmatmul.f32.gmra.mxu0 %v403_v63  ;;  %v4788_v63 = vsel %vm8575_vm14, 1.0, %v8788_v27 }
  0xe8   : > { %v424_v58 = vsub.f32 %v4788_v63, %v4788_v63 }
  0xe9   : > { %711 = vmatmul.f32.gmra.mxu2 %v408_v51  ;;  %v418_v51 = vsub.f32 %v416_v57, %v417_v4 }
  0xea   : > { %v425_v36 = vand.u32 4294901760, %v424_v58 }
  0xeb   : > { %837 = vmatmul.f32.gmra.mxu3 %v409_v1  ;;  %v419_v1 = vand.u32 4294901760, %v418_v51 }
  0xee   : > { %4803 = vmatmul.msk.f32.gmra.mxu1 %vm8568_vm13, %v8787_v26  ;;  %vm1134_vm13 = vcmp.eq.s32.totalorder %v5572_v54, %v5838_v60  ;;  %v8885_v60 = vld [vmem:[#allocation10_spill] sm:$0xff] }
  0xef   : > { %412 = vmatmul.f32.gmra.mxu0 %v411_v15  ;;  %v4838_v15 = vsel %vm1133_vm12, 1.0, %v8788_v27 }
  0xf0   : > { %v5836_v63 = vsub.f32 %v4838_v15, %v4838_v15 }
  0xf1   : > { %716 = vmatmul.f32.gmra.mxu2 %v416_v57  ;;  %v4789_v57 = vsel %vm8582_vm15, 1.0, %v8788_v27 }
  0xf2   : > { %v432_v51 = vsub.f32 %v4789_v57, %v4789_v57  ;;  %v8584_v22 = vand.u32 4294901760, %v5836_v63  ;;  %v5856_v57 = vpop.permute.xlu0 %1092 }
  0xf3   : > { %843 = vmatmul.f32.gmra.mxu3 %v417_v4  ;;  %v426_v4 = vsub.f32 %v424_v58, %v425_v36 }
  0xf4   : > { %v433_v28 = vand.u32 4294901760, %v432_v51 }
  0xf5   : > { %v427_v21 = vand.u32 4294901760, %v426_v4 }
  0xf6   : > { %4804 = vmatmul.msk.f32.gmra.mxu1 %vm8575_vm14, %v8787_v26  ;;  %v434_v15 = vsub.f32 %v432_v51, %v433_v28  ;;  %vm1135_vm14 = vcmp.eq.s32.totalorder %v5572_v54, %v5856_v57  ;;  %v8891_v57 = vld [vmem:[#allocation18_spill] sm:$0xff] }
  0xf7   : > { %420 = vmatmul.f32.gmra.mxu0 %v419_v1  ;;  %v4839_v1 = vsel %vm1134_vm13, 1.0, %v8788_v27 }
  0xf8   : > { %v435_v5 = vand.u32 4294901760, %v434_v15 }
  0xf9   : > { %721 = vmatmul.f32.gmra.mxu2 %v424_v58  ;;  %v5851_v58 = vsub.f32 %v4839_v1, %v4839_v1  ;;  %v5877_v1 = vpop.permute.xlu1 %1095 }
  0xfb   : > { %849 = vmatmul.f32.gmra.mxu3 %v425_v36  ;;  %v1216_v36 = vsub.f32 %v5836_v63, %v8584_v22  ;;  %v8583_v53 = vand.u32 4294901760, %v5851_v58 }
  0xfd   : > { %v1217_v20 = vand.u32 4294901760, %v1216_v36 }
  0xfe   : > { %4805 = vmatmul.msk.f32.gmra.mxu1 %vm8582_vm15, %v8787_v26  ;;  %vm1136_vm15 = vcmp.eq.s32.totalorder %v5572_v54, %v5877_v1 }
  0xff   : > { %428 = vmatmul.f32.gmra.mxu0 %v427_v21  ;;  %v4840_v21 = vsel %vm1135_vm14, 1.0, %v8788_v27 }
 0x101   : > { %726 = vmatmul.f32.gmra.mxu2 %v432_v51  ;;  %v5870_v51 = vsub.f32 %v4840_v21, %v4840_v21 }
 0x103   : > { %v538_v4 = vpop.f32.mrf.mxu1  ;;  %855 = vmatmul.f32.gmra.mxu3 %v433_v28  ;;  %v1224_v28 = vsub.f32 %v5851_v58, %v8583_v53  ;;  %v8586_v53 = vand.u32 4294901760, %v5870_v51 }
 0x105   : > { %v1225_v21 = vand.u32 4294901760, %v1224_v28 }
 0x106   : > { %4822 = vmatmul.msk.f32.vlgmr.msrb.gmra.mxu1 %vm231_vm0, %v8787_v26 }
 0x107   : > { %436 = vmatmul.f32.gmra.mxu0 %v435_v5  ;;  %2249 = vmatpush.msrb.mxu1 %v5229_v33 }
 0x109   : > { %1218 = vmatmul.f32.vlgmr.msrb.gmra.mxu2 %v1217_v20  ;;  %2255 = vmatpush.msrb.mxu1 %v5245_v38 }
 0x10a   : > { %2407 = vmatpush.msrb.mxu2 %v5174_v16 }
 0x10b   : > { %v542_v15 = vpop.f32.mrf.mxu1  ;;  %4854 = vmatmul.msk.f32.vlgmr.msrb.gmra.mxu3 %vm1133_vm12, %v8787_v26  ;;  %2261 = vmatpush.msrb.mxu1 %v5256_v42 }
 0x10c   : > { %v317_v5 = vpop.f32.mrf.mxu0  ;;  %v652_v20 = vpop.f32.mrf.mxu2  ;;  %2535 = vmatpush.msrb.mxu3 %v5152_v8  ;;  %2410 = vmatpush.msrb.mxu2 %v8785_v23 }
 0x10d   : > { %v539_v36 = vadd.f32 %v538_v4, %v317_v5  ;;  %2267 = vmatpush.msrb.mxu1 %v5277_v49  ;;  %v4841_v4 = vsel %vm1136_vm15, 1.0, %v8788_v27  ;;  %v1232_v5 = vsub.f32 %v5870_v51, %v8586_v53 }
 0x10e   : > { %v766_v22 = vpop.f32.mrf.mxu3  ;;  %4823 = vmatmul.msk.f32.gmra.mxu1 %vm232_vm2, %v8787_v26  ;;  %2537 = vmatpush.msrb.mxu3 %v5164_v12  ;;  %v5914_v37 = vsub.f32 %v4841_v4, %v4841_v4 }
 0x10f   : > { %v653_v16 = vadd.f32 %v652_v20, %v539_v36  ;;  %4806 = vmatmul.msk.f32.vlgmr.msrb.gmra.mxu0 %vm231_vm0, %v8787_v26  ;;  %2413 = vmatpush.msrb.mxu2 %v8786_v50  ;;  %v5916_v20 = vpop.permute.xlu2 %1098  ;;  %v1233_v4 = vand.u32 4294901760, %v1232_v5  ;;  %v8817_v50 = vld [vmem:[#allocation33_spill] sm:$0xff] }
 0x110   : > { %2084 = vmatpush.msrb.mxu0 %v5152_v8  ;;  %2539 = vmatpush.msrb.mxu3 %v5166_v13  ;;  %vm1137_vm0 = vcmp.eq.s32.totalorder %v5572_v54, %v5916_v20  ;;  %v8902_v20 = vld [vmem:[#allocation32_spill] sm:$0xff] }
 0x111   : > { %v5906_v28 = vadd.f32 %v766_v22, %v653_v16  ;;  %1226 = vmatmul.f32.gmra.mxu2 %v1225_v21  ;;  %2273 = vmatpush.msrb.mxu1 %v5298_v55  ;;  %v4842_v5 = vsel %vm1137_vm0, 1.0, %v8788_v27 }
 0x112   : > { %2086 = vmatpush.msrb.mxu0 %v5164_v12  ;;  %2416 = vmatpush.msrb.mxu2 %v8789_v6  ;;  %v5951_v47 = vsub.f32 %v4842_v5, %v4842_v5 }
 0x113   : > { %v546_v36 = vpop.f32.mrf.mxu1  ;;  %4855 = vmatmul.msk.f32.gmra.mxu3 %vm1134_vm13, %v8787_v26  ;;  %2279 = vmatpush.msrb.mxu1 %v5330_v7 }
 0x114   : > { %v325_v16 = vpop.f32.mrf.mxu0  ;;  %v657_v22 = vpop.f32.mrf.mxu2  ;;  %2088 = vmatpush.msrb.mxu0 %v5166_v13  ;;  %2541 = vmatpush.msrb.mxu3 %v5168_v14 }
 0x115   : > { %v543_v21 = vadd.f32 %v542_v15, %v325_v16  ;;  %2419 = vmatpush.msrb.mxu2 %v8790_v30  ;;  %2285 = vmatpush.msrb.mxu1 %v5343_v29  ;;  %v8589_v15 = vand.u32 4294901760, %v5914_v37 }
 0x116   : > { %v772_v53 = vpop.f32.mrf.mxu3  ;;  %4824 = vmatmul.msk.f32.gmra.mxu1 %vm233_vm1, %v8787_v26  ;;  %2090 = vmatpush.msrb.mxu0 %v5168_v14 }
 0x117   : > { %v658_v6 = vadd.f32 %v657_v22, %v543_v21  ;;  %4807 = vmatmul.msk.f32.gmra.mxu0 %vm232_vm2, %v8787_v26  ;;  %2543 = vmatpush.msrb.mxu3 %v5177_v17  ;;  %v5953_v22 = vpop.permute.xlu1 %1101 }
 0x118   : > { %2092 = vmatpush.msrb.mxu0 %v5177_v17  ;;  %2422 = vmatpush.msrb.mxu2 %v8791_v18  ;;  %8808 = vst [vmem:[#allocation51_spill] sm:$0xff] %v5953_v22  ;;  %vm1138_vm2 = vcmp.eq.s32.totalorder %v5572_v54, %v5953_v22 }
 0x119   : > { %v5946_v16 = vadd.f32 %v772_v53, %v658_v6  ;;  %1234 = vmatmul.f32.gmra.mxu2 %v1233_v4  ;;  %2545 = vmatpush.msrb.mxu3 %v5249_v40  ;;  %v1240_v6 = vsub.f32 %v5914_v37, %v8589_v15 }
 0x11a   : > { %2094 = vmatpush.msrb.mxu0 %v5249_v40  ;;  %2425 = vmatpush.msrb.mxu2 %v8792_v31 }
 0x11b   : > { %v550_v21 = vpop.f32.mrf.mxu1  ;;  %4856 = vmatmul.msk.f32.gmra.mxu3 %vm1135_vm14, %v8787_v26  ;;  %2291 = vmatpush.msrb.mxu1 %v5368_v41  ;;  %v1241_v18 = vand.u32 4294901760, %v1240_v6  ;;  %v5993_v6 = vpop.permute.xlu2 %1104 }
 0x11c   : > { %v333_v53 = vpop.f32.mrf.mxu0  ;;  %v662_v4 = vpop.f32.mrf.mxu2  ;;  %2096 = vmatpush.msrb.mxu0 %v5259_v43  ;;  %2547 = vmatpush.msrb.mxu3 %v5259_v43  ;;  %8809 = vst [vmem:[#allocation52_spill] sm:$0xff] %v5993_v6 }
 0x11d   : > { %v547_v5 = vadd.f32 %v546_v36, %v333_v53  ;;  %2428 = vmatpush.msrb.mxu2 %v8793_v61  ;;  %2297 = vmatpush.msrb.mxu1 %v5389_v0  ;;  %v8592_v36 = vand.u32 4294901760, %v5951_v47  ;;  %v4843_v53 = vsel %vm1138_vm2, 1.0, %v8788_v27 }
 0x11e   : > { %v778_v31 = vpop.f32.mrf.mxu3  ;;  %4825 = vmatmul.msk.f32.gmra.mxu1 %vm234_vm3, %v8787_v26  ;;  %2098 = vmatpush.msrb.mxu0 %v5261_v44  ;;  %v5991_v2 = vsub.f32 %v4843_v53, %v4843_v53 }
 0x11f   : > { %v663_v15 = vadd.f32 %v662_v4, %v547_v5  ;;  %4808 = vmatmul.msk.f32.gmra.mxu0 %vm233_vm1, %v8787_v26  ;;  %2549 = vmatpush.msrb.mxu3 %v5261_v44  ;;  %vm1139_vm1 = vcmp.eq.s32.totalorder %v5572_v54, %v5993_v6 }
 0x120   : > { %2431 = vmatpush.msrb.mxu2 %v8794_v48  ;;  %2100 = vmatpush.msrb.mxu0 %v5263_v45  ;;  %v8815_v48 = vld [vmem:[#allocation32_spill] sm:$0xff] }
 0x121   : > { %v5986_v4 = vadd.f32 %v778_v31, %v663_v15  ;;  %1242 = vmatmul.f32.gmra.mxu2 %v1241_v18  ;;  %2551 = vmatpush.msrb.mxu3 %v5263_v45  ;;  %v1248_v18 = vsub.f32 %v5951_v47, %v8592_v36 }
 0x122   : > { %2434 = vmatpush.msrb.mxu2 %v8795_v35  ;;  %2102 = vmatpush.msrb.mxu0 %v5333_v9 }
 0x123   : > { %v554_v5 = vpop.f32.mrf.mxu1  ;;  %4857 = vmatmul.msk.f32.gmra.mxu3 %vm1136_vm15, %v8787_v26  ;;  %2303 = vmatpush.msrb.mxu1 %v5409_v46 }
 0x124   : > { %v341_v31 = vpop.f32.mrf.mxu0  ;;  %v667_v15 = vpop.f32.mrf.mxu2  ;;  %2553 = vmatpush.msrb.mxu3 %v5333_v9  ;;  %2437 = vmatpush.msrb.mxu2 %v8796_v39  ;;  %v1249_v39 = vand.u32 4294901760, %v1248_v18 }
 0x125   : > { %v551_v53 = vadd.f32 %v550_v21, %v341_v31  ;;  %2104 = vmatpush.msrb.mxu0 %v5335_v10  ;;  %2309 = vmatpush.msrb.mxu1 %v5415_v24  ;;  %v4844_v31 = vsel %vm1139_vm1, 1.0, %v8788_v27  ;;  %v6033_v18 = vpop.permute.xlu0 %1107 }
 0x126   : > { %v784_v35 = vpop.f32.mrf.mxu3  ;;  %4826 = vmatmul.msk.f32.gmra.mxu1 %vm235_vm4, %v8787_v26  ;;  %2555 = vmatpush.msrb.mxu3 %v5335_v10  ;;  %v6031_v25 = vsub.f32 %v4844_v31, %v4844_v31  ;;  %8812 = vst [vmem:[#allocation53_spill] sm:$0xff] %v6033_v18 }
 0x127   : > { %v668_v36 = vadd.f32 %v667_v15, %v551_v53  ;;  %4809 = vmatmul.msk.f32.gmra.mxu0 %vm234_vm3, %v8787_v26  ;;  %2440 = vmatpush.msrb.mxu2 %v8798_v62  ;;  %v8810_v53 = vld [vmem:[#allocation29_spill] sm:$0xff]  ;;  %vm1140_vm3 = vcmp.eq.s32.totalorder %v5572_v54, %v6033_v18 }
 0x128   : > { %2106 = vmatpush.msrb.mxu0 %v5337_v11  ;;  %2557 = vmatpush.msrb.mxu3 %v5337_v11  ;;  %8811 = vst [vmem:[#allocation29_spill] sm:$0xff] %v6031_v25  ;;  %v4845_v30 = vsel %vm1140_vm3, 1.0, %v8788_v27 }
 0x129   : > { %v6026_v15 = vadd.f32 %v784_v35, %v668_v36  ;;  %1250 = vmatmul.f32.gmra.mxu2 %v1249_v39  ;;  %2315 = vmatpush.msrb.mxu1 %v8810_v53  ;;  %v8813_v35 = vand.u32 4294901760, %v5991_v2  ;;  %v8814_v36 = vld [vmem:[#allocation31_spill] sm:$0xff] }
 0x12a   : > { %2443 = vmatpush.msrb.mxu2 %v5372_v59  ;;  %2108 = vmatpush.msrb.mxu0 %v5348_v32 }
 0x12b   : > { %v558_v21 = vpop.f32.mrf.mxu1  ;;  %4858 = vmatmul.msk.f32.gmra.mxu3 %vm1137_vm0, %v8787_v26  ;;  %v1256_v39 = vsub.f32 %v5991_v2, %v8813_v35  ;;  %2321 = vmatpush.msrb.mxu1 %v8814_v36 }
 0x12c   : > { %v349_v62 = vpop.f32.mrf.mxu0  ;;  %v672_v59 = vpop.f32.mrf.mxu2  ;;  %2559 = vmatpush.msrb.mxu3 %v5348_v32  ;;  %2446 = vmatpush.msrb.mxu2 %v5423_v52 }
 0x12d   : > { %v555_v31 = vadd.f32 %v554_v5, %v349_v62  ;;  %2110 = vmatpush.msrb.mxu0 %v5412_v34  ;;  %2327 = vmatpush.msrb.mxu1 %v8815_v48  ;;  %v1257_v52 = vand.u32 4294901760, %v1256_v39  ;;  %v8816_v5 = vld [vmem:[#allocation34_spill] sm:$0xff]  ;;  %v8820_v39 = vld [vmem:[#allocation37_spill] sm:$0xff]  ;;  %v6071_v62 = vpop.permute.xlu1 %1110 }
 0x12e   : > { %v790_v61 = vpop.f32.mrf.mxu3  ;;  %4827 = vmatmul.msk.f32.gmra.mxu1 %vm236_vm5, %v8787_v26  ;;  %2561 = vmatpush.msrb.mxu3 %v5412_v34  ;;  %8821 = vst [vmem:[#allocation31_spill] sm:$0xff] %v6071_v62 }
 0x12f   : > { %v673_v35 = vadd.f32 %v672_v59, %v555_v31  ;;  %4810 = vmatmul.msk.f32.gmra.mxu0 %vm235_vm4, %v8787_v26  ;;  %2449 = vmatpush.msrb.mxu2 %v8816_v5  ;;  %v8818_v31 = vld [vmem:[#allocation36_spill] sm:$0xff]  ;;  %v6073_v5 = vsub.f32 %v4845_v30, %v4845_v30  ;;  %vm1141_vm4 = vcmp.eq.s32.totalorder %v5572_v54, %v6071_v62  ;;  %v5090_v62 = vmov 2  }
 0x130   : > { %2112 = vmatpush.msrb.mxu0 %v8817_v50  ;;  %2563 = vmatpush.msrb.mxu3 %v8817_v50 }
 0x131   : > { %v6066_v59 = vadd.f32 %v790_v61, %v673_v35  ;;  %1258 = vmatmul.f32.gmra.mxu2 %v1257_v52  ;;  %2333 = vmatpush.msrb.mxu1 %v8818_v31  ;;  %8822 = vst [vmem:[#allocation54_spill] sm:$0xff] %v6073_v5  ;;  %v8823_v61 = vand.u32 4294901760, %v6031_v25  ;;  %v8824_v35 = vld [vmem:[#allocation40_spill] sm:$0xff] }
 0x132   : > { %2452 = vmatpush.msrb.mxu2 %v8819_v19  ;;  %2114 = vmatpush.msrb.mxu0 %v8820_v39 }
 0x133   : > { %v562_v23 = vpop.f32.mrf.mxu1  ;;  %4859 = vmatmul.msk.f32.gmra.mxu3 %vm1138_vm2, %v8787_v26  ;;  %v1264_v52 = vsub.f32 %v6031_v25, %v8823_v61  ;;  %2339 = vmatpush.msrb.mxu1 %v8824_v35  ;;  %v8610_v25 = vand.u32 4294901760, %v6073_v5 }
 0x134   : > { %v357_v31 = vpop.f32.mrf.mxu0  ;;  %v677_v19 = vpop.f32.mrf.mxu2  ;;  %2565 = vmatpush.msrb.mxu3 %v8820_v39  ;;  %5057 = vset.pattern.permute.xlu1 %v5090_v62 }
 0x135   : > { %v559_v30 = vadd.f32 %v558_v21, %v357_v31  ;;  %v1265_v61 = vand.u32 4294901760, %v1264_v52  ;;  %v4846_v21 = vsel %vm1141_vm4, 1.0, %v8788_v27  ;;  %v6103_v39 = vpop.permute.xlu2 %1113  ;;  %v1272_v56 = vsub.f32 %v6073_v5, %v8610_v25  ;;  %5056 = vset.pattern.permute.xlu0 %v5090_v62  ;;  %5058 = vset.pattern.permute.xlu2 %v5090_v62 }
 0x136   : > { %v796_v50 = vpop.f32.mrf.mxu3  ;;  %4828 = vmatmul.msk.f32.gmra.mxu1 %vm237_vm6, %v8787_v26  ;;  %v6101_v35 = vsub.f32 %v4846_v21, %v4846_v21  ;;  %8828 = vst [vmem:[#allocation56_spill] sm:$0xff] %v6103_v39 }
 0x137   : > { %v678_v22 = vadd.f32 %v677_v19, %v559_v30  ;;  %4811 = vmatmul.msk.f32.gmra.mxu0 %vm236_vm5, %v8787_v26  ;;  %vm1142_vm5 = vcmp.eq.s32.totalorder %v5572_v54, %v6103_v39  ;;  %v1273_v6 = vand.u32 4294901760, %v1272_v56 }
 0x138   : > { %8827 = vst [vmem:[#allocation55_spill] sm:$0xff] %v6101_v35  ;;  %v8615_v25 = vand.u32 4294901760, %v6101_v35 }
 0x139   : > { %v6099_v31 = vadd.f32 %v796_v50, %v678_v22  ;;  %1266 = vmatmul.f32.gmra.mxu2 %v1265_v61 }
 0x13a   : > { %v1280_v48 = vsub.f32 %v6101_v35, %v8615_v25  ;;  %v6157_v35 = vpop.permute.xlu1 %1119 }
 0x13b   : > { %8826 = vst [vmem:[#allocation41_spill] sm:$0xff] %v6099_v31  ;;  %v566_v19 = vpop.f32.mrf.mxu1  ;;  %4860 = vmatmul.msk.f32.gmra.mxu3 %vm1139_vm1, %v8787_v26  ;;  %v6131_v31 = vpop.permute.xlu0 %1116 }
 0x13c   : > { %v365_v52 = vpop.f32.mrf.mxu0  ;;  %v682_v30 = vpop.f32.mrf.mxu2  ;;  %8832 = vst [vmem:[#allocation58_spill] sm:$0xff] %v6131_v31  ;;  %v1281_v18 = vand.u32 4294901760, %v1280_v48 }
 0x13d   : > { %v563_v50 = vadd.f32 %v562_v23, %v365_v52  ;;  %v4847_v23 = vsel %vm1142_vm5, 1.0, %v8788_v27  ;;  %8835 = vst [vmem:[#allocation59_spill] sm:$0xff] %v6157_v35 }
 0x13e   : > { %v802_v22 = vpop.f32.mrf.mxu3  ;;  %4829 = vmatmul.msk.f32.gmra.mxu1 %vm238_vm7, %v8787_v26  ;;  %v6129_v5 = vsub.f32 %v4847_v23, %v4847_v23 }
 0x13f   : > { %v683_v21 = vadd.f32 %v682_v30, %v563_v50  ;;  %4812 = vmatmul.msk.f32.gmra.mxu0 %vm237_vm6, %v8787_v26  ;;  %vm1143_vm6 = vcmp.eq.s32.totalorder %v5572_v54, %v6131_v31 }
 0x140   : > { %8831 = vst [vmem:[#allocation57_spill] sm:$0xff] %v6129_v5  ;;  %v8618_v25 = vand.u32 4294901760, %v6129_v5 }
 0x141   : > { %v6127_v52 = vadd.f32 %v802_v22, %v683_v21  ;;  %1274 = vmatmul.f32.gmra.mxu2 %v1273_v6  ;;  %v6190_v21 = vld [vmem:[%s5124_s15] sm:$0xff] }
 0x142   : > { %v1288_v61 = vsub.f32 %v6129_v5, %v8618_v25  ;;  %8840 = vst [vmem:[#allocation62_spill] sm:$0xff] %v6190_v21  ;;  %1988 = vperm.xlu0 %5056, %v6190_v21   ;;  %v6273_v39 = vpop.permute.xlu1 %1128 }
 0x143   : > { %8830 = vst [vmem:[#allocation42_spill] sm:$0xff] %v6127_v52  ;;  %v570_v30 = vpop.f32.mrf.mxu1  ;;  %4861 = vmatmul.msk.f32.gmra.mxu3 %vm1140_vm3, %v8787_v26 }
 0x144   : > { %v373_v56 = vpop.f32.mrf.mxu0  ;;  %v687_v50 = vpop.f32.mrf.mxu2  ;;  %v1289_v25 = vand.u32 4294901760, %v1288_v61  ;;  %8855 = vst [vmem:[#allocation72_spill] sm:$0xff] %v6273_v39 }
 0x145   : > { %v567_v6 = vadd.f32 %v566_v19, %v373_v56  ;;  %v4848_v19 = vsel %vm1143_vm6, 1.0, %v8788_v27 }
 0x146   : > { %v808_v22 = vpop.f32.mrf.mxu3  ;;  %4830 = vmatmul.msk.f32.gmra.mxu1 %vm239_vm8, %v8787_v26  ;;  %v6159_v52 = vsub.f32 %v4848_v19, %v4848_v19 }
 0x147   : > { %v688_v23 = vadd.f32 %v687_v50, %v567_v6  ;;  %4813 = vmatmul.msk.f32.gmra.mxu0 %vm238_vm7, %v8787_v26  ;;  %vm8640_vm7 = vcmp.eq.s32.totalorder %v5572_v54, %v6157_v35  ;;  %v8858_v35 = vld [vmem:[#allocation47_spill] sm:$0xff] }
 0x148   : > { %8836 = vst [vmem:[#allocation60_spill] sm:$0xff] %v6159_v52 }
 0x149   : > { %v6155_v56 = vadd.f32 %v808_v22, %v688_v23  ;;  %1282 = vmatmul.f32.gmra.mxu2 %v1281_v18  ;;  %v6233_v23 = vpop.permute.xlu0 %1125 }
 0x14a   : > { %8848 = vst [vmem:[#allocation67_spill] sm:$0xff] %v6233_v23 }
 0x14b   : > { %8834 = vst [vmem:[#allocation43_spill] sm:$0xff] %v6155_v56  ;;  %v574_v50 = vpop.f32.mrf.mxu1  ;;  %4862 = vmatmul.msk.f32.gmra.mxu3 %vm1141_vm4, %v8787_v26 }
 0x14c   : > { %v381_v48 = vpop.f32.mrf.mxu0  ;;  %v692_v6 = vpop.f32.mrf.mxu2 }
 0x14d   : > { %v571_v18 = vadd.f32 %v570_v30, %v381_v48  ;;  %v4849_v30 = vsel %vm8640_vm7, 1.0, %v8788_v27  ;;  %v6184_v48 = vld [vmem:[%s5124_s15 + $0x8] sm:$0xff] }
 0x14e   : > { %v814_v22 = vpop.f32.mrf.mxu3  ;;  %4831 = vmatmul.msk.f32.gmra.mxu1 %vm240_vm9, %v8787_v26  ;;  %8838 = vst [vmem:[#allocation44_spill] sm:$0xff] %v6184_v48  ;;  %1991 = vperm.xlu1 %5057, %v6184_v48   ;;  %v6193_v61 = vsub.f32 %v4849_v30, %v4849_v30 }
 0x14f   : > { %v693_v19 = vadd.f32 %v692_v6, %v571_v18  ;;  %4814 = vmatmul.msk.f32.gmra.mxu0 %vm239_vm8, %v8787_v26  ;;  %v6195_v18 = vpop.permute.xlu2 %1122 }
 0x150   : > { %8841 = vst [vmem:[#allocation63_spill] sm:$0xff] %v6193_v61  ;;  %vm8650_vm8 = vcmp.eq.s32.totalorder %v5572_v54, %v6195_v18 }
 0x151   : > { %v6187_v6 = vadd.f32 %v814_v22, %v693_v19  ;;  %1290 = vmatmul.f32.gmra.mxu2 %v1289_v25  ;;  %8842 = vst [vmem:[#allocation64_spill] sm:$0xff] %v6195_v18  ;;  %v8843_v22 = vand.u32 4294901760, %v6159_v52  ;;  %v6205_v19 = vld [vmem:[%s5124_s15 + $0x10] sm:$0xff] }
 0x152   : > { %1994 = vperm.xlu2 %5058, %v6205_v19   ;;  %v8865_v18 = vld [vmem:[#allocation48_spill] sm:$0xff] }
 0x153   : > { %8839 = vst [vmem:[#allocation61_spill] sm:$0xff] %v6187_v6  ;;  %v578_v5 = vpop.f32.mrf.mxu1  ;;  %4863 = vmatmul.msk.f32.gmra.mxu3 %vm1142_vm5, %v8787_v26  ;;  %v1296_v25 = vsub.f32 %v6159_v52, %v8843_v22  ;;  %v8633_v52 = vand.u32 4294901760, %v6193_v61 }
 0x154   : > { %v389_v62 = vpop.f32.mrf.mxu0  ;;  %v697_v30 = vpop.f32.mrf.mxu2 }
 0x155   : > { %v575_v6 = vadd.f32 %v574_v50, %v389_v62  ;;  %v1297_v22 = vand.u32 4294901760, %v1296_v25  ;;  %v4850_v50 = vsel %vm8650_vm8, 1.0, %v8788_v27  ;;  %v6224_v62 = vld [vmem:[%s5124_s15 + $0x18] sm:$0xff] }
 0x156   : > { %v820_v56 = vpop.f32.mrf.mxu3  ;;  %4832 = vmatmul.msk.f32.gmra.mxu1 %vm241_vm10, %v8787_v26  ;;  %8845 = vst [vmem:[#allocation45_spill] sm:$0xff] %v6224_v62  ;;  %1997 = vperm.xlu1 %5057, %v6224_v62   ;;  %v6235_v25 = vsub.f32 %v4850_v50, %v4850_v50 }
 0x157   : > { %v698_v48 = vadd.f32 %v697_v30, %v575_v6  ;;  %4815 = vmatmul.msk.f32.gmra.mxu0 %vm240_vm9, %v8787_v26  ;;  %v6230_v6 = vld [vmem:[%s5124_s15 + $0x28] sm:$0xff]  ;;  %vm1146_vm9 = vcmp.eq.s32.totalorder %v5572_v54, %v6233_v23  ;;  %v6313_v31 = vpop.permute.xlu2 %1131  ;;  %v6376_v23 = vld [vmem:[%s5124_s15 + $0x78] sm:$0xff] }
 0x158   : > { %8847 = vst [vmem:[#allocation66_spill] sm:$0xff] %v6230_v6  ;;  %2003 = vperm.xlu0 %5056, %v6230_v6  }
 0x159   : > { %v6227_v21 = vadd.f32 %v820_v56, %v698_v48  ;;  %1298 = vmatmul.f32.gmra.mxu2 %v1297_v22  ;;  %8849 = vst [vmem:[#allocation68_spill] sm:$0xff] %v6235_v25  ;;  %v1304_v56 = vsub.f32 %v6193_v61, %v8633_v52  ;;  %v6245_v48 = vld [vmem:[%s5124_s15 + $0x20] sm:$0xff]  ;;  %v8642_v61 = vand.u32 4294901760, %v6235_v25 }
 0x15a   : > { %8850 = vst [vmem:[#allocation69_spill] sm:$0xff] %v6245_v48  ;;  %2000 = vperm.xlu2 %5058, %v6245_v48  }
 0x15b   : > { %8846 = vst [vmem:[#allocation65_spill] sm:$0xff] %v6227_v21  ;;  %v582_v30 = vpop.f32.mrf.mxu1  ;;  %4864 = vmatmul.msk.f32.gmra.mxu3 %vm1143_vm6, %v8787_v26  ;;  %v1305_v52 = vand.u32 4294901760, %v1304_v56 }
 0x15c   : > { %v397_v22 = vpop.f32.mrf.mxu0  ;;  %v702_v21 = vpop.f32.mrf.mxu2 }
 0x15d   : > { %v579_v50 = vadd.f32 %v578_v5, %v397_v22  ;;  %v4851_v5 = vsel %vm1146_vm9, 1.0, %v8788_v27  ;;  %v6264_v22 = vld [vmem:[%s5124_s15 + $0x30] sm:$0xff] }
 0x15e   : > { %v826_v6 = vpop.f32.mrf.mxu3  ;;  %4833 = vmatmul.msk.f32.gmra.mxu1 %vm242_vm11, %v8787_v26  ;;  %8852 = vst [vmem:[#allocation46_spill] sm:$0xff] %v6264_v22  ;;  %2006 = vperm.xlu1 %5057, %v6264_v22   ;;  %v6275_v56 = vsub.f32 %v4851_v5, %v4851_v5 }
 0x15f   : > { %v703_v62 = vadd.f32 %v702_v21, %v579_v50  ;;  %4816 = vmatmul.msk.f32.gmra.mxu0 %vm241_vm10, %v8787_v26  ;;  %v6270_v21 = vld [vmem:[%s5124_s15 + $0x40] sm:$0xff]  ;;  %vm1147_vm10 = vcmp.eq.s32.totalorder %v5572_v54, %v6273_v39 }
 0x160   : > { %8854 = vst [vmem:[#allocation71_spill] sm:$0xff] %v6270_v21  ;;  %2012 = vperm.xlu0 %5056, %v6270_v21  }
 0x161   : > { %v6267_v48 = vadd.f32 %v826_v6, %v703_v62  ;;  %1306 = vmatmul.f32.gmra.mxu2 %v1305_v52  ;;  %8856 = vst [vmem:[#allocation73_spill] sm:$0xff] %v6275_v56  ;;  %v1312_v62 = vsub.f32 %v6235_v25, %v8642_v61  ;;  %v6285_v52 = vld [vmem:[%s5124_s15 + $0x38] sm:$0xff]  ;;  %v8651_v25 = vand.u32 4294901760, %v6275_v56 }
 0x162   : > { %8857 = vst [vmem:[#allocation74_spill] sm:$0xff] %v6285_v52  ;;  %2009 = vperm.xlu2 %5058, %v6285_v52  }
 0x163   : > { %8853 = vst [vmem:[#allocation70_spill] sm:$0xff] %v6267_v48  ;;  %v586_v50 = vpop.f32.mrf.mxu1  ;;  %4865 = vmatmul.msk.f32.gmra.mxu3 %vm8640_vm7, %v8787_v26  ;;  %vm8859_vm7 = vcmp.eq.s32.totalorder %v5572_v54, %v8858_v35  ;;  %v1313_v61 = vand.u32 4294901760, %v1312_v62 }
 0x164   : > { %v405_v6 = vpop.f32.mrf.mxu0  ;;  %v707_v48 = vpop.f32.mrf.mxu2 }
 0x165   : > { %v583_v5 = vadd.f32 %v582_v30, %v405_v6  ;;  %v4852_v30 = vsel %vm1147_vm10, 1.0, %v8788_v27  ;;  %v6304_v6 = vld [vmem:[%s5124_s15 + $0x48] sm:$0xff] }
 0x166   : > { %v832_v21 = vpop.f32.mrf.mxu3  ;;  %4834 = vmatmul.msk.f32.gmra.mxu1 %vm8859_vm7, %v8787_v26  ;;  %8860 = vst [vmem:[#allocation47_spill] sm:$0xff] %v6304_v6  ;;  %2015 = vperm.xlu1 %5057, %v6304_v6   ;;  %v6315_v62 = vsub.f32 %v4852_v30, %v4852_v30  ;;  %vm8866_vm7 = vcmp.eq.s32.totalorder %v5572_v54, %v8865_v18 }
 0x167   : > { %v708_v22 = vadd.f32 %v707_v48, %v583_v5  ;;  %4817 = vmatmul.msk.f32.gmra.mxu0 %vm242_vm11, %v8787_v26  ;;  %v6310_v48 = vld [vmem:[%s5124_s15 + $0x58] sm:$0xff]  ;;  %vm1148_vm11 = vcmp.eq.s32.totalorder %v5572_v54, %v6313_v31 }
 0x168   : > { %8862 = vst [vmem:[#allocation76_spill] sm:$0xff] %v6310_v48  ;;  %2021 = vperm.xlu0 %5056, %v6310_v48  }
 0x169   : > { %v6307_v52 = vadd.f32 %v832_v21, %v708_v22  ;;  %1314 = vmatmul.f32.gmra.mxu2 %v1313_v61  ;;  %8863 = vst [vmem:[#allocation77_spill] sm:$0xff] %v6315_v62  ;;  %v1320_v22 = vsub.f32 %v6275_v56, %v8651_v25  ;;  %v6325_v61 = vld [vmem:[%s5124_s15 + $0x50] sm:$0xff]  ;;  %v8657_v56 = vand.u32 4294901760, %v6315_v62 }
 0x16a   : > { %8864 = vst [vmem:[#allocation78_spill] sm:$0xff] %v6325_v61  ;;  %2018 = vperm.xlu2 %5058, %v6325_v61  }
 0x16b   : > { %8861 = vst [vmem:[#allocation75_spill] sm:$0xff] %v6307_v52  ;;  %v590_v5 = vpop.f32.mrf.mxu1  ;;  %4866 = vmatmul.msk.f32.gmra.mxu3 %vm8650_vm8, %v8787_v26  ;;  %vm8867_vm8 = vcmp.eq.s32.totalorder %v5572_v54, %v8858_v35  ;;  %v1321_v25 = vand.u32 4294901760, %v1320_v22 }
 0x16c   : > { %v413_v21 = vpop.f32.mrf.mxu0  ;;  %v712_v52 = vpop.f32.mrf.mxu2 }
 0x16d   : > { %v587_v30 = vadd.f32 %v586_v50, %v413_v21  ;;  %v4853_v50 = vsel %vm1148_vm11, 1.0, %v8788_v27  ;;  %v6344_v21 = vld [vmem:[%s5124_s15 + $0x60] sm:$0xff] }
 0x16e   : > { %v838_v48 = vpop.f32.mrf.mxu3  ;;  %4835 = vmatmul.msk.f32.gmra.mxu1 %vm8866_vm7, %v8787_v26  ;;  %2024 = vperm.xlu1 %5057, %v6344_v21   ;;  %v6353_v35 = vsub.f32 %v4853_v50, %v4853_v50  ;;  %v8872_v50 = vld [vmem:[#allocation49_spill] sm:$0xff] }
 0x16f   : > { %v713_v6 = vadd.f32 %v712_v52, %v587_v30  ;;  %4818 = vmatmul.msk.f32.gmra.mxu0 %vm8867_vm8, %v8787_v26  ;;  %v6350_v52 = vld [vmem:[%s5124_s15 + $0x70] sm:$0xff]  ;;  %v1328_v30 = vsub.f32 %v6315_v62, %v8657_v56  ;;  %vm8873_vm8 = vcmp.eq.s32.totalorder %v5572_v54, %v8872_v50  ;;  %8874 = vst [vmem:[#allocation49_spill] sm:$0xff] %v6376_v23 }
 0x170   : > { %8869 = vst [vmem:[#allocation79_spill] sm:$0xff] %v6350_v52  ;;  %2030 = vperm.xlu0 %5056, %v6350_v52   ;;  %v8664_v62 = vand.u32 4294901760, %v6353_v35 }
 0x171   : > { %v6347_v61 = vadd.f32 %v838_v48, %v713_v6  ;;  %1322 = vmatmul.f32.gmra.mxu2 %v1321_v25  ;;  %8870 = vst [vmem:[#allocation80_spill] sm:$0xff] %v6353_v35  ;;  %v6363_v6 = vld [vmem:[%s5124_s15 + $0x68] sm:$0xff]  ;;  %v1329_v56 = vand.u32 4294901760, %v1328_v30  ;;  %s5092_s15 = smov 32  }
 0x172   : > { %8871 = vst [vmem:[#allocation81_spill] sm:$0xff] %v6363_v6  ;;  %2027 = vperm.xlu2 %5058, %v6363_v6  }
 0x173   : > { %8868 = vst [vmem:[#allocation48_spill] sm:$0xff] %v6347_v61  ;;  %v594_v22 = vpop.f32.mrf.mxu1  ;;  %4867 = vmatmul.msk.f32.gmra.mxu3 %vm1146_vm9, %v8787_v26 }
 0x174   : > { %v421_v25 = vpop.f32.mrf.mxu0  ;;  %v717_v48 = vpop.f32.mrf.mxu2 }
 0x175   : > { %v591_v27 = vadd.f32 %v590_v5, %v421_v25 }
 0x176   : > { %v844_v61 = vpop.f32.mrf.mxu3  ;;  %4836 = vmatmul.msk.f32.gmra.mxu1 %vm8873_vm8, %v8787_v26  ;;  %2033 = vperm.xlu1 %5057, %v6376_v23   ;;  %v8875_v23 = vld [vmem:[#allocation50_spill] sm:$0xff] }
 0x177   : > { %v718_v52 = vadd.f32 %v717_v48, %v591_v27  ;;  %4819 = vmatmul.msk.f32.gmra.mxu0 %vm8866_vm7, %v8787_v26  ;;  %v1336_v27 = vsub.f32 %v6353_v35, %v8664_v62  ;;  %vm8876_vm8 = vcmp.eq.s32.totalorder %v5572_v54, %v8875_v23  ;;  %vm8877_vm7 = vcmp.eq.s32.totalorder %v5572_v54, %v8872_v50 }
 0x179   : > { %v6379_v5 = vadd.f32 %v844_v61, %v718_v52  ;;  %1330 = vmatmul.f32.gmra.mxu2 %v1329_v56  ;;  %v1337_v61 = vand.u32 4294901760, %v1336_v27  ;;  %v8879_v27 = vand.u32 4294901760, %v5851_v58 }
 0x17b   : > { %v598_v25 = vpop.f32.mrf.mxu1  ;;  %4868 = vmatmul.msk.f32.gmra.mxu3 %vm1147_vm10, %v8787_v26 }
 0x17c   : > { %v429_v18 = vpop.f32.mrf.mxu0  ;;  %v722_v30 = vpop.f32.mrf.mxu2 }
 0x17d   : > { %v595_v48 = vadd.f32 %v594_v22, %v429_v18 }
 0x17e   : > { %v850_v6 = vpop.f32.mrf.mxu3  ;;  %4837 = vmatmul.msk.f32.gmra.mxu1 %vm8876_vm8, %v8787_v26 }
 0x17f   : > { %v723_v56 = vadd.f32 %v722_v30, %v595_v48  ;;  %4820 = vmatmul.msk.f32.gmra.mxu0 %vm8877_vm7, %v8787_v26  ;;  %v8878_v30 = vand.u32 4294901760, %v5836_v63 }
 0x181   : > { %v6396_v52 = vadd.f32 %v850_v6, %v723_v56  ;;  %1338 = vmatmul.f32.gmra.mxu2 %v1337_v61 }
 0x183   : > { %v1022_v62 = vpop.f32.mrf.mxu1  ;;  %4869 = vmatmul.msk.f32.gmra.mxu3 %vm1148_vm11, %v8787_v26 }
 0x184   : > { %v437_v22 = vpop.f32.mrf.mxu0  ;;  %v727_v18 = vpop.f32.mrf.mxu2 }
 0x185   : > { %v599_v35 = vadd.f32 %v598_v25, %v437_v22 }
 0x186   : > { %v856_v39 = vpop.f32.mrf.mxu3  ;;  %1667 = vmatmul.f32.vlgmr.msra.gmra.mxu1 %v8878_v30 }
 0x187   : > { %v728_v48 = vadd.f32 %v727_v18, %v599_v35  ;;  %4821 = vmatmul.msk.f32.gmra.mxu0 %vm8876_vm8, %v8787_v26  ;;  %2793 = vmatpush.msra.mxu1 %v5152_v8  ;;  %v8884_v18 = vand.u32 4294901760, %v5870_v51 }
 0x189   : > { %v6409_v6 = vadd.f32 %v856_v39, %v728_v48  ;;  %4870 = vmatmul.msk.f32.vlgmr.msra.gmra.mxu2 %vm1133_vm12, %v8787_v26  ;;  %2795 = vmatpush.msra.mxu1 %v5164_v12 }
 0x18a   : > { %2986 = vmatpush.msra.mxu2 %v5152_v8 }
 0x18b   : > { %v1026_v50 = vpop.f32.mrf.mxu1  ;;  %4886 = vmatmul.msk.f32.vlgmr.msra.gmra.mxu3 %vm1133_vm12, %v8787_v26  ;;  %2797 = vmatpush.msra.mxu1 %v5166_v13 }
 0x18c   : > { %v925_v23 = vpop.f32.mrf.mxu0  ;;  %v1219_v39 = vpop.f32.mrf.mxu2  ;;  %3151 = vmatpush.msra.mxu3 %v5229_v33  ;;  %2988 = vmatpush.msra.mxu2 %v5164_v12  ;;  %v8881_v33 = vld [vmem:[#allocation6_spill] sm:$0xff] }
 0x18d   : > { %v926_v35 = vadd.f32 %v925_v23, %v5906_v28  ;;  %2799 = vmatpush.msra.mxu1 %v5168_v14  ;;  %v8889_v23 = vld [vmem:[#allocation17_spill] sm:$0xff] }
 0x18e   : > { %v1440_v25 = vpop.f32.mrf.mxu3  ;;  %1673 = vmatmul.f32.gmra.mxu1 %v8879_v27  ;;  %3157 = vmatpush.msra.mxu3 %v5245_v38  ;;  %v8882_v38 = vld [vmem:[#allocation8_spill] sm:$0xff] }
 0x18f   : > { %v6429_v3 = vadd.f32 %v1022_v62, %v926_v35  ;;  %v6431_v56 = vadd.f32 %v1440_v25, %v1219_v39  ;;  %1553 = vmatmul.f32.vlgmr.msra.gmra.mxu0 %v5836_v63  ;;  %2990 = vmatpush.msra.mxu2 %v5166_v13  ;;  %v8883_v62 = vld [vmem:[#allocation9_spill] sm:$0xff]  ;;  %v8890_v35 = vand.u32 4294901760, %v5914_v37 }
 0x190   : > { %2666 = vmatpush.msra.mxu0 %v8881_v33  ;;  %3163 = vmatpush.msra.mxu3 %v5256_v42 }
 0x191   : > { %8880 = vst [vmem:[#allocation50_spill] sm:$0xff] %v6429_v3  ;;  %4871 = vmatmul.msk.f32.gmra.mxu2 %vm1134_vm13, %v8787_v26  ;;  %2801 = vmatpush.msra.mxu1 %v5177_v17 }
 0x192   : > { %2670 = vmatpush.msra.mxu0 %v8882_v38  ;;  %2992 = vmatpush.msra.mxu2 %v5168_v14 }
 0x193   : > { %v1030_v28 = vpop.f32.mrf.mxu1  ;;  %4887 = vmatmul.msk.f32.gmra.mxu3 %vm1134_vm13, %v8787_v26  ;;  %2803 = vmatpush.msra.mxu1 %v5249_v40 }
 0x194   : > { %v929_v42 = vpop.f32.mrf.mxu0  ;;  %v1227_v63 = vpop.f32.mrf.mxu2  ;;  %2674 = vmatpush.msra.mxu0 %v8883_v62  ;;  %3169 = vmatpush.msra.mxu3 %v5277_v49  ;;  %v8887_v49 = vld [vmem:[#allocation11_spill] sm:$0xff] }
 0x195   : > { %v930_v61 = vadd.f32 %v929_v42, %v5946_v16  ;;  %2994 = vmatpush.msra.mxu2 %v5177_v17  ;;  %2805 = vmatpush.msra.mxu1 %v5259_v43  ;;  %v8888_v16 = vld [vmem:[#allocation16_spill] sm:$0xff]  ;;  %v8895_v42 = vld [vmem:[#allocation25_spill] sm:$0xff] }
 0x196   : > { %v1444_v22 = vpop.f32.mrf.mxu3  ;;  %1679 = vmatmul.f32.gmra.mxu1 %v8884_v18  ;;  %2678 = vmatpush.msra.mxu0 %v8885_v60 }
 0x197   : > { %v6457_v30 = vadd.f32 %v1026_v50, %v930_v61  ;;  %v6459_v48 = vadd.f32 %v1444_v22, %v1227_v63  ;;  %1558 = vmatmul.f32.gmra.mxu0 %v5851_v58  ;;  %3175 = vmatpush.msra.mxu3 %v5298_v55  ;;  %v8896_v61 = vand.u32 4294901760, %v5951_v47 }
 0x198   : > { %2682 = vmatpush.msra.mxu0 %v8887_v49  ;;  %2996 = vmatpush.msra.mxu2 %v5249_v40 }
 0x199   : > { %8886 = vst [vmem:[#allocation6_spill] sm:$0xff] %v6457_v30  ;;  %4872 = vmatmul.msk.f32.gmra.mxu2 %vm1135_vm14, %v8787_v26  ;;  %3181 = vmatpush.msra.mxu3 %v5330_v7 }
 0x19a   : > { %2686 = vmatpush.msra.mxu0 %v8888_v16  ;;  %2998 = vmatpush.msra.mxu2 %v5259_v43 }
 0x19b   : > { %v1034_v50 = vpop.f32.mrf.mxu1  ;;  %4888 = vmatmul.msk.f32.gmra.mxu3 %vm1135_vm14, %v8787_v26  ;;  %2807 = vmatpush.msra.mxu1 %v5261_v44 }
 0x19c   : > { %v933_v55 = vpop.f32.mrf.mxu0  ;;  %v1235_v58 = vpop.f32.mrf.mxu2  ;;  %2690 = vmatpush.msra.mxu0 %v8889_v23  ;;  %3187 = vmatpush.msra.mxu3 %v5343_v29  ;;  %v8893_v29 = vld [vmem:[#allocation19_spill] sm:$0xff] }
 0x19d   : > { %v934_v7 = vadd.f32 %v933_v55, %v5986_v4  ;;  %3000 = vmatpush.msra.mxu2 %v5261_v44  ;;  %2809 = vmatpush.msra.mxu1 %v5263_v45  ;;  %v8894_v4 = vld [vmem:[#allocation24_spill] sm:$0xff] }
 0x19e   : > { %v1448_v39 = vpop.f32.mrf.mxu3  ;;  %1685 = vmatmul.f32.gmra.mxu1 %v8890_v35  ;;  %2694 = vmatpush.msra.mxu0 %v8891_v57  ;;  %v8905_v35 = vld [vmem:[#allocation35_spill] sm:$0xff] }
 0x19f   : > { %v6485_v25 = vadd.f32 %v1030_v28, %v934_v7  ;;  %v6487_v27 = vadd.f32 %v1448_v39, %v1235_v58  ;;  %1563 = vmatmul.f32.gmra.mxu0 %v5870_v51  ;;  %3193 = vmatpush.msra.mxu3 %v5368_v41  ;;  %v8901_v58 = vand.u32 4294901760, %v5991_v2 }
 0x1a0   : > { %3002 = vmatpush.msra.mxu2 %v5263_v45  ;;  %2698 = vmatpush.msra.mxu0 %v8893_v29 }
 0x1a1   : > { %8892 = vst [vmem:[#allocation8_spill] sm:$0xff] %v6485_v25  ;;  %4873 = vmatmul.msk.f32.gmra.mxu2 %vm1136_vm15, %v8787_v26  ;;  %3199 = vmatpush.msra.mxu3 %v5389_v0 }
 0x1a2   : > { %3004 = vmatpush.msra.mxu2 %v5333_v9  ;;  %2702 = vmatpush.msra.mxu0 %v8894_v4 }
 0x1a3   : > { %v1038_v28 = vpop.f32.mrf.mxu1  ;;  %4889 = vmatmul.msk.f32.gmra.mxu3 %vm1136_vm15, %v8787_v26  ;;  %2811 = vmatpush.msra.mxu1 %v5333_v9 }
 0x1a4   : > { %v937_v41 = vpop.f32.mrf.mxu0  ;;  %v1243_v51 = vpop.f32.mrf.mxu2  ;;  %3205 = vmatpush.msra.mxu3 %v5409_v46  ;;  %3006 = vmatpush.msra.mxu2 %v5335_v10  ;;  %v8898_v46 = vld [vmem:[#allocation26_spill] sm:$0xff] }
 0x1a5   : > { %v938_v0 = vadd.f32 %v937_v41, %v6026_v15  ;;  %2706 = vmatpush.msra.mxu0 %v8895_v42  ;;  %2813 = vmatpush.msra.mxu1 %v5335_v10  ;;  %v8951_v41 = vld [vmem:[#allocation59_spill] sm:$0xff] }
 0x1a6   : > { %v1452_v63 = vpop.f32.mrf.mxu3  ;;  %1691 = vmatmul.f32.gmra.mxu1 %v8896_v61  ;;  %3211 = vmatpush.msra.mxu3 %v5415_v24  ;;  %v8899_v24 = vld [vmem:[#allocation27_spill] sm:$0xff]  ;;  %v8910_v61 = vld [vmem:[#allocation40_spill] sm:$0xff]  ;;  %vm8952_vm12 = vcmp.eq.s32.totalorder %v5572_v54, %v8951_v41 }
 0x1a7   : > { %v6513_v1 = vadd.f32 %v1034_v50, %v938_v0  ;;  %v6515_v22 = vadd.f32 %v1452_v63, %v1243_v51  ;;  %1568 = vmatmul.f32.gmra.mxu0 %v5914_v37  ;;  %3008 = vmatpush.msra.mxu2 %v5337_v11  ;;  %v8900_v50 = vld [vmem:[#allocation30_spill] sm:$0xff]  ;;  %v8908_v51 = vld [vmem:[#allocation37_spill] sm:$0xff]  ;;  %vm8954_vm13 = vmmov %vm8952_vm12 }
 0x1a8   : > { %2710 = vmatpush.msra.mxu0 %v8898_v46  ;;  %3217 = vmatpush.msra.mxu3 %v8810_v53  ;;  %v8960_v41 = vld [vmem:[#allocation64_spill] sm:$0xff] }
 0x1a9   : > { %8897 = vst [vmem:[#allocation9_spill] sm:$0xff] %v6513_v1  ;;  %4874 = vmatmul.msk.f32.gmra.mxu2 %vm1137_vm0, %v8787_v26  ;;  %2815 = vmatpush.msra.mxu1 %v5337_v11  ;;  %vm8961_vm14 = vcmp.eq.s32.totalorder %v5572_v54, %v8960_v41 }
 0x1aa   : > { %3010 = vmatpush.msra.mxu2 %v5348_v32  ;;  %2714 = vmatpush.msra.mxu0 %v8899_v24  ;;  %vm8963_vm15 = vmmov %vm8961_vm14 }
 0x1ab   : > { %v1042_v15 = vpop.f32.mrf.mxu1  ;;  %4890 = vmatmul.msk.f32.gmra.mxu3 %vm1137_vm0, %v8787_v26  ;;  %2817 = vmatpush.msra.mxu1 %v5348_v32 }
 0x1ac   : > { %v941_v37 = vpop.f32.mrf.mxu0  ;;  %v1251_v53 = vpop.f32.mrf.mxu2  ;;  %3223 = vmatpush.msra.mxu3 %v8814_v36  ;;  %3012 = vmatpush.msra.mxu2 %v5412_v34  ;;  %v8904_v36 = vld [vmem:[#allocation33_spill] sm:$0xff] }
 0x1ad   : > { %v942_v18 = vadd.f32 %v941_v37, %v6066_v59  ;;  %2718 = vmatpush.msra.mxu0 %v8900_v50  ;;  %2819 = vmatpush.msra.mxu1 %v5412_v34  ;;  %v8906_v59 = vld [vmem:[#allocation36_spill] sm:$0xff]  ;;  %v8911_v37 = vld [vmem:[#allocation41_spill] sm:$0xff] }
 0x1ae   : > { %v1456_v55 = vpop.f32.mrf.mxu3  ;;  %1697 = vmatmul.f32.gmra.mxu1 %v8901_v58  ;;  %3229 = vmatpush.msra.mxu3 %v8902_v20 }
 0x1af   : > { %v6541_v7 = vadd.f32 %v1038_v28, %v942_v18  ;;  %v6543_v39 = vadd.f32 %v1456_v55, %v1251_v53  ;;  %1573 = vmatmul.f32.gmra.mxu0 %v5951_v47  ;;  %3014 = vmatpush.msra.mxu2 %v8904_v36  ;;  %v8909_v28 = vld [vmem:[#allocation39_spill] sm:$0xff]  ;;  %v8912_v55 = vld [vmem:[#allocation29_spill] sm:$0xff] }
 0x1b0   : > { %2722 = vmatpush.msra.mxu0 %v8905_v35  ;;  %3235 = vmatpush.msra.mxu3 %v8906_v59  ;;  %v8913_v58 = vand.u32 4294901760, %v8912_v55 }
 0x1b1   : > { %8903 = vst [vmem:[#allocation10_spill] sm:$0xff] %v6541_v7  ;;  %4875 = vmatmul.msk.f32.gmra.mxu2 %vm1138_vm2, %v8787_v26  ;;  %2821 = vmatpush.msra.mxu1 %v8904_v36 }
 0x1b2   : > { %3016 = vmatpush.msra.mxu2 %v8908_v51  ;;  %2726 = vmatpush.msra.mxu0 %v8909_v28 }
 0x1b3   : > { %v1046_v0 = vpop.f32.mrf.mxu1  ;;  %4891 = vmatmul.msk.f32.gmra.mxu3 %vm1138_vm2, %v8787_v26  ;;  %2823 = vmatpush.msra.mxu1 %v8908_v51 }
 0x1b4   : > { %v945_v47 = vpop.f32.mrf.mxu0  ;;  %v1259_v63 = vpop.f32.mrf.mxu2  ;;  %3241 = vmatpush.msra.mxu3 %v8910_v61 }
 0x1b5   : > { %v946_v53 = vadd.f32 %v945_v47, %v8911_v37  ;;  %v8916_v37 = vld [vmem:[#allocation42_spill] sm:$0xff] }
 0x1b6   : > { %v1460_v18 = vpop.f32.mrf.mxu3  ;;  %1703 = vmatmul.f32.gmra.mxu1 %v8913_v58 }
 0x1b7   : > { %v6565_v20 = vadd.f32 %v1042_v15, %v946_v53  ;;  %v6567_v59 = vadd.f32 %v1460_v18, %v1259_v63  ;;  %1578 = vmatmul.f32.gmra.mxu0 %v5991_v2  ;;  %v8917_v63 = vld [vmem:[#allocation54_spill] sm:$0xff] }
 0x1b8   : > { %v8918_v18 = vand.u32 4294901760, %v8917_v63 }
 0x1b9   : > { %8914 = vst [vmem:[#allocation11_spill] sm:$0xff] %v6565_v20  ;;  %4876 = vmatmul.msk.f32.gmra.mxu2 %vm1139_vm1, %v8787_v26  ;;  %v5091_v20 = vmov 3  }
 0x1ba   : > { %5061 = vset.pattern.permute.xlu1 %v5091_v20  ;;  %5059 = vset.pattern.permute.xlu2 %v5091_v20 }
 0x1bb   : > { %v1050_v1 = vpop.f32.mrf.mxu1  ;;  %4892 = vmatmul.msk.f32.gmra.mxu3 %vm1139_vm1, %v8787_v26  ;;  %2896 = vperm.xlu1 %5061, %v6205_v19   ;;  %v8923_v19 = vld [vmem:[#allocation43_spill] sm:$0xff] }
 0x1bc   : > { %v949_v47 = vpop.f32.mrf.mxu0  ;;  %v1267_v61 = vpop.f32.mrf.mxu2  ;;  %5060 = vset.pattern.permute.xlu0 %v5091_v20  ;;  %v8927_v20 = vld [vmem:[#allocation69_spill] sm:$0xff] }
 0x1bd   : > { %v950_v15 = vadd.f32 %v949_v47, %v8916_v37  ;;  %v8921_v47 = vld [vmem:[#allocation62_spill] sm:$0xff] }
 0x1be   : > { %v1464_v53 = vpop.f32.mrf.mxu3  ;;  %1709 = vmatmul.f32.gmra.mxu1 %v8918_v18  ;;  %2890 = vperm.xlu2 %5059, %v8921_v47   ;;  %v8924_v18 = vld [vmem:[#allocation55_spill] sm:$0xff] }
 0x1bf   : > { %v6581_v2 = vadd.f32 %v1046_v0, %v950_v15  ;;  %v6583_v58 = vadd.f32 %v1464_v53, %v1267_v61  ;;  %1583 = vmatmul.f32.gmra.mxu0 %v8912_v55  ;;  %v8922_v0 = vld [vmem:[#allocation44_spill] sm:$0xff] }
 0x1c0   : > { %2893 = vperm.xlu0 %5060, %v8922_v0   ;;  %v8929_v0 = vld [vmem:[#allocation45_spill] sm:$0xff] }
 0x1c1   : > { %8919 = vst [vmem:[#allocation16_spill] sm:$0xff] %v6581_v2  ;;  %4877 = vmatmul.msk.f32.gmra.mxu2 %vm1140_vm3, %v8787_v26  ;;  %v8925_v2 = vand.u32 4294901760, %v8924_v18 }
 0x1c3   : > { %v1054_v37 = vpop.f32.mrf.mxu1  ;;  %4893 = vmatmul.msk.f32.gmra.mxu3 %vm1140_vm3, %v8787_v26  ;;  %2902 = vperm.xlu1 %5061, %v8927_v20  }
 0x1c4   : > { %v953_v55 = vpop.f32.mrf.mxu0  ;;  %v1275_v61 = vpop.f32.mrf.mxu2 }
 0x1c5   : > { %v954_v15 = vadd.f32 %v953_v55, %v8923_v19 }
 0x1c6   : > { %v1468_v53 = vpop.f32.mrf.mxu3  ;;  %1715 = vmatmul.f32.gmra.mxu1 %v8925_v2  ;;  %2899 = vperm.xlu2 %5059, %v8929_v0   ;;  %v8935_v0 = vld [vmem:[#allocation74_spill] sm:$0xff] }
 0x1c7   : > { %v6600_v25 = vadd.f32 %v1050_v1, %v954_v15  ;;  %v6602_v47 = vadd.f32 %v1468_v53, %v1275_v61  ;;  %1588 = vmatmul.f32.gmra.mxu0 %v8917_v63  ;;  %v8930_v1 = vld [vmem:[#allocation46_spill] sm:$0xff]  ;;  %v8931_v63 = vld [vmem:[#allocation61_spill] sm:$0xff] }
 0x1c8   : > { %2908 = vperm.xlu0 %5060, %v8930_v1   ;;  %v8932_v53 = vld [vmem:[#allocation57_spill] sm:$0xff]  ;;  %v8937_v1 = vld [vmem:[#allocation66_spill] sm:$0xff] }
 0x1c9   : > { %8926 = vst [vmem:[#allocation17_spill] sm:$0xff] %v6600_v25  ;;  %4878 = vmatmul.msk.f32.gmra.mxu2 %vm1141_vm4, %v8787_v26  ;;  %v8933_v20 = vand.u32 4294901760, %v8932_v53 }
 0x1cb   : > { %v1058_v55 = vpop.f32.mrf.mxu1  ;;  %4894 = vmatmul.msk.f32.gmra.mxu3 %vm1141_vm4, %v8787_v26  ;;  %2911 = vperm.xlu1 %5061, %v8935_v0  }
 0x1cc   : > { %v957_v2 = vpop.f32.mrf.mxu0  ;;  %v1283_v61 = vpop.f32.mrf.mxu2 }
 0x1cd   : > { %v958_v19 = vadd.f32 %v957_v2, %v8931_v63 }
 0x1ce   : > { %v1472_v15 = vpop.f32.mrf.mxu3  ;;  %1721 = vmatmul.f32.gmra.mxu1 %v8933_v20  ;;  %2905 = vperm.xlu2 %5059, %v8937_v1   ;;  %v8940_v20 = vld [vmem:[#allocation60_spill] sm:$0xff]  ;;  %v8943_v1 = vld [vmem:[#allocation78_spill] sm:$0xff] }
 0x1cf   : > { %v6619_v25 = vadd.f32 %v1054_v37, %v958_v19  ;;  %v6621_v7 = vadd.f32 %v1472_v15, %v1283_v61  ;;  %1593 = vmatmul.f32.gmra.mxu0 %v8924_v18  ;;  %v8938_v37 = vld [vmem:[#allocation47_spill] sm:$0xff]  ;;  %v8939_v18 = vld [vmem:[#allocation65_spill] sm:$0xff]  ;;  %v8941_v0 = vand.u32 4294901760, %v8940_v20 }
 0x1d0   : > { %2917 = vperm.xlu0 %5060, %v8938_v37   ;;  %v8945_v37 = vld [vmem:[#allocation71_spill] sm:$0xff] }
 0x1d1   : > { %8934 = vst [vmem:[#allocation18_spill] sm:$0xff] %v6619_v25  ;;  %4879 = vmatmul.msk.f32.gmra.mxu2 %vm1142_vm5, %v8787_v26 }
 0x1d3   : > { %v1062_v2 = vpop.f32.mrf.mxu1  ;;  %4895 = vmatmul.msk.f32.gmra.mxu3 %vm1142_vm5, %v8787_v26  ;;  %2920 = vperm.xlu1 %5061, %v8943_v1  }
 0x1d4   : > { %v961_v61 = vpop.f32.mrf.mxu0  ;;  %v1291_v63 = vpop.f32.mrf.mxu2 }
 0x1d5   : > { %v962_v19 = vadd.f32 %v961_v61, %v8939_v18 }
 0x1d6   : > { %v1476_v15 = vpop.f32.mrf.mxu3  ;;  %1727 = vmatmul.f32.gmra.mxu1 %v8941_v0  ;;  %2914 = vperm.xlu2 %5059, %v8945_v37   ;;  %v8950_v37 = vld [vmem:[#allocation81_spill] sm:$0xff] }
 0x1d7   : > { %v6638_v25 = vadd.f32 %v1058_v55, %v962_v19  ;;  %v6640_v3 = vadd.f32 %v1476_v15, %v1291_v63  ;;  %1598 = vmatmul.f32.gmra.mxu0 %v8932_v53  ;;  %v8946_v53 = vld [vmem:[#allocation70_spill] sm:$0xff]  ;;  %v8947_v15 = vld [vmem:[#allocation63_spill] sm:$0xff] }
 0x1d8   : > { %2926 = vperm.xlu0 %5060, %v6344_v21   ;;  %v8948_v0 = vand.u32 4294901760, %v8947_v15  ;;  %v8953_v21 = vld [vmem:[#allocation76_spill] sm:$0xff] }
 0x1d9   : > { %8942 = vst [vmem:[#allocation19_spill] sm:$0xff] %v6638_v25  ;;  %4880 = vmatmul.msk.f32.gmra.mxu2 %vm1143_vm6, %v8787_v26 }
 0x1db   : > { %v1066_v61 = vpop.f32.mrf.mxu1  ;;  %4896 = vmatmul.msk.f32.gmra.mxu3 %vm1143_vm6, %v8787_v26  ;;  %2929 = vperm.xlu1 %5061, %v8950_v37  }
 0x1dc   : > { %v965_v55 = vpop.f32.mrf.mxu0  ;;  %v1299_v63 = vpop.f32.mrf.mxu2 }
 0x1dd   : > { %v966_v18 = vadd.f32 %v965_v55, %v8946_v53 }
 0x1de   : > { %v1480_v19 = vpop.f32.mrf.mxu3  ;;  %1733 = vmatmul.f32.gmra.mxu1 %v8948_v0  ;;  %2923 = vperm.xlu2 %5059, %v8953_v21   ;;  %v8957_v0 = vld [vmem:[#allocation68_spill] sm:$0xff]  ;;  %v8962_v21 = vld [vmem:[#allocation79_spill] sm:$0xff] }
 0x1df   : > { %v6657_v1 = vadd.f32 %v1062_v2, %v966_v18  ;;  %v6659_v25 = vadd.f32 %v1480_v19, %v1299_v63  ;;  %1603 = vmatmul.f32.gmra.mxu0 %v8940_v20  ;;  %v8955_v2 = vld [vmem:[#allocation49_spill] sm:$0xff]  ;;  %v8956_v20 = vld [vmem:[#allocation75_spill] sm:$0xff]  ;;  %v8958_v37 = vand.u32 4294901760, %v8957_v0 }
 0x1e0   : > { %2935 = vperm.xlu0 %5060, %v8955_v2  }
 0x1e1   : > { %8949 = vst [vmem:[#allocation24_spill] sm:$0xff] %v6657_v1  ;;  %4881 = vmatmul.msk.f32.gmra.mxu2 %vm8952_vm12, %v8787_v26 }
 0x1e3   : > { %v1070_v55 = vpop.f32.mrf.mxu1  ;;  %4897 = vmatmul.msk.f32.gmra.mxu3 %vm8954_vm13, %v8787_v26 }
 0x1e4   : > { %v969_v63 = vpop.f32.mrf.mxu0  ;;  %v1307_v53 = vpop.f32.mrf.mxu2 }
 0x1e5   : > { %v970_v18 = vadd.f32 %v969_v63, %v8956_v20  ;;  %v8964_v20 = vld [vmem:[#allocation48_spill] sm:$0xff] }
 0x1e6   : > { %v1484_v19 = vpop.f32.mrf.mxu3  ;;  %1739 = vmatmul.f32.gmra.mxu1 %v8958_v37  ;;  %2932 = vperm.xlu2 %5059, %v8962_v21   ;;  %v6718_v21 = vpop.permute.xlu0 %1988 }
 0x1e7   : > { %v6676_v1 = vadd.f32 %v1066_v61, %v970_v18  ;;  %v6678_v30 = vadd.f32 %v1484_v19, %v1307_v53  ;;  %1608 = vmatmul.f32.gmra.mxu0 %v8947_v15  ;;  %v8965_v19 = vld [vmem:[#allocation73_spill] sm:$0xff]  ;;  %vm2035_vm0 = vcmp.eq.s32.totalorder %v5572_v54, %v6718_v21 }
 0x1e8   : > { %v8966_v15 = vand.u32 4294901760, %v8965_v19 }
 0x1e9   : > { %8959 = vst [vmem:[#allocation25_spill] sm:$0xff] %v6676_v1  ;;  %4882 = vmatmul.msk.f32.gmra.mxu2 %vm8961_vm14, %v8787_v26 }
 0x1eb   : > { %v1074_v2 = vpop.f32.mrf.mxu1  ;;  %4898 = vmatmul.msk.f32.gmra.mxu3 %vm8963_vm15, %v8787_v26 }
 0x1ec   : > { %v973_v63 = vpop.f32.mrf.mxu0  ;;  %v1315_v61 = vpop.f32.mrf.mxu2 }
 0x1ed   : > { %v974_v53 = vadd.f32 %v973_v63, %v8964_v20 }
 0x1ee   : > { %v1488_v18 = vpop.f32.mrf.mxu3  ;;  %1745 = vmatmul.f32.gmra.mxu1 %v8966_v15 }
 0x1ef   : > { %v6693_v37 = vadd.f32 %v1070_v55, %v974_v53  ;;  %v6695_v1 = vadd.f32 %v1488_v18, %v1315_v61  ;;  %1613 = vmatmul.f32.gmra.mxu0 %v8957_v0  ;;  %v8970_v61 = vld [vmem:[#allocation77_spill] sm:$0xff] }
 0x1f0   : > { %v8971_v18 = vand.u32 4294901760, %v8970_v61 }
 0x1f1   : > { %8967 = vst [vmem:[#allocation26_spill] sm:$0xff] %v6693_v37  ;;  %4883 = vmatmul.msk.f32.gmra.mxu2 %vm1146_vm9, %v8787_v26 }
 0x1f2   : > { %8968 = vst [vmem:[#allocation27_spill] sm:$0xff] %v6695_v1 }
 0x1f3   : > { %v1078_v41 = vpop.f32.mrf.mxu1  ;;  %4899 = vmatmul.msk.f32.gmra.mxu3 %vm1146_vm9, %v8787_v26 }
 0x1f4   : > { %v977_v63 = vpop.f32.mrf.mxu0  ;;  %v1323_v20 = vpop.f32.mrf.mxu2 }
 0x1f5   : > { %v978_v55 = vadd.f32 %v977_v63, %v6379_v5 }
 0x1f6   : > { %v1492_v53 = vpop.f32.mrf.mxu3  ;;  %1751 = vmatmul.f32.gmra.mxu1 %v8971_v18  ;;  %v8976_v18 = vld [vmem:[#allocation80_spill] sm:$0xff] }
 0x1f7   : > { %v6709_v0 = vadd.f32 %v1074_v2, %v978_v55  ;;  %v6711_v15 = vadd.f32 %v1492_v53, %v1323_v20  ;;  %1618 = vmatmul.f32.gmra.mxu0 %v8965_v19  ;;  %v8975_v20 = vmov 0.0  }
 0x1f8   : > { %v4902_v55 = vsel %vm2035_vm0, 1.0, %v8975_v20 }
 0x1f9   : > { %8972 = vst [vmem:[#allocation30_spill] sm:$0xff] %v6709_v0  ;;  %4884 = vmatmul.msk.f32.gmra.mxu2 %vm1147_vm10, %v8787_v26  ;;  %v8977_v0 = vand.u32 4294901760, %v8976_v18  ;;  %v2116_v37 = vsub.f32 %v4902_v55, %v4902_v55 }
 0x1fa   : > { %8973 = vst [vmem:[#allocation32_spill] sm:$0xff] %v6711_v15 }
 0x1fb   : > { %v1082_v5 = vpop.f32.mrf.mxu1  ;;  %4900 = vmatmul.msk.f32.gmra.mxu3 %vm1147_vm10, %v8787_v26 }
 0x1fc   : > { %v981_v2 = vpop.f32.mrf.mxu0  ;;  %v1331_v63 = vpop.f32.mrf.mxu2 }
 0x1fd   : > { %v982_v19 = vadd.f32 %v981_v2, %v6396_v52  ;;  %v6742_v52 = vpop.permute.xlu1 %1991 }
 0x1fe   : > { %v1496_v53 = vpop.f32.mrf.mxu3  ;;  %1757 = vmatmul.f32.gmra.mxu1 %v8977_v0  ;;  %vm2036_vm2 = vcmp.eq.s32.totalorder %v5572_v54, %v6742_v52 }
 0x1ff   : > { %v6733_v15 = vadd.f32 %v1078_v41, %v982_v19  ;;  %v6735_v1 = vadd.f32 %v1496_v53, %v1331_v63  ;;  %1623 = vmatmul.f32.gmra.mxu0 %v8970_v61  ;;  %v2117_v61 = vand.u32 4294901760, %v2116_v37  ;;  %v4903_v55 = vsel %vm2036_vm2, 1.0, %v8975_v20 }
 0x201   : > { %8978 = vst [vmem:[#allocation33_spill] sm:$0xff] %v6733_v15  ;;  %4885 = vmatmul.msk.f32.gmra.mxu2 %vm1148_vm11, %v8787_v26  ;;  %v6766_v15 = vpop.permute.xlu2 %1994 }
 0x202   : > { %vm2037_vm1 = vcmp.eq.s32.totalorder %v5572_v54, %v6766_v15 }
 0x203   : > { %v1668_v2 = vpop.f32.mrf.mxu1  ;;  %4901 = vmatmul.msk.f32.gmra.mxu3 %vm1148_vm11, %v8787_v26 }
 0x204   : > { %v985_v41 = vpop.f32.mrf.mxu0  ;;  %v1339_v0 = vpop.f32.mrf.mxu2 }
 0x205   : > { %v986_v63 = vadd.f32 %v985_v41, %v6409_v6  ;;  %v2118_v6 = vsub.f32 %v2116_v37, %v2117_v61  ;;  %v2124_v41 = vsub.f32 %v4903_v55, %v4903_v55 }
 0x206   : > { %v1500_v19 = vpop.f32.mrf.mxu3  ;;  %4918 = vmatmul.msk.f32.vlgmr.msrb.gmra.mxu1 %vm2035_vm0, %v8787_v26 }
 0x207   : > { %v6759_v53 = vadd.f32 %v1082_v5, %v986_v63  ;;  %v6761_v31 = vadd.f32 %v1500_v19, %v1339_v0  ;;  %1628 = vmatmul.f32.gmra.mxu0 %v8976_v18  ;;  %3437 = vmatpush.msrb.mxu1 %v5152_v8  ;;  %v2125_v19 = vand.u32 4294901760, %v2124_v41 }
 0x209   : > { %8979 = vst [vmem:[#allocation35_spill] sm:$0xff] %v6759_v53  ;;  %2455 = vmatmul.f32.vlgmr.msrb.gmra.mxu2 %v2116_v37  ;;  %3439 = vmatpush.msrb.mxu1 %v5164_v12  ;;  %v2119_v37 = vand.u32 4294901760, %v2118_v6  ;;  %v2126_v55 = vsub.f32 %v2124_v41, %v2125_v19  ;;  %v8981_v53 = vld [vmem:[#allocation3_spill] sm:$0xff] }
 0x20a   : > { %3568 = vmatpush.msrb.mxu2 %v8881_v33 }
 0x20b   : > { %v1674_v5 = vpop.f32.mrf.mxu1  ;;  %2569 = vmatmul.f32.vlgmr.msrb.gmra.mxu3 %v2117_v61  ;;  %3441 = vmatpush.msrb.mxu1 %v5166_v13  ;;  %v4904_v61 = vsel %vm2037_vm1, 1.0, %v8975_v20 }
 0x20c   : > { %v1554_v0 = vpop.f32.mrf.mxu0  ;;  %v1827_v18 = vpop.f32.mrf.mxu2  ;;  %3695 = vmatpush.msrb.mxu3 %v5152_v8  ;;  %3572 = vmatpush.msrb.mxu2 %v8882_v38  ;;  %v2132_v6 = vsub.f32 %v4904_v61, %v4904_v61 }
 0x20d   : > { %v1555_v63 = vadd.f32 %v1554_v0, %v6431_v56  ;;  %3443 = vmatpush.msrb.mxu1 %v5168_v14  ;;  %v8980_v56 = vld [vmem:[#allocation2_spill] sm:$0xff]  ;;  %v6789_v0 = vpop.permute.xlu1 %1997 }
 0x20e   : > { %v1924_v33 = vpop.f32.mrf.mxu3  ;;  %4919 = vmatmul.msk.f32.gmra.mxu1 %vm2036_vm2, %v8787_v26  ;;  %3697 = vmatpush.msrb.mxu3 %v5164_v12  ;;  %vm2038_vm3 = vcmp.eq.s32.totalorder %v5572_v54, %v6789_v0 }
 0x20f   : > { %v1669_v8 = vadd.f32 %v1668_v2, %v1555_v63  ;;  %2120 = vmatmul.f32.vlgmr.msrb.gmra.mxu0 %v2119_v37  ;;  %3576 = vmatpush.msrb.mxu2 %v8883_v62 }
 0x210   : > { %3309 = vmatpush.msrb.mxu0 %v8980_v56  ;;  %3699 = vmatpush.msrb.mxu3 %v5166_v13  ;;  %v8986_v56 = vld [vmem:[#allocation12_spill] sm:$0xff] }
 0x211   : > { %v1828_v38 = vadd.f32 %v1827_v18, %v1669_v8  ;;  %2460 = vmatmul.f32.gmra.mxu2 %v2124_v41  ;;  %3445 = vmatpush.msrb.mxu1 %v5177_v17  ;;  %v8983_v41 = vld [vmem:[#allocation4_spill] sm:$0xff]  ;;  %v6817_v8 = vpop.permute.xlu2 %2000 }
 0x212   : > { %3312 = vmatpush.msrb.mxu0 %v8981_v53  ;;  %3580 = vmatpush.msrb.mxu2 %v8885_v60  ;;  %v2127_v60 = vand.u32 4294901760, %v2126_v55  ;;  %v2133_v53 = vand.u32 4294901760, %v2132_v6  ;;  %vm2039_vm4 = vcmp.eq.s32.totalorder %v5572_v54, %v6817_v8  ;;  %v8988_v55 = vld [vmem:[#allocation13_spill] sm:$0xff] }
 0x213   : > { %v6795_v12 = vadd.f32 %v1924_v33, %v1828_v38  ;;  %v1680_v62 = vpop.f32.mrf.mxu1  ;;  %2575 = vmatmul.f32.gmra.mxu3 %v2125_v19  ;;  %3447 = vmatpush.msrb.mxu1 %v5249_v40  ;;  %v8985_v19 = vld [vmem:[#allocation7_spill] sm:$0xff] }
 0x214   : > { %v1559_v13 = vpop.f32.mrf.mxu0  ;;  %v1831_v2 = vpop.f32.mrf.mxu2  ;;  %3315 = vmatpush.msrb.mxu0 %v8983_v41  ;;  %3701 = vmatpush.msrb.mxu3 %v5168_v14  ;;  %v4905_v14 = vsel %vm2038_vm3, 1.0, %v8975_v20  ;;  %v2134_v33 = vsub.f32 %v2132_v6, %v2133_v53 }
 0x215   : > { %8982 = vst [vmem:[#allocation36_spill] sm:$0xff] %v6795_v12  ;;  %v1560_v18 = vadd.f32 %v1559_v13, %v6459_v48  ;;  %3807 = vrot.lane.b32.xlu1 %v6795_v12, %s5092_s15  ;;  %3584 = vmatpush.msrb.mxu2 %v8887_v49  ;;  %v8984_v48 = vld [vmem:[#allocation5_spill] sm:$0xff]  ;;  %v2140_v61 = vsub.f32 %v4905_v14, %v4905_v14  ;;  %v8992_v14 = vld [vmem:[#allocation20_spill] sm:$0xff] }
 0x216   : > { %v1928_v37 = vpop.f32.mrf.mxu3  ;;  %4920 = vmatmul.msk.f32.gmra.mxu1 %vm2037_vm1, %v8787_v26  ;;  %3318 = vmatpush.msrb.mxu0 %v8984_v48 }
 0x217   : > { %v1675_v63 = vadd.f32 %v1674_v5, %v1560_v18  ;;  %2128 = vmatmul.f32.gmra.mxu0 %v2127_v60  ;;  %3703 = vmatpush.msrb.mxu3 %v5177_v17  ;;  %v8990_v60 = vld [vmem:[#allocation15_spill] sm:$0xff] }
 0x218   : > { %3321 = vmatpush.msrb.mxu0 %v8985_v19  ;;  %3588 = vmatpush.msrb.mxu2 %v8888_v16 }
 0x219   : > { %v1832_v49 = vadd.f32 %v1831_v2, %v1675_v63  ;;  %2465 = vmatmul.f32.gmra.mxu2 %v2132_v6  ;;  %3705 = vmatpush.msrb.mxu3 %v5249_v40  ;;  %v2141_v6 = vand.u32 4294901760, %v2140_v61  ;;  %v8989_v2 = vld [vmem:[#allocation14_spill] sm:$0xff] }
 0x21a   : > { %3324 = vmatpush.msrb.mxu0 %v8986_v56  ;;  %3592 = vmatpush.msrb.mxu2 %v8889_v23  ;;  %v2135_v23 = vand.u32 4294901760, %v2134_v33 }
 0x21b   : > { %v6823_v17 = vadd.f32 %v1928_v37, %v1832_v49  ;;  %v1686_v5 = vpop.f32.mrf.mxu1  ;;  %2581 = vmatmul.f32.gmra.mxu3 %v2133_v53  ;;  %3449 = vmatpush.msrb.mxu1 %v5259_v43  ;;  %v2142_v41 = vsub.f32 %v2140_v61, %v2141_v6  ;;  %v6845_v53 = vpop.permute.xlu0 %2003 }
 0x21c   : > { %v1564_v16 = vpop.f32.mrf.mxu0  ;;  %v1835_v38 = vpop.f32.mrf.mxu2  ;;  %3327 = vmatpush.msrb.mxu0 %v8988_v55  ;;  %3707 = vmatpush.msrb.mxu3 %v5259_v43  ;;  %v4906_v43 = vsel %vm2039_vm4, 1.0, %v8975_v20  ;;  %vm2040_vm5 = vcmp.eq.s32.totalorder %v5572_v54, %v6845_v53 }
 0x21d   : > { %8987 = vst [vmem:[#allocation51_spill] sm:$0xff] %v6823_v17  ;;  %v1565_v40 = vadd.f32 %v1564_v16, %v6487_v27  ;;  %3809 = vrot.lane.b32.xlu2 %v6823_v17, %s5092_s15  ;;  %3596 = vmatpush.msrb.mxu2 %v8891_v57  ;;  %v2148_v18 = vsub.f32 %v4906_v43, %v4906_v43  ;;  %v6875_v16 = vpop.permute.xlu1 %2006 }
 0x21e   : > { %v1932_v13 = vpop.f32.mrf.mxu3  ;;  %4921 = vmatmul.msk.f32.gmra.mxu1 %vm2038_vm3, %v8787_v26  ;;  %3330 = vmatpush.msrb.mxu0 %v8989_v2  ;;  %vm2041_vm6 = vcmp.eq.s32.totalorder %v5572_v54, %v6875_v16 }
 0x21f   : > { %v1681_v27 = vadd.f32 %v1680_v62, %v1565_v40  ;;  %2136 = vmatmul.f32.gmra.mxu0 %v2135_v23  ;;  %3709 = vmatpush.msrb.mxu3 %v5261_v44  ;;  %v2149_v63 = vand.u32 4294901760, %v2148_v18  ;;  %v8996_v40 = vld [vmem:[#allocation23_spill] sm:$0xff] }
 0x220   : > { %3451 = vmatpush.msrb.mxu1 %v5261_v44  ;;  %3600 = vmatpush.msrb.mxu2 %v8893_v29 }
 0x221   : > { %v1836_v57 = vadd.f32 %v1835_v38, %v1681_v27  ;;  %2470 = vmatmul.f32.gmra.mxu2 %v2140_v61  ;;  %3333 = vmatpush.msrb.mxu0 %v8990_v60  ;;  %v2150_v61 = vsub.f32 %v2148_v18, %v2149_v63 }
 0x222   : > { %3711 = vmatpush.msrb.mxu3 %v5263_v45  ;;  %3453 = vmatpush.msrb.mxu1 %v5263_v45  ;;  %v2143_v45 = vand.u32 4294901760, %v2142_v41  ;;  %v8998_v41 = vld [vmem:[#allocation34_spill] sm:$0xff] }
 0x223   : > { %v6851_v62 = vadd.f32 %v1932_v13, %v1836_v57  ;;  %v1692_v44 = vpop.f32.mrf.mxu1  ;;  %2587 = vmatmul.f32.gmra.mxu3 %v2141_v6  ;;  %3604 = vmatpush.msrb.mxu2 %v8894_v4  ;;  %v4907_v4 = vsel %vm2040_vm5, 1.0, %v8975_v20 }
 0x224   : > { %v1569_v29 = vpop.f32.mrf.mxu0  ;;  %v1839_v37 = vpop.f32.mrf.mxu2  ;;  %3336 = vmatpush.msrb.mxu0 %v8992_v14  ;;  %3713 = vmatpush.msrb.mxu3 %v5333_v9  ;;  %v2156_v56 = vsub.f32 %v4907_v4, %v4907_v4 }
 0x225   : > { %8991 = vst [vmem:[#allocation37_spill] sm:$0xff] %v6851_v62  ;;  %v1570_v48 = vadd.f32 %v1569_v29, %v6515_v22  ;;  %3811 = vrot.lane.b32.xlu0 %v6851_v62, %s5092_s15  ;;  %3455 = vmatpush.msrb.mxu1 %v5333_v9  ;;  %v6869_v22 = vpop.permute.xlu2 %2009  ;;  %v8993_v9 = vld [vmem:[#allocation21_spill] sm:$0xff] }
 0x226   : > { %v1936_v19 = vpop.f32.mrf.mxu3  ;;  %4922 = vmatmul.msk.f32.gmra.mxu1 %vm2039_vm4, %v8787_v26  ;;  %3608 = vmatpush.msrb.mxu2 %v8895_v42  ;;  %v8994_v42 = vld [vmem:[#allocation22_spill] sm:$0xff]  ;;  %v2157_v6 = vand.u32 4294901760, %v2156_v56  ;;  %vm2042_vm9 = vcmp.eq.s32.totalorder %v5572_v54, %v6869_v22 }
 0x227   : > { %v1687_v49 = vadd.f32 %v1686_v5, %v1570_v48  ;;  %2144 = vmatmul.f32.gmra.mxu0 %v2143_v45  ;;  %3715 = vmatpush.msrb.mxu3 %v5335_v10 }
 0x228   : > { %3339 = vmatpush.msrb.mxu0 %v8993_v9  ;;  %3457 = vmatpush.msrb.mxu1 %v5335_v10  ;;  %v2158_v27 = vsub.f32 %v2156_v56, %v2157_v6 }
 0x229   : > { %v1840_v33 = vadd.f32 %v1839_v37, %v1687_v49  ;;  %2475 = vmatmul.f32.gmra.mxu2 %v2148_v18  ;;  %3717 = vmatpush.msrb.mxu3 %v5337_v11  ;;  %v6928_v37 = vpop.permute.xlu1 %2015 }
 0x22a   : > { %3612 = vmatpush.msrb.mxu2 %v8898_v46  ;;  %3342 = vmatpush.msrb.mxu0 %v8994_v42  ;;  %v2151_v46 = vand.u32 4294901760, %v2150_v61  ;;  %vm2044_vm11 = vcmp.eq.s32.totalorder %v5572_v54, %v6928_v37 }
 0x22b   : > { %v6881_v5 = vadd.f32 %v1936_v19, %v1840_v33  ;;  %v1698_v38 = vpop.f32.mrf.mxu1  ;;  %2593 = vmatmul.f32.gmra.mxu3 %v2149_v63  ;;  %3459 = vmatpush.msrb.mxu1 %v5337_v11  ;;  %v4908_v11 = vsel %vm2041_vm6, 1.0, %v8975_v20  ;;  %v6930_v63 = vpop.permute.xlu0 %2012 }
 0x22c   : > { %v1574_v10 = vpop.f32.mrf.mxu0  ;;  %v1843_v55 = vpop.f32.mrf.mxu2  ;;  %3616 = vmatpush.msrb.mxu2 %v8899_v24  ;;  %3345 = vmatpush.msrb.mxu0 %v8996_v40  ;;  %v2164_v57 = vsub.f32 %v4908_v11, %v4908_v11  ;;  %vm2043_vm10 = vcmp.eq.s32.totalorder %v5572_v54, %v6930_v63 }
 0x22d   : > { %8995 = vst [vmem:[#allocation39_spill] sm:$0xff] %v6881_v5  ;;  %v1575_v23 = vadd.f32 %v1574_v10, %v6543_v39  ;;  %3813 = vrot.lane.b32.xlu1 %v6881_v5, %s5092_s15  ;;  %3719 = vmatpush.msrb.mxu3 %v5348_v32  ;;  %v8997_v39 = vld [vmem:[#allocation28_spill] sm:$0xff]  ;;  %v6902_v43 = vpop.permute.xlu2 %2018 }
 0x22e   : > { %v1940_v13 = vpop.f32.mrf.mxu3  ;;  %4923 = vmatmul.msk.f32.gmra.mxu1 %vm2040_vm5, %v8787_v26  ;;  %3620 = vmatpush.msrb.mxu2 %v8900_v50  ;;  %vm2045_vm7 = vcmp.eq.s32.totalorder %v5572_v54, %v6902_v43 }
 0x22f   : > { %v1693_v24 = vadd.f32 %v1692_v44, %v1575_v23  ;;  %2152 = vmatmul.f32.gmra.mxu0 %v2151_v46  ;;  %3461 = vmatpush.msrb.mxu1 %v5348_v32  ;;  %v2165_v44 = vand.u32 4294901760, %v2164_v57 }
 0x230   : > { %3348 = vmatpush.msrb.mxu0 %v8997_v39  ;;  %3721 = vmatpush.msrb.mxu3 %v5412_v34 }
 0x231   : > { %v1844_v2 = vadd.f32 %v1843_v55, %v1693_v24  ;;  %2480 = vmatmul.f32.gmra.mxu2 %v2156_v56  ;;  %3463 = vmatpush.msrb.mxu1 %v5412_v34  ;;  %v2166_v48 = vsub.f32 %v2164_v57, %v2165_v44  ;;  %v6949_v23 = vpop.permute.xlu1 %2024 }
 0x232   : > { %3624 = vmatpush.msrb.mxu2 %v8905_v35  ;;  %3351 = vmatpush.msrb.mxu0 %v8998_v41  ;;  %v2159_v35 = vand.u32 4294901760, %v2158_v27  ;;  %v4911_v41 = vsel %vm2044_vm11, 1.0, %v8975_v20  ;;  %vm8685_vm12 = vcmp.eq.s32.totalorder %v5572_v54, %v6949_v23 }
 0x233   : > { %v6909_v32 = vadd.f32 %v1940_v13, %v1844_v2  ;;  %v1704_v50 = vpop.f32.mrf.mxu1  ;;  %2599 = vmatmul.f32.gmra.mxu3 %v2157_v6  ;;  %3465 = vmatpush.msrb.mxu1 %v8904_v36  ;;  %v2167_v61 = vand.u32 4294901760, %v2166_v48 }
 0x234   : > { %v1579_v18 = vpop.f32.mrf.mxu0  ;;  %v1847_v60 = vpop.f32.mrf.mxu2  ;;  %3723 = vmatpush.msrb.mxu3 %v8904_v36  ;;  %3628 = vmatpush.msrb.mxu2 %v8909_v28  ;;  %v4909_v36 = vsel %vm2042_vm9, 1.0, %v8975_v20  ;;  %v9000_v28 = vld [vmem:[#allocation38_spill] sm:$0xff] }
 0x235   : > { %8999 = vst [vmem:[#allocation40_spill] sm:$0xff] %v6909_v32  ;;  %v1580_v34 = vadd.f32 %v1579_v18, %v6567_v59  ;;  %3815 = vrot.lane.b32.xlu2 %v6909_v32, %s5092_s15  ;;  %3467 = vmatpush.msrb.mxu1 %v8908_v51  ;;  %v2172_v45 = vsub.f32 %v4909_v36, %v4909_v36  ;;  %v6934_v19 = vpop.permute.xlu2 %2027 }
 0x236   : > { %v1944_v29 = vpop.f32.mrf.mxu3  ;;  %4924 = vmatmul.msk.f32.gmra.mxu1 %vm2041_vm6, %v8787_v26  ;;  %3354 = vmatpush.msrb.mxu0 %v9000_v28  ;;  %vm8686_vm13 = vcmp.eq.s32.totalorder %v5572_v54, %v6934_v19 }
 0x237   : > { %v1699_v59 = vadd.f32 %v1698_v38, %v1580_v34  ;;  %2160 = vmatmul.f32.gmra.mxu0 %v2159_v35  ;;  %3725 = vmatpush.msrb.mxu3 %v8908_v51  ;;  %v2173_v56 = vand.u32 4294901760, %v2172_v45  ;;  %v4910_v38 = vsel %vm2043_vm10, 1.0, %v8975_v20 }
 0x238   : > { %v2180_v40 = vsub.f32 %v4910_v38, %v4910_v38 }
 0x239   : > { %v1848_v14 = vadd.f32 %v1847_v60, %v1699_v59  ;;  %2485 = vmatmul.f32.gmra.mxu2 %v2164_v57  ;;  %v2188_v60 = vsub.f32 %v4911_v41, %v4911_v41  ;;  %v6977_v48 = vpop.permute.xlu1 %2033 }
 0x23a   : > { %v2181_v27 = vand.u32 4294901760, %v2180_v40  ;;  %vm8701_vm15 = vcmp.eq.s32.totalorder %v5572_v54, %v6977_v48 }
 0x23b   : > { %v6936_v4 = vadd.f32 %v1944_v29, %v1848_v14  ;;  %v1710_v49 = vpop.f32.mrf.mxu1  ;;  %2605 = vmatmul.f32.gmra.mxu3 %v2165_v44  ;;  %v2189_v14 = vand.u32 4294901760, %v2188_v60 }
 0x23c   : > { %v1584_v9 = vpop.f32.mrf.mxu0  ;;  %v1851_v33 = vpop.f32.mrf.mxu2 }
 0x23d   : > { %9001 = vst [vmem:[#allocation41_spill] sm:$0xff] %v6936_v4  ;;  %v1585_v51 = vadd.f32 %v1584_v9, %v6583_v58  ;;  %3817 = vrot.lane.b32.xlu0 %v6936_v4, %s5092_s15  ;;  %v2174_v58 = vsub.f32 %v2172_v45, %v2173_v56  ;;  %v6955_v13 = vpop.permute.xlu2 %2890 }
 0x23e   : > { %v1948_v42 = vpop.f32.mrf.mxu3  ;;  %4925 = vmatmul.msk.f32.gmra.mxu1 %vm2042_vm9, %v8787_v26 }
 0x23f   : > { %v1705_v10 = vadd.f32 %v1704_v50, %v1585_v51  ;;  %2168 = vmatmul.f32.gmra.mxu0 %v2167_v61  ;;  %v2175_v2 = vand.u32 4294901760, %v2174_v58  ;;  %v6987_v61 = vpop.permute.xlu0 %2021 }
 0x240   : > { %vm2046_vm8 = vcmp.eq.s32.totalorder %v5572_v54, %v6987_v61 }
 0x241   : > { %v1852_v55 = vadd.f32 %v1851_v33, %v1705_v10  ;;  %2490 = vmatmul.f32.gmra.mxu2 %v2172_v45  ;;  %v2190_v33 = vsub.f32 %v2188_v60, %v2189_v14 }
 0x243   : > { %v6953_v46 = vadd.f32 %v1948_v42, %v1852_v55  ;;  %v1716_v6 = vpop.f32.mrf.mxu1  ;;  %2611 = vmatmul.f32.gmra.mxu3 %v2173_v56  ;;  %v2191_v58 = vand.u32 4294901760, %v2190_v33 }
 0x244   : > { %v1589_v11 = vpop.f32.mrf.mxu0  ;;  %v1855_v24 = vpop.f32.mrf.mxu2 }
 0x245   : > { %9002 = vst [vmem:[#allocation29_spill] sm:$0xff] %v6953_v46  ;;  %v1590_v39 = vadd.f32 %v1589_v11, %v6602_v47  ;;  %3819 = vrot.lane.b32.xlu1 %v6953_v46, %s5092_s15  ;;  %v2182_v47 = vsub.f32 %v2180_v40, %v2181_v27  ;;  %v6975_v28 = vpop.permute.xlu2 %2899 }
 0x246   : > { %v1952_v57 = vpop.f32.mrf.mxu3  ;;  %4926 = vmatmul.msk.f32.gmra.mxu1 %vm2043_vm10, %v8787_v26 }
 0x247   : > { %v1711_v50 = vadd.f32 %v1710_v49, %v1590_v39  ;;  %2176 = vmatmul.f32.gmra.mxu0 %v2175_v2  ;;  %v2183_v59 = vand.u32 4294901760, %v2182_v47 }
 0x249   : > { %v1856_v18 = vadd.f32 %v1855_v24, %v1711_v50  ;;  %2495 = vmatmul.f32.gmra.mxu2 %v2180_v40  ;;  %v4913_v24 = vsel %vm2046_vm8, 1.0, %v8975_v20 }
 0x24b   : > { %v6970_v34 = vadd.f32 %v1952_v57, %v1856_v18  ;;  %v1722_v35 = vpop.f32.mrf.mxu1  ;;  %2617 = vmatmul.f32.gmra.mxu3 %v2181_v27  ;;  %v2204_v57 = vsub.f32 %v4913_v24, %v4913_v24 }
 0x24c   : > { %v1594_v44 = vpop.f32.mrf.mxu0  ;;  %v1859_v29 = vpop.f32.mrf.mxu2 }
 0x24d   : > { %9003 = vst [vmem:[#allocation52_spill] sm:$0xff] %v6970_v34  ;;  %v1595_v36 = vadd.f32 %v1594_v44, %v6621_v7  ;;  %3821 = vrot.lane.b32.xlu2 %v6970_v34, %s5092_s15  ;;  %v4912_v7 = vsel %vm2045_vm7, 1.0, %v8975_v20  ;;  %v2205_v44 = vand.u32 4294901760, %v2204_v57 }
 0x24e   : > { %v1956_v45 = vpop.f32.mrf.mxu3  ;;  %4927 = vmatmul.msk.f32.gmra.mxu1 %vm2044_vm11, %v8787_v26  ;;  %v2196_v51 = vsub.f32 %v4912_v7, %v4912_v7 }
 0x24f   : > { %v1717_v49 = vadd.f32 %v1716_v6, %v1595_v36  ;;  %2184 = vmatmul.f32.gmra.mxu0 %v2183_v59  ;;  %v6996_v6 = vpop.permute.xlu1 %2896  ;;  %v4914_v36 = vsel %vm8685_vm12, 1.0, %v8975_v20  ;;  %v7023_v59 = vpop.permute.xlu0 %2030 }
 0x250   : > { %v2197_v40 = vand.u32 4294901760, %v2196_v51  ;;  %vm8702_vm14 = vcmp.eq.s32.totalorder %v5572_v54, %v7023_v59 }
 0x251   : > { %v1860_v9 = vadd.f32 %v1859_v29, %v1717_v49  ;;  %2500 = vmatmul.f32.gmra.mxu2 %v2188_v60  ;;  %v2206_v49 = vsub.f32 %v2204_v57, %v2205_v44 }
 0x252   : > { %v2198_v27 = vsub.f32 %v2196_v51, %v2197_v40 }
 0x253   : > { %v6991_v56 = vadd.f32 %v1956_v45, %v1860_v9  ;;  %v1728_v42 = vpop.f32.mrf.mxu1  ;;  %2623 = vmatmul.f32.gmra.mxu3 %v2189_v14  ;;  %v2212_v9 = vsub.f32 %v4914_v36, %v4914_v36 }
 0x254   : > { %v1599_v38 = vpop.f32.mrf.mxu0  ;;  %v1863_v10 = vpop.f32.mrf.mxu2 }
 0x255   : > { %9004 = vst [vmem:[#allocation42_spill] sm:$0xff] %v6991_v56  ;;  %v1600_v55 = vadd.f32 %v1599_v38, %v6640_v3  ;;  %3823 = vrot.lane.b32.xlu0 %v6991_v56, %s5092_s15  ;;  %v7006_v3 = vpop.permute.xlu2 %2905 }
 0x256   : > { %v1960_v11 = vpop.f32.mrf.mxu3  ;;  %4928 = vmatmul.msk.f32.gmra.mxu1 %vm2045_vm7, %v8787_v26 }
 0x257   : > { %v1723_v39 = vadd.f32 %v1722_v35, %v1600_v55  ;;  %2192 = vmatmul.f32.gmra.mxu0 %v2191_v58  ;;  %v2199_v35 = vand.u32 4294901760, %v2198_v27  ;;  %v2207_v55 = vand.u32 4294901760, %v2206_v49  ;;  %v2213_v58 = vand.u32 4294901760, %v2212_v9 }
 0x258   : > { %v4916_v49 = vsel %vm8702_vm14, 1.0, %v8975_v20 }
 0x259   : > { %v1864_v2 = vadd.f32 %v1863_v10, %v1723_v39  ;;  %2505 = vmatmul.f32.gmra.mxu2 %v2196_v51  ;;  %v7044_v39 = vpop.permute.xlu0 %2893 }
 0x25b   : > { %v7010_v41 = vadd.f32 %v1960_v11, %v1864_v2  ;;  %v1734_v50 = vpop.f32.mrf.mxu1  ;;  %2629 = vmatmul.f32.gmra.mxu3 %v2197_v40  ;;  %v4915_v11 = vsel %vm8686_vm13, 1.0, %v8975_v20  ;;  %v2214_v2 = vsub.f32 %v2212_v9, %v2213_v58 }
 0x25c   : > { %v1604_v18 = vpop.f32.mrf.mxu0  ;;  %v1867_v47 = vpop.f32.mrf.mxu2  ;;  %v2220_v27 = vsub.f32 %v4915_v11, %v4915_v11 }
 0x25d   : > { %9005 = vst [vmem:[#allocation54_spill] sm:$0xff] %v7010_v41  ;;  %v1605_v60 = vadd.f32 %v1604_v18, %v6659_v25  ;;  %3825 = vrot.lane.b32.xlu1 %v7010_v41, %s5092_s15  ;;  %v7025_v25 = vpop.permute.xlu1 %2902  ;;  %v7027_v7 = vpop.permute.xlu2 %2914  ;;  %v2215_v36 = vand.u32 4294901760, %v2214_v2 }
 0x25e   : > { %v1964_v29 = vpop.f32.mrf.mxu3  ;;  %4929 = vmatmul.msk.f32.gmra.mxu1 %vm2046_vm8, %v8787_v26 }
 0x25f   : > { %v1729_v14 = vadd.f32 %v1728_v42, %v1605_v60  ;;  %2200 = vmatmul.f32.gmra.mxu0 %v2199_v35 }
 0x261   : > { %v1868_v45 = vadd.f32 %v1867_v47, %v1729_v14  ;;  %2510 = vmatmul.f32.gmra.mxu2 %v2204_v57  ;;  %v2221_v14 = vand.u32 4294901760, %v2220_v27 }
 0x263   : > { %v7031_v33 = vadd.f32 %v1964_v29, %v1868_v45  ;;  %v1740_v51 = vpop.f32.mrf.mxu1  ;;  %2635 = vmatmul.f32.gmra.mxu3 %v2205_v44  ;;  %v9008_v44 = vld [vmem:[#allocation27_spill] sm:$0xff] }
 0x264   : > { %v1609_v38 = vpop.f32.mrf.mxu0  ;;  %v1871_v10 = vpop.f32.mrf.mxu2 }
 0x265   : > { %9006 = vst [vmem:[#allocation53_spill] sm:$0xff] %v7031_v33  ;;  %v1610_v42 = vadd.f32 %v1609_v38, %v6678_v30  ;;  %3827 = vrot.lane.b32.xlu2 %v7031_v33, %s5092_s15  ;;  %v7046_v57 = vpop.permute.xlu1 %2911  ;;  %v7052_v47 = vpop.permute.xlu2 %2923 }
 0x266   : > { %v1968_v40 = vpop.f32.mrf.mxu3  ;;  %4930 = vmatmul.msk.f32.gmra.mxu1 %vm8685_vm12, %v8787_v26  ;;  %vm2937_vm12 = vcmp.eq.s32.totalorder %v5572_v54, %v6955_v13 }
 0x267   : > { %v1735_v24 = vadd.f32 %v1734_v50, %v1610_v42  ;;  %2208 = vmatmul.f32.gmra.mxu0 %v2207_v55  ;;  %v2222_v42 = vsub.f32 %v2220_v27, %v2221_v14  ;;  %v2228_v55 = vsub.f32 %v4916_v49, %v4916_v49 }
 0x269   : > { %v1872_v30 = vadd.f32 %v1871_v10, %v1735_v24  ;;  %2515 = vmatmul.f32.gmra.mxu2 %v2212_v9  ;;  %v7065_v10 = vpop.permute.xlu0 %2908 }
 0x26b   : > { %v7050_v18 = vadd.f32 %v1968_v40, %v1872_v30  ;;  %v1746_v60 = vpop.f32.mrf.mxu1  ;;  %2641 = vmatmul.f32.gmra.mxu3 %v2213_v58  ;;  %v9010_v30 = vld [vmem:[#allocation32_spill] sm:$0xff] }
 0x26c   : > { %v1614_v35 = vpop.f32.mrf.mxu0  ;;  %v1875_v50 = vpop.f32.mrf.mxu2 }
 0x26d   : > { %9007 = vst [vmem:[#allocation62_spill] sm:$0xff] %v7050_v18  ;;  %v1615_v29 = vadd.f32 %v1614_v35, %v9008_v44  ;;  %3829 = vrot.lane.b32.xlu0 %v7050_v18, %s5092_s15  ;;  %v2229_v35 = vand.u32 4294901760, %v2228_v55  ;;  %v4966_v44 = vsel %vm2937_vm12, 1.0, %v8975_v20 }
 0x26e   : > { %v1972_v45 = vpop.f32.mrf.mxu3  ;;  %4931 = vmatmul.msk.f32.gmra.mxu1 %vm8686_vm13, %v8787_v26  ;;  %v7092_v49 = vsub.f32 %v4966_v44, %v4966_v44  ;;  %vm2938_vm13 = vcmp.eq.s32.totalorder %v5572_v54, %v7044_v39 }
 0x26f   : > { %v1741_v9 = vadd.f32 %v1740_v51, %v1615_v29  ;;  %2216 = vmatmul.f32.gmra.mxu0 %v2215_v36  ;;  %v7073_v51 = vpop.permute.xlu1 %2920  ;;  %v7086_v29 = vpop.permute.xlu2 %2932 }
 0x271   : > { %v1876_v38 = vadd.f32 %v1875_v50, %v1741_v9  ;;  %2520 = vmatmul.f32.gmra.mxu2 %v2220_v27  ;;  %v2223_v27 = vand.u32 4294901760, %v2222_v42  ;;  %v4917_v50 = vsel %vm8701_vm15, 1.0, %v8975_v20 }
 0x273   : > { %v7071_v58 = vadd.f32 %v1972_v45, %v1876_v38  ;;  %v1752_v40 = vpop.f32.mrf.mxu1  ;;  %2647 = vmatmul.f32.gmra.mxu3 %v2221_v14  ;;  %v2236_v45 = vsub.f32 %v4917_v50, %v4917_v50  ;;  %v2230_v38 = vsub.f32 %v2228_v55, %v2229_v35 }
 0x274   : > { %v1619_v11 = vpop.f32.mrf.mxu0  ;;  %v1879_v24 = vpop.f32.mrf.mxu2 }
 0x275   : > { %9009 = vst [vmem:[#allocation44_spill] sm:$0xff] %v7071_v58  ;;  %v1620_v2 = vadd.f32 %v1619_v11, %v9010_v30  ;;  %3831 = vrot.lane.b32.xlu1 %v7071_v58, %s5092_s15  ;;  %v7098_v11 = vpop.permute.xlu0 %2917  ;;  %v2237_v33 = vand.u32 4294901760, %v2236_v45 }
 0x276   : > { %v1976_v36 = vpop.f32.mrf.mxu3  ;;  %4932 = vmatmul.msk.f32.gmra.mxu1 %vm8702_vm14, %v8787_v26  ;;  %vm2940_vm14 = vcmp.eq.s32.totalorder %v5572_v54, %v6975_v28 }
 0x277   : > { %v1747_v14 = vadd.f32 %v1746_v60, %v1620_v2  ;;  %2224 = vmatmul.f32.gmra.mxu0 %v2223_v27  ;;  %v8705_v60 = vand.u32 4294901760, %v7092_v49 }
 0x279   : > { %v1880_v9 = vadd.f32 %v1879_v24, %v1747_v14  ;;  %2525 = vmatmul.f32.gmra.mxu2 %v2228_v55  ;;  %v2231_v55 = vand.u32 4294901760, %v2230_v38  ;;  %v4967_v24 = vsel %vm2938_vm13, 1.0, %v8975_v20  ;;  %v3020_v44 = vsub.f32 %v7092_v49, %v8705_v60 }
 0x27b   : > { %v7096_v42 = vadd.f32 %v1976_v36, %v1880_v9  ;;  %v1758_v30 = vpop.f32.mrf.mxu1  ;;  %2653 = vmatmul.f32.gmra.mxu3 %v2229_v35  ;;  %v7112_v35 = vpop.permute.xlu1 %2929  ;;  %v7117_v36 = vsub.f32 %v4967_v24, %v4967_v24  ;;  %v9012_v9 = vld [vmem:[#allocation6_spill] sm:$0xff] }
 0x27c   : > { %v1624_v58 = vpop.f32.mrf.mxu0  ;;  %v1883_v18 = vpop.f32.mrf.mxu2 }
 0x27d   : > { %9011 = vst [vmem:[#allocation43_spill] sm:$0xff] %v7096_v42  ;;  %v1625_v2 = vadd.f32 %v1624_v58, %v6735_v1  ;;  %3833 = vrot.lane.b32.xlu2 %v7096_v42, %s5092_s15  ;;  %v3810_v1 = vpop.permute.xlu2 %3809  ;;  %v2238_v58 = vsub.f32 %v2236_v45, %v2237_v33 }
 0x27e   : > { %v1980_v27 = vpop.f32.mrf.mxu3  ;;  %4933 = vmatmul.msk.f32.gmra.mxu1 %vm8701_vm15, %v8787_v26  ;;  %v3856_v38 = vmul.f32 %v3810_v1, %v9012_v9  ;;  %vm2939_vm15 = vcmp.eq.s32.totalorder %v5572_v54, %v6996_v6 }
 0x27f   : > { %v1753_v50 = vadd.f32 %v1752_v40, %v1625_v2  ;;  %2232 = vmatmul.f32.gmra.mxu0 %v2231_v55  ;;  %v2239_v40 = vand.u32 4294901760, %v2238_v58  ;;  %v3021_v2 = vand.u32 4294901760, %v3020_v44  ;;  %v7124_v55 = vpop.permute.xlu0 %2926 }
 0x281   : > { %v1884_v14 = vadd.f32 %v1883_v18, %v1753_v50  ;;  %2530 = vmatmul.f32.gmra.mxu2 %v2236_v45  ;;  %v8703_v18 = vand.u32 4294901760, %v7117_v36 }
 0x283   : > { %v7120_v42 = vadd.f32 %v1980_v27, %v1884_v14  ;;  %v2342_v41 = vpop.f32.mrf.mxu1  ;;  %2659 = vmatmul.f32.gmra.mxu3 %v2237_v33  ;;  %v9014_v27 = vld [vmem:[#allocation50_spill] sm:$0xff]  ;;  %v3028_v1 = vsub.f32 %v7117_v36, %v8703_v18 }
 0x284   : > { %v1629_v56 = vpop.f32.mrf.mxu0  ;;  %v1887_v34 = vpop.f32.mrf.mxu2 }
 0x285   : > { %9013 = vst [vmem:[#allocation55_spill] sm:$0xff] %v7120_v42  ;;  %v1630_v24 = vadd.f32 %v1629_v56, %v6761_v31  ;;  %3835 = vrot.lane.b32.xlu0 %v7120_v42, %s5092_s15  ;;  %4241 = vrot.lane.b32.xlu2 %v3856_v38, %s5093_s23  ;;  %v4968_v31 = vsel %vm2939_vm15, 1.0, %v8975_v20 }
 0x286   : > { %v1984_v33 = vpop.f32.mrf.mxu3  ;;  %4950 = vmatmul.msk.f32.vlgmr.msra.gmra.mxu1 %vm2035_vm0, %v8787_v26  ;;  %v7144_v58 = vsub.f32 %v4968_v31, %v4968_v31 }
 0x287   : > { %v3808_v45 = vpop.permute.xlu1 %3807  ;;  %2240 = vmatmul.f32.gmra.mxu0 %v2239_v40  ;;  %v1759_v56 = vadd.f32 %v1758_v30, %v1630_v24 }
 0x288   : > { %v3855_v50 = vmul.f32 %v3808_v45, %v9014_v27  ;;  %v7156_v45 = vpop.permute.xlu0 %2935 }
 0x289   : > { %3022 = vmatmul.f32.vlgmr.msra.gmra.mxu2 %v3021_v2  ;;  %v1888_v14 = vadd.f32 %v1887_v34, %v1759_v56  ;;  %v3029_v2 = vand.u32 4294901760, %v3028_v1  ;;  %v8704_v34 = vand.u32 4294901760, %v7144_v58  ;;  %v9016_v1 = vld [vmem:[#allocation10_spill] sm:$0xff] }
 0x28a   : > { %4239 = vrot.lane.b32.xlu1 %v3855_v50, %s5093_s23 }
 0x28b   : > { %v2346_v44 = vpop.f32.mrf.mxu1  ;;  %4982 = vmatmul.msk.f32.vlgmr.msra.gmra.mxu3 %vm2937_vm12, %v8787_v26  ;;  %v7167_v56 = vadd.f32 %v1984_v33, %v1888_v14  ;;  %v3036_v33 = vsub.f32 %v7144_v58, %v8704_v34 }
 0x28c   : > { %v2121_v38 = vpop.f32.mrf.mxu0  ;;  %v2456_v30 = vpop.f32.mrf.mxu2 }
 0x28d   : > { %v2343_v40 = vadd.f32 %v2342_v41, %v2121_v38  ;;  %v4969_v41 = vsel %vm2940_vm14, 1.0, %v8975_v20  ;;  %9015 = vst [vmem:[#allocation69_spill] sm:$0xff] %v7167_v56 }
 0x28e   : > { %v2570_v24 = vpop.f32.mrf.mxu3  ;;  %4951 = vmatmul.msk.f32.gmra.mxu1 %vm2036_vm2, %v8787_v26  ;;  %v7175_v21 = vsub.f32 %v4969_v41, %v4969_v41  ;;  %v3037_v41 = vand.u32 4294901760, %v3036_v33 }
 0x28f   : > { %v2457_v31 = vadd.f32 %v2456_v30, %v2343_v40  ;;  %v3816_v50 = vpop.permute.xlu2 %3815  ;;  %4934 = vmatmul.msk.f32.vlgmr.msra.gmra.mxu0 %vm2035_vm0, %v8787_v26  ;;  %vm2941_vm0 = vcmp.eq.s32.totalorder %v5572_v54, %v7025_v25 }
 0x290   : > { %v3859_v38 = vmul.f32 %v3816_v50, %v9016_v1 }
 0x291   : > { %v7170_v18 = vadd.f32 %v2570_v24, %v2457_v31  ;;  %3030 = vmatmul.f32.gmra.mxu2 %v3029_v2 }
 0x292   : > { %4247 = vrot.lane.b32.xlu2 %v3859_v38, %s5093_s23  ;;  %3837 = vrot.lane.b32.xlu1 %v7167_v56, %s5092_s15  ;;  %v8708_v38 = vand.u32 4294901760, %v7175_v21 }
 0x293   : > { %v2350_v30 = vpop.f32.mrf.mxu1  ;;  %4983 = vmatmul.msk.f32.gmra.mxu3 %vm2938_vm13, %v8787_v26 }
 0x294   : > { %v2129_v14 = vpop.f32.mrf.mxu0  ;;  %v2461_v40 = vpop.f32.mrf.mxu2  ;;  %v3044_v33 = vsub.f32 %v7175_v21, %v8708_v38 }
 0x295   : > { %v2347_v2 = vadd.f32 %v2346_v44, %v2129_v14  ;;  %v4970_v44 = vsel %vm2941_vm0, 1.0, %v8975_v20  ;;  %v9017_v14 = vld [vmem:[#allocation8_spill] sm:$0xff] }
 0x296   : > { %v2576_v24 = vpop.f32.mrf.mxu3  ;;  %4952 = vmatmul.msk.f32.gmra.mxu1 %vm2037_vm1, %v8787_v26 }
 0x297   : > { %v2462_v31 = vadd.f32 %v2461_v40, %v2347_v2  ;;  %4935 = vmatmul.msk.f32.gmra.mxu0 %vm2036_vm2, %v8787_v26  ;;  %v3812_v50 = vpop.permute.xlu0 %3811  ;;  %v7203_v40 = vsub.f32 %v4970_v44, %v4970_v44  ;;  %vm2942_vm2 = vcmp.eq.s32.totalorder %v5572_v54, %v7006_v3 }
 0x298   : > { %v3857_v34 = vmul.f32 %v3812_v50, %v9017_v14 }
 0x299   : > { %v7200_v60 = vadd.f32 %v2576_v24, %v2462_v31  ;;  %3038 = vmatmul.f32.gmra.mxu2 %v3037_v41  ;;  %v3045_v41 = vand.u32 4294901760, %v3044_v33  ;;  %v8713_v44 = vand.u32 4294901760, %v7203_v40 }
 0x29a   : > { %4243 = vrot.lane.b32.xlu0 %v3857_v34, %s5093_s23 }
 0x29b   : > { %v2354_v52 = vpop.f32.mrf.mxu1  ;;  %4984 = vmatmul.msk.f32.gmra.mxu3 %vm2939_vm15, %v8787_v26  ;;  %v3052_v15 = vsub.f32 %v7203_v40, %v8713_v44 }
 0x29c   : > { %v2137_v2 = vpop.f32.mrf.mxu0  ;;  %v2466_v56 = vpop.f32.mrf.mxu2 }
 0x29d   : > { %v2351_v24 = vadd.f32 %v2350_v30, %v2137_v2  ;;  %v4971_v30 = vsel %vm2942_vm2, 1.0, %v8975_v20  ;;  %v9018_v2 = vld [vmem:[#allocation9_spill] sm:$0xff] }
 0x29e   : > { %v2582_v31 = vpop.f32.mrf.mxu3  ;;  %4953 = vmatmul.msk.f32.gmra.mxu1 %vm2038_vm3, %v8787_v26 }
 0x29f   : > { %v2467_v34 = vadd.f32 %v2466_v56, %v2351_v24  ;;  %v3814_v50 = vpop.permute.xlu1 %3813  ;;  %4936 = vmatmul.msk.f32.gmra.mxu0 %vm2037_vm1, %v8787_v26  ;;  %v7231_v56 = vsub.f32 %v4971_v30, %v4971_v30  ;;  %vm2943_vm1 = vcmp.eq.s32.totalorder %v5572_v54, %v7065_v10 }
 0x2a0   : > { %v3858_v38 = vmul.f32 %v3814_v50, %v9018_v2 }
 0x2a1   : > { %v7228_v42 = vadd.f32 %v2582_v31, %v2467_v34  ;;  %3046 = vmatmul.f32.gmra.mxu2 %v3045_v41  ;;  %v3053_v41 = vand.u32 4294901760, %v3052_v15  ;;  %v8718_v30 = vand.u32 4294901760, %v7231_v56 }
 0x2a2   : > { %4245 = vrot.lane.b32.xlu1 %v3858_v38, %s5093_s23 }
 0x2a3   : > { %v2358_v24 = vpop.f32.mrf.mxu1  ;;  %4985 = vmatmul.msk.f32.gmra.mxu3 %vm2940_vm14, %v8787_v26  ;;  %v3060_v0 = vsub.f32 %v7231_v56, %v8718_v30 }
 0x2a4   : > { %v2145_v33 = vpop.f32.mrf.mxu0  ;;  %v2471_v46 = vpop.f32.mrf.mxu2 }
 0x2a5   : > { %v2355_v31 = vadd.f32 %v2354_v52, %v2145_v33  ;;  %v4972_v52 = vsel %vm2943_vm1, 1.0, %v8975_v20  ;;  %v9019_v33 = vld [vmem:[#allocation17_spill] sm:$0xff] }
 0x2a6   : > { %v2588_v34 = vpop.f32.mrf.mxu3  ;;  %4954 = vmatmul.msk.f32.gmra.mxu1 %vm2039_vm4, %v8787_v26 }
 0x2a7   : > { %v2472_v38 = vadd.f32 %v2471_v46, %v2355_v31  ;;  %v3822_v50 = vpop.permute.xlu2 %3821  ;;  %4937 = vmatmul.msk.f32.gmra.mxu0 %vm2038_vm3, %v8787_v26  ;;  %v7259_v46 = vsub.f32 %v4972_v52, %v4972_v52  ;;  %vm2944_vm3 = vcmp.eq.s32.totalorder %v5572_v54, %v7046_v57 }
 0x2a8   : > { %v3862_v44 = vmul.f32 %v3822_v50, %v9019_v33 }
 0x2a9   : > { %v7256_v4 = vadd.f32 %v2588_v34, %v2472_v38  ;;  %3054 = vmatmul.f32.gmra.mxu2 %v3053_v41  ;;  %v3061_v41 = vand.u32 4294901760, %v3060_v0  ;;  %v8719_v52 = vand.u32 4294901760, %v7259_v46 }
 0x2aa   : > { %4253 = vrot.lane.b32.xlu2 %v3862_v44, %s5093_s23 }
 0x2ab   : > { %v2362_v31 = vpop.f32.mrf.mxu1  ;;  %4986 = vmatmul.msk.f32.gmra.mxu3 %vm2941_vm0, %v8787_v26  ;;  %v3068_v0 = vsub.f32 %v7259_v46, %v8719_v52 }
 0x2ac   : > { %v2153_v15 = vpop.f32.mrf.mxu0  ;;  %v2476_v32 = vpop.f32.mrf.mxu2 }
 0x2ad   : > { %v2359_v34 = vadd.f32 %v2358_v24, %v2153_v15  ;;  %v4973_v24 = vsel %vm2944_vm3, 1.0, %v8975_v20  ;;  %v9020_v15 = vld [vmem:[#allocation11_spill] sm:$0xff] }
 0x2ae   : > { %v2594_v38 = vpop.f32.mrf.mxu3  ;;  %4955 = vmatmul.msk.f32.gmra.mxu1 %vm2040_vm5, %v8787_v26 }
 0x2af   : > { %v2477_v44 = vadd.f32 %v2476_v32, %v2359_v34  ;;  %4938 = vmatmul.msk.f32.gmra.mxu0 %vm2039_vm4, %v8787_v26  ;;  %v3818_v50 = vpop.permute.xlu0 %3817  ;;  %v7287_v32 = vsub.f32 %v4973_v24, %v4973_v24  ;;  %vm2945_vm4 = vcmp.eq.s32.totalorder %v5572_v54, %v7027_v7 }
 0x2b0   : > { %v3860_v30 = vmul.f32 %v3818_v50, %v9020_v15 }
 0x2b1   : > { %v7284_v33 = vadd.f32 %v2594_v38, %v2477_v44  ;;  %3062 = vmatmul.f32.gmra.mxu2 %v3061_v41  ;;  %v3069_v41 = vand.u32 4294901760, %v3068_v0  ;;  %v8722_v24 = vand.u32 4294901760, %v7287_v32 }
 0x2b2   : > { %4249 = vrot.lane.b32.xlu0 %v3860_v30, %s5093_s23 }
 0x2b3   : > { %v2366_v8 = vpop.f32.mrf.mxu1  ;;  %4987 = vmatmul.msk.f32.gmra.mxu3 %vm2942_vm2, %v8787_v26  ;;  %v3076_v53 = vsub.f32 %v7287_v32, %v8722_v24 }
 0x2b4   : > { %v2161_v34 = vpop.f32.mrf.mxu0  ;;  %v2481_v1 = vpop.f32.mrf.mxu2 }
 0x2b5   : > { %v2363_v38 = vadd.f32 %v2362_v31, %v2161_v34  ;;  %v4974_v31 = vsel %vm2945_vm4, 1.0, %v8975_v20  ;;  %v9021_v34 = vld [vmem:[#allocation16_spill] sm:$0xff] }
 0x2b6   : > { %v2600_v44 = vpop.f32.mrf.mxu3  ;;  %4956 = vmatmul.msk.f32.gmra.mxu1 %vm2041_vm6, %v8787_v26 }
 0x2b7   : > { %v2482_v30 = vadd.f32 %v2481_v1, %v2363_v38  ;;  %v3820_v50 = vpop.permute.xlu1 %3819  ;;  %4939 = vmatmul.msk.f32.gmra.mxu0 %vm2040_vm5, %v8787_v26  ;;  %v7315_v1 = vsub.f32 %v4974_v31, %v4974_v31  ;;  %vm2946_vm5 = vcmp.eq.s32.totalorder %v5572_v54, %v7098_v11 }
 0x2b8   : > { %v3861_v52 = vmul.f32 %v3820_v50, %v9021_v34 }
 0x2b9   : > { %v7312_v15 = vadd.f32 %v2600_v44, %v2482_v30  ;;  %3070 = vmatmul.f32.gmra.mxu2 %v3069_v41  ;;  %v3077_v41 = vand.u32 4294901760, %v3076_v53  ;;  %v8725_v31 = vand.u32 4294901760, %v7315_v1 }
 0x2ba   : > { %4251 = vrot.lane.b32.xlu1 %v3861_v52, %s5093_s23 }
 0x2bb   : > { %v2370_v38 = vpop.f32.mrf.mxu1  ;;  %4988 = vmatmul.msk.f32.gmra.mxu3 %vm2943_vm1, %v8787_v26  ;;  %v3084_v16 = vsub.f32 %v7315_v1, %v8725_v31 }
 0x2bc   : > { %v2169_v0 = vpop.f32.mrf.mxu0  ;;  %v2486_v5 = vpop.f32.mrf.mxu2 }
 0x2bd   : > { %v2367_v44 = vadd.f32 %v2366_v8, %v2169_v0  ;;  %v4975_v8 = vsel %vm2946_vm5, 1.0, %v8975_v20  ;;  %v9022_v0 = vld [vmem:[#allocation24_spill] sm:$0xff] }
 0x2be   : > { %v2606_v30 = vpop.f32.mrf.mxu3  ;;  %4957 = vmatmul.msk.f32.gmra.mxu1 %vm2042_vm9, %v8787_v26 }
 0x2bf   : > { %v2487_v52 = vadd.f32 %v2486_v5, %v2367_v44  ;;  %v3828_v50 = vpop.permute.xlu2 %3827  ;;  %4940 = vmatmul.msk.f32.gmra.mxu0 %vm2041_vm6, %v8787_v26  ;;  %v7343_v5 = vsub.f32 %v4975_v8, %v4975_v8  ;;  %vm8731_vm6 = vcmp.eq.s32.totalorder %v5572_v54, %v7073_v51 }
 0x2c0   : > { %v3865_v24 = vmul.f32 %v3828_v50, %v9022_v0 }
 0x2c1   : > { %v7340_v34 = vadd.f32 %v2606_v30, %v2487_v52  ;;  %3078 = vmatmul.f32.gmra.mxu2 %v3077_v41  ;;  %v3085_v41 = vand.u32 4294901760, %v3084_v16  ;;  %v8726_v8 = vand.u32 4294901760, %v7343_v5 }
 0x2c2   : > { %4259 = vrot.lane.b32.xlu2 %v3865_v24, %s5093_s23 }
 0x2c3   : > { %v2374_v44 = vpop.f32.mrf.mxu1  ;;  %4989 = vmatmul.msk.f32.gmra.mxu3 %vm2944_vm3, %v8787_v26  ;;  %v3092_v16 = vsub.f32 %v7343_v5, %v8726_v8 }
 0x2c4   : > { %v2177_v53 = vpop.f32.mrf.mxu0  ;;  %v2491_v62 = vpop.f32.mrf.mxu2 }
 0x2c5   : > { %v2371_v30 = vadd.f32 %v2370_v38, %v2177_v53  ;;  %v4976_v38 = vsel %vm8731_vm6, 1.0, %v8975_v20  ;;  %v9023_v53 = vld [vmem:[#allocation18_spill] sm:$0xff] }
 0x2c6   : > { %v2612_v52 = vpop.f32.mrf.mxu3  ;;  %4958 = vmatmul.msk.f32.gmra.mxu1 %vm2043_vm10, %v8787_v26 }
 0x2c7   : > { %v2492_v24 = vadd.f32 %v2491_v62, %v2371_v30  ;;  %4941 = vmatmul.msk.f32.gmra.mxu0 %vm2042_vm9, %v8787_v26  ;;  %v3824_v50 = vpop.permute.xlu0 %3823  ;;  %v7371_v62 = vsub.f32 %v4976_v38, %v4976_v38  ;;  %vm2948_vm9 = vcmp.eq.s32.totalorder %v5572_v54, %v7052_v47 }
 0x2c8   : > { %v3863_v31 = vmul.f32 %v3824_v50, %v9023_v53 }
 0x2c9   : > { %v7368_v0 = vadd.f32 %v2612_v52, %v2492_v24  ;;  %3086 = vmatmul.f32.gmra.mxu2 %v3085_v41  ;;  %v3093_v41 = vand.u32 4294901760, %v3092_v16  ;;  %v8727_v38 = vand.u32 4294901760, %v7371_v62 }
 0x2ca   : > { %4255 = vrot.lane.b32.xlu0 %v3863_v31, %s5093_s23 }
 0x2cb   : > { %v2378_v22 = vpop.f32.mrf.mxu1  ;;  %4990 = vmatmul.msk.f32.gmra.mxu3 %vm2945_vm4, %v8787_v26  ;;  %v3100_v63 = vsub.f32 %v7371_v62, %v8727_v38 }
 0x2cc   : > { %v2185_v30 = vpop.f32.mrf.mxu0  ;;  %v2496_v2 = vpop.f32.mrf.mxu2 }
 0x2cd   : > { %v2375_v52 = vadd.f32 %v2374_v44, %v2185_v30  ;;  %v4977_v44 = vsel %vm2948_vm9, 1.0, %v8975_v20  ;;  %v9024_v30 = vld [vmem:[#allocation19_spill] sm:$0xff] }
 0x2ce   : > { %v2618_v24 = vpop.f32.mrf.mxu3  ;;  %4959 = vmatmul.msk.f32.gmra.mxu1 %vm2044_vm11, %v8787_v26 }
 0x2cf   : > { %v2497_v31 = vadd.f32 %v2496_v2, %v2375_v52  ;;  %v3826_v50 = vpop.permute.xlu1 %3825  ;;  %4942 = vmatmul.msk.f32.gmra.mxu0 %vm2043_vm10, %v8787_v26  ;;  %v7399_v2 = vsub.f32 %v4977_v44, %v4977_v44  ;;  %vm8733_vm10 = vcmp.eq.s32.totalorder %v5572_v54, %v7124_v55 }
 0x2d0   : > { %v3864_v8 = vmul.f32 %v3826_v50, %v9024_v30 }
 0x2d1   : > { %v7396_v53 = vadd.f32 %v2618_v24, %v2497_v31  ;;  %3094 = vmatmul.f32.gmra.mxu2 %v3093_v41  ;;  %v3101_v41 = vand.u32 4294901760, %v3100_v63  ;;  %v8730_v44 = vand.u32 4294901760, %v7399_v2 }
 0x2d2   : > { %4257 = vrot.lane.b32.xlu1 %v3864_v8, %s5093_s23 }
 0x2d3   : > { %v2382_v52 = vpop.f32.mrf.mxu1  ;;  %4991 = vmatmul.msk.f32.gmra.mxu3 %vm2946_vm5, %v8787_v26  ;;  %v3108_v37 = vsub.f32 %v7399_v2, %v8730_v44 }
 0x2d4   : > { %v2193_v16 = vpop.f32.mrf.mxu0  ;;  %v2501_v14 = vpop.f32.mrf.mxu2 }
 0x2d5   : > { %v2379_v24 = vadd.f32 %v2378_v22, %v2193_v16  ;;  %v4978_v22 = vsel %vm8733_vm10, 1.0, %v8975_v20  ;;  %v9025_v16 = vld [vmem:[#allocation30_spill] sm:$0xff] }
 0x2d6   : > { %v2624_v31 = vpop.f32.mrf.mxu3  ;;  %4960 = vmatmul.msk.f32.gmra.mxu1 %vm2045_vm7, %v8787_v26 }
 0x2d7   : > { %v2502_v8 = vadd.f32 %v2501_v14, %v2379_v24  ;;  %v3834_v50 = vpop.permute.xlu2 %3833  ;;  %4943 = vmatmul.msk.f32.gmra.mxu0 %vm2044_vm11, %v8787_v26  ;;  %v7427_v14 = vsub.f32 %v4978_v22, %v4978_v22  ;;  %vm2950_vm11 = vcmp.eq.s32.totalorder %v5572_v54, %v7112_v35 }
 0x2d8   : > { %v3868_v38 = vmul.f32 %v3834_v50, %v9025_v16 }
 0x2d9   : > { %v7424_v30 = vadd.f32 %v2624_v31, %v2502_v8  ;;  %3102 = vmatmul.f32.gmra.mxu2 %v3101_v41  ;;  %v3109_v41 = vand.u32 4294901760, %v3108_v37  ;;  %v8732_v22 = vand.u32 4294901760, %v7427_v14 }
 0x2da   : > { %4265 = vrot.lane.b32.xlu2 %v3868_v38, %s5093_s23 }
 0x2db   : > { %v2386_v24 = vpop.f32.mrf.mxu1  ;;  %4992 = vmatmul.msk.f32.gmra.mxu3 %vm8731_vm6, %v8787_v26  ;;  %v3116_v37 = vsub.f32 %v7427_v14, %v8732_v22  ;;  %vm9027_vm6 = vcmp.eq.s32.totalorder %v5572_v54, %v6949_v23 }
 0x2dc   : > { %v2201_v63 = vpop.f32.mrf.mxu0  ;;  %v2506_v17 = vpop.f32.mrf.mxu2 }
 0x2dd   : > { %v2383_v31 = vadd.f32 %v2382_v52, %v2201_v63  ;;  %v4979_v52 = vsel %vm2950_vm11, 1.0, %v8975_v20  ;;  %v9026_v63 = vld [vmem:[#allocation25_spill] sm:$0xff] }
 0x2de   : > { %v2630_v8 = vpop.f32.mrf.mxu3  ;;  %4961 = vmatmul.msk.f32.gmra.mxu1 %vm2046_vm8, %v8787_v26 }
 0x2df   : > { %v2507_v38 = vadd.f32 %v2506_v17, %v2383_v31  ;;  %4944 = vmatmul.msk.f32.gmra.mxu0 %vm2045_vm7, %v8787_v26  ;;  %v3830_v50 = vpop.permute.xlu0 %3829  ;;  %v7455_v17 = vsub.f32 %v4979_v52, %v4979_v52  ;;  %vm2951_vm7 = vcmp.eq.s32.totalorder %v5572_v54, %v7086_v29  ;;  %v7744_v7 = vpop.permute.xlu2 %4241 }
 0x2e0   : > { %v3866_v44 = vmul.f32 %v3830_v50, %v9026_v63  ;;  %9047 = vst [vmem:[#allocation45_spill] sm:$0xff] %v7744_v7 }
 0x2e1   : > { %v7452_v16 = vadd.f32 %v2630_v8, %v2507_v38  ;;  %3110 = vmatmul.f32.gmra.mxu2 %v3109_v41  ;;  %v3117_v41 = vand.u32 4294901760, %v3116_v37  ;;  %v8734_v52 = vand.u32 4294901760, %v7455_v17 }
 0x2e2   : > { %4261 = vrot.lane.b32.xlu0 %v3866_v44, %s5093_s23 }
 0x2e3   : > { %v2390_v43 = vpop.f32.mrf.mxu1  ;;  %4993 = vmatmul.msk.f32.gmra.mxu3 %vm2948_vm9, %v8787_v26  ;;  %v3124_v61 = vsub.f32 %v7455_v17, %v8734_v52 }
 0x2e4   : > { %v2209_v31 = vpop.f32.mrf.mxu0  ;;  %v2511_v9 = vpop.f32.mrf.mxu2 }
 0x2e5   : > { %v2387_v8 = vadd.f32 %v2386_v24, %v2209_v31  ;;  %v4980_v24 = vsel %vm2951_vm7, 1.0, %v8975_v20  ;;  %v9028_v31 = vld [vmem:[#allocation26_spill] sm:$0xff] }
 0x2e6   : > { %v2636_v38 = vpop.f32.mrf.mxu3  ;;  %4962 = vmatmul.msk.f32.gmra.mxu1 %vm9027_vm6, %v8787_v26  ;;  %vm9029_vm6 = vcmp.eq.s32.totalorder %v5572_v54, %v6934_v19 }
 0x2e7   : > { %v2512_v44 = vadd.f32 %v2511_v9, %v2387_v8  ;;  %v3832_v50 = vpop.permute.xlu1 %3831  ;;  %4945 = vmatmul.msk.f32.gmra.mxu0 %vm2046_vm8, %v8787_v26  ;;  %v7483_v9 = vsub.f32 %v4980_v24, %v4980_v24  ;;  %vm2952_vm8 = vcmp.eq.s32.totalorder %v5572_v54, %v7156_v45  ;;  %v9081_v45 = vld [vmem:[#allocation6_spill] sm:$0xff] }
 0x2e8   : > { %v3867_v22 = vmul.f32 %v3832_v50, %v9028_v31 }
 0x2e9   : > { %v7480_v63 = vadd.f32 %v2636_v38, %v2512_v44  ;;  %3118 = vmatmul.f32.gmra.mxu2 %v3117_v41  ;;  %v3125_v41 = vand.u32 4294901760, %v3124_v61  ;;  %v8737_v24 = vand.u32 4294901760, %v7483_v9 }
 0x2ea   : > { %4263 = vrot.lane.b32.xlu1 %v3867_v22, %s5093_s23 }
 0x2eb   : > { %v2394_v8 = vpop.f32.mrf.mxu1  ;;  %4994 = vmatmul.msk.f32.gmra.mxu3 %vm8733_vm10, %v8787_v26  ;;  %vm9030_vm10 = vcmp.eq.s32.totalorder %v5572_v54, %v6949_v23  ;;  %v3132_v23 = vsub.f32 %v7483_v9, %v8737_v24 }
 0x2ec   : > { %v2217_v37 = vpop.f32.mrf.mxu0  ;;  %v2516_v44 = vpop.f32.mrf.mxu2 }
 0x2ed   : > { %v2391_v38 = vadd.f32 %v2390_v43, %v2217_v37  ;;  %v4981_v43 = vsel %vm2952_vm8, 1.0, %v8975_v20  ;;  %v7766_v11 = vpop.permute.xlu2 %4247 }
 0x2ee   : > { %v2642_v50 = vpop.f32.mrf.mxu3  ;;  %4963 = vmatmul.msk.f32.gmra.mxu1 %vm9029_vm6, %v8787_v26  ;;  %v7509_v52 = vsub.f32 %v4981_v43, %v4981_v43  ;;  %v9032_v43 = vld [vmem:[#allocation33_spill] sm:$0xff]  ;;  %9051 = vst [vmem:[#allocation61_spill] sm:$0xff] %v7766_v11 }
 0x2ef   : > { %v2517_v22 = vadd.f32 %v2516_v44, %v2391_v38  ;;  %4946 = vmatmul.msk.f32.gmra.mxu0 %vm9030_vm10, %v8787_v26  ;;  %vm9031_vm10 = vcmp.eq.s32.totalorder %v5572_v54, %v7023_v59 }
 0x2f1   : > { %v7507_v37 = vadd.f32 %v2642_v50, %v2517_v22  ;;  %3126 = vmatmul.f32.gmra.mxu2 %v3125_v41  ;;  %v3133_v22 = vand.u32 4294901760, %v3132_v23  ;;  %v8738_v41 = vand.u32 4294901760, %v7509_v52 }
 0x2f3   : > { %v2398_v31 = vpop.f32.mrf.mxu1  ;;  %4995 = vmatmul.msk.f32.gmra.mxu3 %vm2950_vm11, %v8787_v26  ;;  %v3140_v19 = vsub.f32 %v7509_v52, %v8738_v41 }
 0x2f4   : > { %v2225_v61 = vpop.f32.mrf.mxu0  ;;  %v2521_v44 = vpop.f32.mrf.mxu2 }
 0x2f5   : > { %v2395_v38 = vadd.f32 %v2394_v8, %v2225_v61 }
 0x2f6   : > { %v2648_v12 = vpop.f32.mrf.mxu3  ;;  %4964 = vmatmul.msk.f32.gmra.mxu1 %vm9031_vm10, %v8787_v26  ;;  %vm9034_vm10 = vcmp.eq.s32.totalorder %v5572_v54, %v6977_v48 }
 0x2f7   : > { %v2522_v20 = vadd.f32 %v2521_v44, %v2395_v38  ;;  %4947 = vmatmul.msk.f32.gmra.mxu0 %vm9029_vm6, %v8787_v26  ;;  %v3836_v50 = vpop.permute.xlu0 %3835  ;;  %vm9035_vm6 = vcmp.eq.s32.totalorder %v5572_v54, %v7023_v59  ;;  %v9037_v59 = vand.u32 4294901760, %v7092_v49 }
 0x2f8   : > { %v3869_v24 = vmul.f32 %v3836_v50, %v9032_v43 }
 0x2f9   : > { %v7528_v8 = vadd.f32 %v2648_v12, %v2522_v20  ;;  %3134 = vmatmul.f32.gmra.mxu2 %v3133_v22  ;;  %v3141_v20 = vand.u32 4294901760, %v3140_v19 }
 0x2fa   : > { %4267 = vrot.lane.b32.xlu0 %v3869_v24, %s5093_s23 }
 0x2fb   : > { %v2402_v61 = vpop.f32.mrf.mxu1  ;;  %4996 = vmatmul.msk.f32.gmra.mxu3 %vm2951_vm7, %v8787_v26 }
 0x2fc   : > { %v7538_v23 = vpop.permute.xlu1 %4239  ;;  %v2233_v38 = vpop.f32.mrf.mxu0 }
 0x2fd   : > { %9033 = vst [vmem:[#allocation31_spill] sm:$0xff] %v7538_v23  ;;  %v2399_v44 = vadd.f32 %v2398_v31, %v2233_v38  ;;  %v2526_v50 = vpop.f32.mrf.mxu2  ;;  %v9036_v38 = vld [vmem:[#allocation35_spill] sm:$0xff] }
 0x2fe   : > { %v2654_v12 = vpop.f32.mrf.mxu3  ;;  %4965 = vmatmul.msk.f32.gmra.mxu1 %vm9034_vm10, %v8787_v26 }
 0x2ff   : > { %v2527_v24 = vadd.f32 %v2526_v50, %v2399_v44  ;;  %4948 = vmatmul.msk.f32.gmra.mxu0 %vm9035_vm6, %v8787_v26 }
 0x301   : > { %v7548_v22 = vadd.f32 %v2654_v12, %v2527_v24  ;;  %3142 = vmatmul.f32.gmra.mxu2 %v3141_v20  ;;  %v9038_v20 = vand.u32 4294901760, %v7117_v36 }
 0x303   : > { %v2826_v41 = vpop.f32.mrf.mxu1  ;;  %4997 = vmatmul.msk.f32.gmra.mxu3 %vm2952_vm8, %v8787_v26 }
 0x304   : > { %v3838_v31 = vpop.permute.xlu1 %3837  ;;  %v2241_v43 = vpop.f32.mrf.mxu0 }
 0x305   : > { %v3870_v23 = vmul.f32 %v3838_v31, %v9036_v38  ;;  %v2531_v44 = vpop.f32.mrf.mxu2  ;;  %v2403_v50 = vadd.f32 %v2402_v61, %v2241_v43 }
 0x306   : > { %v2660_v27 = vpop.f32.mrf.mxu3  ;;  %3471 = vmatmul.f32.vlgmr.msrb.gmra.mxu1 %v9037_v59 }
 0x307   : > { %4269 = vrot.lane.b32.xlu1 %v3870_v23, %s5093_s23  ;;  %4949 = vmatmul.msk.f32.gmra.mxu0 %vm9034_vm10, %v8787_v26  ;;  %v2532_v19 = vadd.f32 %v2531_v44, %v2403_v50  ;;  %v9039_v50 = vand.u32 4294901760, %v7144_v58 }
 0x309   : > { %4998 = vmatmul.msk.f32.vlgmr.msrb.gmra.mxu2 %vm2937_vm12, %v8787_v26  ;;  %v7566_v12 = vadd.f32 %v2660_v27, %v2532_v19 }
 0x30b   : > { %v2830_v43 = vpop.f32.mrf.mxu1  ;;  %5014 = vmatmul.msk.f32.vlgmr.msrb.gmra.mxu3 %vm2937_vm12, %v8787_v26  ;;  %vm9050_vm12 = vcmp.eq.s32.totalorder %v5572_v54, %v7073_v51  ;;  %v7790_v51 = vpop.permute.xlu2 %4253 }
 0x30c   : > { %v2729_v61 = vpop.f32.mrf.mxu0  ;;  %9056 = vst [vmem:[#allocation56_spill] sm:$0xff] %v7790_v51 }
 0x30d   : > { %v3023_v23 = vpop.f32.mrf.mxu2  ;;  %v2730_v24 = vadd.f32 %v2729_v61, %v7170_v18 }
 0x30e   : > { %v3244_v48 = vpop.f32.mrf.mxu3  ;;  %3477 = vmatmul.f32.gmra.mxu1 %v9038_v20 }
 0x30f   : > { %v7575_v31 = vadd.f32 %v3244_v48, %v3023_v23  ;;  %3357 = vmatmul.f32.vlgmr.msrb.gmra.mxu0 %v7092_v49  ;;  %v7578_v27 = vadd.f32 %v2826_v41, %v2730_v24  ;;  %v9040_v23 = vand.u32 4294901760, %v7175_v21 }
 0x311   : > { %4999 = vmatmul.msk.f32.gmra.mxu2 %vm2938_vm13, %v8787_v26  ;;  %4031 = vrot.lane.b32.xlu1 %v7578_v27, %s5092_s15 }
 0x312   : > { %3887 = vrot.lane.b32.xlu2 %v7578_v27, %s5094_s24 }
 0x313   : > { %v2834_v13 = vpop.f32.mrf.mxu1  ;;  %5015 = vmatmul.msk.f32.gmra.mxu3 %vm2938_vm13, %v8787_v26  ;;  %vm9052_vm13 = vmmov %vm9050_vm12 }
 0x314   : > { %v2733_v49 = vpop.f32.mrf.mxu0 }
 0x315   : > { %v3031_v18 = vpop.f32.mrf.mxu2  ;;  %v2734_v41 = vadd.f32 %v2733_v49, %v7200_v60  ;;  %v9041_v49 = vand.u32 4294901760, %v7203_v40 }
 0x316   : > { %v3248_v44 = vpop.f32.mrf.mxu3  ;;  %3483 = vmatmul.f32.gmra.mxu1 %v9039_v50 }
 0x317   : > { %v7595_v59 = vadd.f32 %v3248_v44, %v3031_v18  ;;  %3362 = vmatmul.f32.gmra.mxu0 %v7117_v36  ;;  %v7598_v19 = vadd.f32 %v2830_v43, %v2734_v41 }
 0x319   : > { %5000 = vmatmul.msk.f32.gmra.mxu2 %vm2939_vm15, %v8787_v26  ;;  %3889 = vrot.lane.b32.xlu0 %v7598_v19, %s5094_s24 }
 0x31a   : > { %4033 = vrot.lane.b32.xlu2 %v7598_v19, %s5092_s15 }
 0x31b   : > { %v2838_v39 = vpop.f32.mrf.mxu1  ;;  %5016 = vmatmul.msk.f32.gmra.mxu3 %vm2939_vm15, %v8787_v26 }
 0x31c   : > { %v2737_v60 = vpop.f32.mrf.mxu0  ;;  %v7820_v47 = vpop.permute.xlu2 %4259 }
 0x31d   : > { %v3039_v36 = vpop.f32.mrf.mxu2  ;;  %v2738_v43 = vadd.f32 %v2737_v60, %v7228_v42  ;;  %9062 = vst [vmem:[#allocation60_spill] sm:$0xff] %v7820_v47 }
 0x31e   : > { %v3252_v61 = vpop.f32.mrf.mxu3  ;;  %3489 = vmatmul.f32.gmra.mxu1 %v9040_v23  ;;  %v9043_v23 = vand.u32 4294901760, %v7259_v46 }
 0x31f   : > { %v7615_v24 = vadd.f32 %v3252_v61, %v3039_v36  ;;  %3367 = vmatmul.f32.gmra.mxu0 %v7144_v58  ;;  %v7618_v48 = vadd.f32 %v2834_v13, %v2738_v43 }
 0x321   : > { %5001 = vmatmul.msk.f32.gmra.mxu2 %vm2940_vm14, %v8787_v26  ;;  %3891 = vrot.lane.b32.xlu1 %v7618_v48, %s5094_s24 }
 0x322   : > { %4035 = vrot.lane.b32.xlu0 %v7618_v48, %s5092_s15 }
 0x323   : > { %v2842_v6 = vpop.f32.mrf.mxu1  ;;  %5017 = vmatmul.msk.f32.gmra.mxu3 %vm2940_vm14, %v8787_v26  ;;  %vm9061_vm14 = vcmp.eq.s32.totalorder %v5572_v54, %v7124_v55 }
 0x324   : > { %v2741_v42 = vpop.f32.mrf.mxu0  ;;  %vm9064_vm15 = vmmov %vm9061_vm14 }
 0x325   : > { %v3047_v58 = vpop.f32.mrf.mxu2  ;;  %v2742_v20 = vadd.f32 %v2741_v42, %v7256_v4 }
 0x326   : > { %v3256_v13 = vpop.f32.mrf.mxu3  ;;  %3495 = vmatmul.f32.gmra.mxu1 %v9041_v49 }
 0x327   : > { %v7635_v18 = vadd.f32 %v3256_v13, %v3047_v58  ;;  %3372 = vmatmul.f32.gmra.mxu0 %v7175_v21  ;;  %v7638_v41 = vadd.f32 %v2838_v39, %v2742_v20  ;;  %v9042_v39 = vand.u32 4294901760, %v7231_v56  ;;  %v9044_v13 = vand.u32 4294901760, %v7287_v32 }
 0x329   : > { %5002 = vmatmul.msk.f32.gmra.mxu2 %vm2941_vm0, %v8787_v26  ;;  %4037 = vrot.lane.b32.xlu1 %v7638_v41, %s5092_s15 }
 0x32a   : > { %3893 = vrot.lane.b32.xlu2 %v7638_v41, %s5094_s24 }
 0x32b   : > { %v2846_v4 = vpop.f32.mrf.mxu1  ;;  %5018 = vmatmul.msk.f32.gmra.mxu3 %vm2941_vm0, %v8787_v26  ;;  %vm4624_vm0 = vcmask 523264  }
 0x32c   : > { %v2745_v28 = vpop.f32.mrf.mxu0 }
 0x32d   : > { %v3055_v21 = vpop.f32.mrf.mxu2  ;;  %v2746_v44 = vadd.f32 %v2745_v28, %v7284_v33 }
 0x32e   : > { %v3260_v50 = vpop.f32.mrf.mxu3  ;;  %3501 = vmatmul.f32.gmra.mxu1 %v9042_v39 }
 0x32f   : > { %v7655_v60 = vadd.f32 %v3260_v50, %v3055_v21  ;;  %3377 = vmatmul.f32.gmra.mxu0 %v7203_v40  ;;  %v7658_v36 = vadd.f32 %v2842_v6, %v2746_v44  ;;  %v9045_v44 = vand.u32 4294901760, %v7315_v1 }
 0x331   : > { %5003 = vmatmul.msk.f32.gmra.mxu2 %vm2942_vm2, %v8787_v26  ;;  %3895 = vrot.lane.b32.xlu0 %v7658_v36, %s5094_s24 }
 0x332   : > { %4039 = vrot.lane.b32.xlu2 %v7658_v36, %s5092_s15 }
 0x333   : > { %v2850_v25 = vpop.f32.mrf.mxu1  ;;  %5019 = vmatmul.msk.f32.gmra.mxu3 %vm2942_vm2, %v8787_v26  ;;  %vm4607_vm2 = vcmask 261120  }
 0x334   : > { %v2749_v40 = vpop.f32.mrf.mxu0 }
 0x335   : > { %v3063_v33 = vpop.f32.mrf.mxu2  ;;  %v2750_v43 = vadd.f32 %v2749_v40, %v7312_v15 }
 0x336   : > { %v3264_v61 = vpop.f32.mrf.mxu3  ;;  %3507 = vmatmul.f32.gmra.mxu1 %v9043_v23 }
 0x337   : > { %v7675_v6 = vadd.f32 %v3264_v61, %v3063_v33  ;;  %3382 = vmatmul.f32.gmra.mxu0 %v7231_v56  ;;  %v7678_v42 = vadd.f32 %v2846_v4, %v2750_v43  ;;  %v9046_v33 = vand.u32 4294901760, %v7343_v5 }
 0x339   : > { %5004 = vmatmul.msk.f32.gmra.mxu2 %vm2943_vm1, %v8787_v26  ;;  %3897 = vrot.lane.b32.xlu1 %v7678_v42, %s5094_s24 }
 0x33a   : > { %4041 = vrot.lane.b32.xlu0 %v7678_v42, %s5092_s15 }
 0x33b   : > { %v2854_v3 = vpop.f32.mrf.mxu1  ;;  %5020 = vmatmul.msk.f32.gmra.mxu3 %vm2943_vm1, %v8787_v26  ;;  %vm4641_vm1 = vcmask 785408  }
 0x33c   : > { %v2753_v56 = vpop.f32.mrf.mxu0 }
 0x33d   : > { %v3071_v15 = vpop.f32.mrf.mxu2  ;;  %v2754_v58 = vadd.f32 %v2753_v56, %v7340_v34 }
 0x33e   : > { %v3268_v20 = vpop.f32.mrf.mxu3  ;;  %3513 = vmatmul.f32.gmra.mxu1 %v9044_v13 }
 0x33f   : > { %v7695_v49 = vadd.f32 %v3268_v20, %v3071_v15  ;;  %3387 = vmatmul.f32.gmra.mxu0 %v7259_v46  ;;  %v7698_v4 = vadd.f32 %v2850_v25, %v2754_v58  ;;  %v9048_v15 = vand.u32 4294901760, %v7371_v62 }
 0x341   : > { %5005 = vmatmul.msk.f32.gmra.mxu2 %vm2944_vm3, %v8787_v26  ;;  %4043 = vrot.lane.b32.xlu1 %v7698_v4, %s5092_s15 }
 0x342   : > { %3899 = vrot.lane.b32.xlu2 %v7698_v4, %s5094_s24 }
 0x343   : > { %v2858_v10 = vpop.f32.mrf.mxu1  ;;  %5021 = vmatmul.msk.f32.gmra.mxu3 %vm2944_vm3, %v8787_v26 }
 0x344   : > { %v2757_v46 = vpop.f32.mrf.mxu0 }
 0x345   : > { %v3079_v34 = vpop.f32.mrf.mxu2  ;;  %v2758_v28 = vadd.f32 %v2757_v46, %v7368_v0 }
 0x346   : > { %v3272_v21 = vpop.f32.mrf.mxu3  ;;  %3519 = vmatmul.f32.gmra.mxu1 %v9045_v44 }
 0x347   : > { %v7715_v50 = vadd.f32 %v3272_v21, %v3079_v34  ;;  %3392 = vmatmul.f32.gmra.mxu0 %v7287_v32  ;;  %v7718_v39 = vadd.f32 %v2854_v3, %v2758_v28  ;;  %v9054_v28 = vand.u32 4294901760, %v7399_v2 }
 0x349   : > { %5006 = vmatmul.msk.f32.gmra.mxu2 %vm2945_vm4, %v8787_v26  ;;  %3901 = vrot.lane.b32.xlu0 %v7718_v39, %s5094_s24 }
 0x34a   : > { %4045 = vrot.lane.b32.xlu2 %v7718_v39, %s5092_s15 }
 0x34b   : > { %v2862_v57 = vpop.f32.mrf.mxu1  ;;  %5022 = vmatmul.msk.f32.gmra.mxu3 %vm2945_vm4, %v8787_v26 }
 0x34c   : > { %v2761_v32 = vpop.f32.mrf.mxu0 }
 0x34d   : > { %v3087_v0 = vpop.f32.mrf.mxu2  ;;  %v2762_v25 = vadd.f32 %v2761_v32, %v7396_v53 }
 0x34e   : > { %v3276_v40 = vpop.f32.mrf.mxu3  ;;  %3525 = vmatmul.f32.gmra.mxu1 %v9046_v33  ;;  %v9059_v33 = vand.u32 4294901760, %v7427_v14 }
 0x34f   : > { %v7735_v43 = vadd.f32 %v3276_v40, %v3087_v0  ;;  %3397 = vmatmul.f32.gmra.mxu0 %v7315_v1  ;;  %v7738_v61 = vadd.f32 %v2858_v10, %v2762_v25 }
 0x351   : > { %5007 = vmatmul.msk.f32.gmra.mxu2 %vm2946_vm5, %v8787_v26  ;;  %3903 = vrot.lane.b32.xlu1 %v7738_v61, %s5094_s24 }
 0x352   : > { %4047 = vrot.lane.b32.xlu0 %v7738_v61, %s5092_s15 }
 0x353   : > { %v2866_v53 = vpop.f32.mrf.mxu1  ;;  %5023 = vmatmul.msk.f32.gmra.mxu3 %vm2946_vm5, %v8787_v26 }
 0x354   : > { %v2765_v1 = vpop.f32.mrf.mxu0 }
 0x355   : > { %v3095_v23 = vpop.f32.mrf.mxu2  ;;  %v2766_v3 = vadd.f32 %v2765_v1, %v7424_v30 }
 0x356   : > { %v3280_v56 = vpop.f32.mrf.mxu3  ;;  %3531 = vmatmul.f32.gmra.mxu1 %v9048_v15 }
 0x357   : > { %v7757_v58 = vadd.f32 %v3280_v56, %v3095_v23  ;;  %3402 = vmatmul.f32.gmra.mxu0 %v7343_v5  ;;  %v7760_v20 = vadd.f32 %v2862_v57, %v2766_v3  ;;  %v7776_v5 = vpop.permute.xlu1 %4245 }
 0x358   : > { %9053 = vst [vmem:[#allocation57_spill] sm:$0xff] %v7776_v5 }
 0x359   : > { %9049 = vst [vmem:[#allocation46_spill] sm:$0xff] %v7760_v20  ;;  %5008 = vmatmul.msk.f32.gmra.mxu2 %vm9050_vm12, %v8787_v26  ;;  %4049 = vrot.lane.b32.xlu1 %v7760_v20, %s5092_s15 }
 0x35a   : > { %3905 = vrot.lane.b32.xlu2 %v7760_v20, %s5094_s24 }
 0x35b   : > { %v2870_v30 = vpop.f32.mrf.mxu1  ;;  %5024 = vmatmul.msk.f32.gmra.mxu3 %vm9052_vm13, %v8787_v26 }
 0x35c   : > { %v2769_v13 = vpop.f32.mrf.mxu0 }
 0x35d   : > { %v3103_v10 = vpop.f32.mrf.mxu2  ;;  %v2770_v46 = vadd.f32 %v2769_v13, %v7452_v16  ;;  %v7796_v16 = vpop.permute.xlu0 %4243  ;;  %v9066_v13 = vand.u32 4294901760, %v7455_v17 }
 0x35e   : > { %v3284_v34 = vpop.f32.mrf.mxu3  ;;  %3537 = vmatmul.f32.gmra.mxu1 %v9054_v28  ;;  %9057 = vst [vmem:[#allocation66_spill] sm:$0xff] %v7796_v16 }
 0x35f   : > { %v7781_v21 = vadd.f32 %v3284_v34, %v3103_v10  ;;  %3407 = vmatmul.f32.gmra.mxu0 %v7371_v62  ;;  %v7784_v44 = vadd.f32 %v2866_v53, %v2770_v46  ;;  %v7802_v62 = vpop.permute.xlu1 %4251 }
 0x360   : > { %9058 = vst [vmem:[#allocation47_spill] sm:$0xff] %v7802_v62 }
 0x361   : > { %9055 = vst [vmem:[#allocation74_spill] sm:$0xff] %v7784_v44  ;;  %5009 = vmatmul.msk.f32.gmra.mxu2 %vm2948_vm9, %v8787_v26  ;;  %3907 = vrot.lane.b32.xlu0 %v7784_v44, %s5094_s24 }
 0x362   : > { %4051 = vrot.lane.b32.xlu2 %v7784_v44, %s5092_s15 }
 0x363   : > { %v2874_v57 = vpop.f32.mrf.mxu1  ;;  %5025 = vmatmul.msk.f32.gmra.mxu3 %vm2948_vm9, %v8787_v26 }
 0x364   : > { %v2773_v32 = vpop.f32.mrf.mxu0 }
 0x365   : > { %v3111_v0 = vpop.f32.mrf.mxu2  ;;  %v2774_v25 = vadd.f32 %v2773_v32, %v7480_v63  ;;  %v7822_v63 = vpop.permute.xlu0 %4249 }
 0x366   : > { %v3288_v40 = vpop.f32.mrf.mxu3  ;;  %3543 = vmatmul.f32.gmra.mxu1 %v9059_v33  ;;  %9063 = vst [vmem:[#allocation78_spill] sm:$0xff] %v7822_v63 }
 0x367   : > { %v7807_v53 = vadd.f32 %v3288_v40, %v3111_v0  ;;  %3412 = vmatmul.f32.gmra.mxu0 %v7399_v2  ;;  %v7810_v1 = vadd.f32 %v2870_v30, %v2774_v25  ;;  %v7828_v2 = vpop.permute.xlu1 %4257  ;;  %v9071_v25 = vand.u32 4294901760, %v7483_v9 }
 0x368   : > { %9065 = vst [vmem:[#allocation58_spill] sm:$0xff] %v7828_v2 }
 0x369   : > { %9060 = vst [vmem:[#allocation65_spill] sm:$0xff] %v7810_v1  ;;  %5010 = vmatmul.msk.f32.gmra.mxu2 %vm9061_vm14, %v8787_v26  ;;  %3909 = vrot.lane.b32.xlu1 %v7810_v1, %s5094_s24 }
 0x36a   : > { %4053 = vrot.lane.b32.xlu0 %v7810_v1, %s5092_s15 }
 0x36b   : > { %5026 = vmatmul.msk.f32.gmra.mxu3 %vm9064_vm15, %v8787_v26  ;;  %v2878_v23 = vpop.f32.mrf.mxu1 }
 0x36c   : > { %v2777_v3 = vpop.f32.mrf.mxu0 }
 0x36d   : > { %v3119_v56 = vpop.f32.mrf.mxu2  ;;  %v2778_v15 = vadd.f32 %v2777_v3, %v7507_v37  ;;  %v7846_v55 = vpop.permute.xlu0 %4255 }
 0x36e   : > { %v3292_v30 = vpop.f32.mrf.mxu3  ;;  %3549 = vmatmul.f32.gmra.mxu1 %v9066_v13  ;;  %9068 = vst [vmem:[#allocation70_spill] sm:$0xff] %v7846_v55 }
 0x36f   : > { %v7833_v10 = vadd.f32 %v3292_v30, %v3119_v56  ;;  %3417 = vmatmul.f32.gmra.mxu0 %v7427_v14  ;;  %v7836_v46 = vadd.f32 %v2874_v57, %v2778_v15  ;;  %v7852_v14 = vpop.permute.xlu2 %4265  ;;  %v7854_v37 = vpop.permute.xlu1 %4263  ;;  %v9075_v30 = vand.u32 4294901760, %v7509_v52 }
 0x370   : > { %9069 = vst [vmem:[#allocation63_spill] sm:$0xff] %v7852_v14 }
 0x371   : > { %9067 = vst [vmem:[#allocation71_spill] sm:$0xff] %v7836_v46  ;;  %5011 = vmatmul.msk.f32.gmra.mxu2 %vm2950_vm11, %v8787_v26  ;;  %4055 = vrot.lane.b32.xlu1 %v7836_v46, %s5092_s15 }
 0x372   : > { %3911 = vrot.lane.b32.xlu2 %v7836_v46, %s5094_s24  ;;  %9070 = vst [vmem:[#allocation81_spill] sm:$0xff] %v7854_v37 }
 0x373   : > { %5027 = vmatmul.msk.f32.gmra.mxu3 %vm2950_vm11, %v8787_v26  ;;  %v2882_v57 = vpop.f32.mrf.mxu1 }
 0x374   : > { %v2781_v34 = vpop.f32.mrf.mxu0 }
 0x375   : > { %v3127_v28 = vpop.f32.mrf.mxu2  ;;  %v2782_v32 = vadd.f32 %v2781_v34, %v7528_v8  ;;  %v7872_v35 = vpop.permute.xlu0 %4261  ;;  %v9076_v34 = vld [vmem:[#allocation50_spill] sm:$0xff] }
 0x376   : > { %v3296_v0 = vpop.f32.mrf.mxu3  ;;  %3555 = vmatmul.f32.gmra.mxu1 %v9071_v25  ;;  %9073 = vst [vmem:[#allocation76_spill] sm:$0xff] %v7872_v35 }
 0x377   : > { %v7859_v40 = vadd.f32 %v3296_v0, %v3127_v28  ;;  %3422 = vmatmul.f32.gmra.mxu0 %v7455_v17  ;;  %v7862_v33 = vadd.f32 %v2878_v23, %v2782_v32  ;;  %v3888_v17 = vpop.permute.xlu2 %3887 }
 0x378   : > { %v3935_v28 = vmul.f32 %v3888_v17, %v9076_v34 }
 0x379   : > { %9072 = vst [vmem:[#allocation59_spill] sm:$0xff] %v7862_v33  ;;  %5012 = vmatmul.msk.f32.gmra.mxu2 %vm2951_vm7, %v8787_v26  ;;  %3913 = vrot.lane.b32.xlu0 %v7862_v33, %s5094_s24  ;;  %v7878_v8 = vpop.permute.xlu1 %4269 }
 0x37a   : > { %4057 = vrot.lane.b32.xlu2 %v7862_v33, %s5092_s15  ;;  %9074 = vst [vmem:[#allocation49_spill] sm:$0xff] %v7878_v8 }
 0x37b   : > { %5028 = vmatmul.msk.f32.gmra.mxu3 %vm2951_vm7, %v8787_v26  ;;  %v2886_v32 = vpop.f32.mrf.mxu1 }
 0x37c   : > { %v2785_v23 = vpop.f32.mrf.mxu0 }
 0x37d   : > { %v3135_v3 = vpop.f32.mrf.mxu2  ;;  %v2786_v56 = vadd.f32 %v2785_v23, %v7548_v22 }
 0x37e   : > { %v3300_v15 = vpop.f32.mrf.mxu3  ;;  %3561 = vmatmul.f32.gmra.mxu1 %v9075_v30 }
 0x37f   : > { %v7883_v13 = vadd.f32 %v3300_v15, %v3135_v3  ;;  %3427 = vmatmul.f32.gmra.mxu0 %v7483_v9  ;;  %v7887_v29 = vadd.f32 %v2882_v57, %v2786_v56  ;;  %v7902_v9 = vpop.permute.xlu0 %4267  ;;  %v9079_v3 = vld [vmem:[#allocation36_spill] sm:$0xff]  ;;  %v4034_v54 = vpop.permute.xlu2 %4033 }
 0x380   : > { %9078 = vst [vmem:[#allocation68_spill] sm:$0xff] %v7902_v9 }
 0x381   : > { %9077 = vst [vmem:[#allocation75_spill] sm:$0xff] %v7887_v29  ;;  %5013 = vmatmul.msk.f32.gmra.mxu2 %vm2952_vm8, %v8787_v26  ;;  %3915 = vrot.lane.b32.xlu1 %v7887_v29, %s5094_s24 }
 0x382   : > { %4303 = vrot.lane.b32.xlu2 %v3935_v28, %s5093_s23  ;;  %4059 = vrot.lane.b32.xlu0 %v7887_v29, %s5092_s15 }
 0x383   : > { %5029 = vmatmul.msk.f32.gmra.mxu3 %vm2952_vm8, %v8787_v26  ;;  %v4032_v22 = vpop.permute.xlu1 %4031  ;;  %v3472_v30 = vpop.f32.mrf.mxu1 }
 0x384   : > { %v2789_v57 = vpop.f32.mrf.mxu0  ;;  %v4079_v56 = vmul.f32 %v4032_v22, %v9079_v3 }
 0x385   : > { %v3143_v0 = vpop.f32.mrf.mxu2  ;;  %v2790_v25 = vadd.f32 %v2789_v57, %v7566_v12 }
 0x386   : > { %v3304_v17 = vpop.f32.mrf.mxu3 }
 0x387   : > { %v7905_v23 = vadd.f32 %v3304_v17, %v3143_v0  ;;  %3432 = vmatmul.f32.gmra.mxu0 %v7509_v52  ;;  %v7909_v15 = vadd.f32 %v2886_v32, %v2790_v25  ;;  %v9082_v52 = vld [vmem:[#allocation51_spill] sm:$0xff]  ;;  %v3894_v14 = vpop.permute.xlu2 %3893 }
 0x388   : > { %v4080_v22 = vmul.f32 %v4034_v54, %v9082_v52 }
 0x389   : > { %9080 = vst [vmem:[#allocation64_spill] sm:$0xff] %v7909_v15  ;;  %4431 = vrot.lane.b32.xlu1 %v4079_v56, %s5092_s15 }
 0x38a   : > { %3917 = vrot.lane.b32.xlu2 %v7909_v15, %s5094_s24 }
 0x38b   : > { %v3890_v26 = vpop.permute.xlu0 %3889  ;;  %v3478_v56 = vpop.f32.mrf.mxu1 }
 0x38c   : > { %v3936_v28 = vmul.f32 %v3890_v26, %v9081_v45  ;;  %v3358_v12 = vpop.f32.mrf.mxu0 }
 0x38d   : > { %v3359_v57 = vadd.f32 %v3358_v12, %v7575_v31  ;;  %v3631_v0 = vpop.f32.mrf.mxu2 }
 0x38e   : > { %4305 = vrot.lane.b32.xlu0 %v3936_v28, %s5093_s23  ;;  %v3728_v17 = vpop.f32.mrf.mxu3  ;;  %v9083_v28 = vld [vmem:[#allocation8_spill] sm:$0xff] }
 0x38f   : > { %v3473_v32 = vadd.f32 %v3472_v30, %v3359_v57 }
 0x391   : > { %v3632_v25 = vadd.f32 %v3631_v0, %v3473_v32  ;;  %4061 = vrot.lane.b32.xlu1 %v7909_v15, %s5092_s15 }
 0x392   : > { %4433 = vrot.lane.b32.xlu2 %v4080_v22, %s5092_s15 }
 0x393   : > { %v3729_v8 = vadd.f32 %v3728_v17, %v3632_v25  ;;  %v3892_v37 = vpop.permute.xlu1 %3891  ;;  %v3484_v25 = vpop.f32.mrf.mxu1  ;;  %v9084_v17 = vld [vmem:[#allocation9_spill] sm:$0xff] }
 0x394   : > { %v3363_v26 = vpop.f32.mrf.mxu0  ;;  %v3937_v12 = vmul.f32 %v3892_v37, %v9083_v28  ;;  %v4036_v37 = vpop.permute.xlu0 %4035 }
 0x395   : > { %v3364_v31 = vadd.f32 %v3363_v26, %v7595_v59  ;;  %v3635_v30 = vpop.f32.mrf.mxu2  ;;  %v3938_v59 = vmul.f32 %v3894_v14, %v9084_v17  ;;  %v4040_v26 = vpop.permute.xlu2 %4039 }
 0x396   : > { %3967 = vrot.lane.b32.xlu0 %v3729_v8, %s5093_s23  ;;  %v3732_v0 = vpop.f32.mrf.mxu3 }
 0x397   : > { %v3479_v54 = vadd.f32 %v3478_v56, %v3364_v31 }
 0x399   : > { %4307 = vrot.lane.b32.xlu1 %v3937_v12, %s5093_s23  ;;  %v3636_v57 = vadd.f32 %v3635_v30, %v3479_v54  ;;  %v9085_v12 = vld [vmem:[#allocation37_spill] sm:$0xff] }
 0x39a   : > { %4095 = vrot.lane.b32.xlu2 %v3729_v8, %s5094_s24  ;;  %v4081_v54 = vmul.f32 %v4036_v37, %v9085_v12  ;;  %v9087_v37 = vld [vmem:[#allocation10_spill] sm:$0xff] }
 0x39b   : > { %v3733_v9 = vadd.f32 %v3732_v0, %v3636_v57  ;;  %v4038_v14 = vpop.permute.xlu1 %4037  ;;  %v9086_v57 = vld [vmem:[#allocation39_spill] sm:$0xff] }
 0x39c   : > { %v3368_v22 = vpop.f32.mrf.mxu0  ;;  %v4082_v0 = vmul.f32 %v4038_v14, %v9086_v57 }
 0x39d   : > { %v3369_v32 = vadd.f32 %v3368_v22, %v7615_v24  ;;  %v3639_v56 = vpop.f32.mrf.mxu2  ;;  %v3900_v24 = vpop.permute.xlu2 %3899 }
 0x39e   : > { %4159 = vrot.lane.b32.xlu0 %v3729_v8, %s5092_s15  ;;  %v3736_v30 = vpop.f32.mrf.mxu3 }
 0x39f   : > { %v3485_v2 = vadd.f32 %v3484_v25, %v3369_v32 }
 0x3a1   : > { %3969 = vrot.lane.b32.xlu1 %v3733_v9, %s5093_s23  ;;  %v3640_v31 = vadd.f32 %v3639_v56, %v3485_v2 }
 0x3a2   : > { %4309 = vrot.lane.b32.xlu2 %v3938_v59, %s5093_s23  ;;  %v3490_v59 = vpop.f32.mrf.mxu1 }
 0x3a3   : > { %v3737_v22 = vadd.f32 %v3736_v30, %v3640_v31  ;;  %v3896_v25 = vpop.permute.xlu0 %3895 }
 0x3a4   : > { %v3373_v8 = vpop.f32.mrf.mxu0  ;;  %v3939_v56 = vmul.f32 %v3896_v25, %v9087_v37 }
 0x3a5   : > { %v3374_v32 = vadd.f32 %v3373_v8, %v7635_v18  ;;  %v7938_v2 = vpop.permute.xlu2 %4045 }
 0x3a6   : > { %4435 = vrot.lane.b32.xlu0 %v4081_v54, %s5092_s15  ;;  %v3643_v54 = vpop.f32.mrf.mxu2  ;;  %v3740_v18 = vpop.f32.mrf.mxu3 }
 0x3a7   : > { %v3491_v31 = vadd.f32 %v3490_v59, %v3374_v32  ;;  %v9089_v32 = vld [vmem:[#allocation11_spill] sm:$0xff] }
 0x3a9   : > { %4161 = vrot.lane.b32.xlu1 %v3733_v9, %s5092_s15  ;;  %v3644_v14 = vadd.f32 %v3643_v54, %v3491_v31 }
 0x3aa   : > { %3971 = vrot.lane.b32.xlu2 %v3737_v22, %s5093_s23 }
 0x3ab   : > { %v3741_v62 = vadd.f32 %v3740_v18, %v3644_v14  ;;  %v3898_v25 = vpop.permute.xlu1 %3897  ;;  %v9090_v14 = vld [vmem:[#allocation16_spill] sm:$0xff] }
 0x3ac   : > { %v3378_v30 = vpop.f32.mrf.mxu0  ;;  %v3940_v59 = vmul.f32 %v3898_v25, %v9089_v32  ;;  %v3941_v18 = vmul.f32 %v3900_v24, %v9090_v14 }
 0x3ad   : > { %v3379_v8 = vadd.f32 %v3378_v30, %v7655_v60 }
 0x3ae   : > { %4097 = vrot.lane.b32.xlu0 %v3733_v9, %s5094_s24  ;;  %v9088_v9 = vld [vmem:[#allocation40_spill] sm:$0xff]  ;;  %v3647_v51 = vpop.f32.mrf.mxu2  ;;  %v3744_v60 = vpop.f32.mrf.mxu3 }
 0x3af   : > { %v4083_v47 = vmul.f32 %v4040_v26, %v9088_v9 }
 0x3b1   : > { %4437 = vrot.lane.b32.xlu1 %v4082_v0, %s5092_s15  ;;  %v3496_v0 = vpop.f32.mrf.mxu1 }
 0x3b2   : > { %4163 = vrot.lane.b32.xlu2 %v3737_v22, %s5092_s15 }
 0x3b4   : > { %v7945_v35 = vpop.permute.xlu2 %3905  ;;  %v3383_v26 = vpop.f32.mrf.mxu0 }
 0x3b6   : > { %4311 = vrot.lane.b32.xlu0 %v3939_v56, %s5093_s23  ;;  %v3497_v56 = vadd.f32 %v3496_v0, %v3379_v8  ;;  %v4044_v8 = vpop.permute.xlu1 %4043  ;;  %v3748_v5 = vpop.f32.mrf.mxu3 }
 0x3b8   : > { %v3648_v31 = vadd.f32 %v3647_v51, %v3497_v56 }
 0x3b9   : > { %4099 = vrot.lane.b32.xlu1 %v3737_v22, %s5094_s24  ;;  %v4042_v22 = vpop.permute.xlu0 %4041  ;;  %v3502_v30 = vpop.f32.mrf.mxu1 }
 0x3ba   : > { %4439 = vrot.lane.b32.xlu2 %v4083_v47, %s5092_s15  ;;  %v3384_v47 = vadd.f32 %v3383_v26, %v7675_v6  ;;  %v3745_v25 = vadd.f32 %v3744_v60, %v3648_v31  ;;  %v9091_v6 = vld [vmem:[#allocation41_spill] sm:$0xff] }
 0x3bb   : > { %v4084_v26 = vmul.f32 %v4042_v22, %v9091_v6  ;;  %v9092_v60 = vld [vmem:[#allocation29_spill] sm:$0xff] }
 0x3bc   : > { %v7955_v54 = vpop.permute.xlu2 %4051  ;;  %v3503_v0 = vadd.f32 %v3502_v30, %v3384_v47  ;;  %v3388_v31 = vpop.f32.mrf.mxu0  ;;  %v4085_v30 = vmul.f32 %v4044_v8, %v9092_v60 }
 0x3be   : > { %3973 = vrot.lane.b32.xlu0 %v3741_v62, %s5093_s23 }
 0x3c1   : > { %4313 = vrot.lane.b32.xlu1 %v3940_v59, %s5093_s23  ;;  %v3651_v59 = vpop.f32.mrf.mxu2  ;;  %v3902_v55 = vpop.permute.xlu0 %3901 }
 0x3c2   : > { %4101 = vrot.lane.b32.xlu2 %v3741_v62, %s5094_s24  ;;  %v3652_v51 = vadd.f32 %v3651_v59, %v3503_v0  ;;  %v9094_v59 = vld [vmem:[#allocation17_spill] sm:$0xff] }
 0x3c3   : > { %v3904_v11 = vpop.permute.xlu1 %3903 }
 0x3c4   : > { %v3393_v29 = vpop.f32.mrf.mxu0 }
 0x3c5   : > { %v3394_v33 = vadd.f32 %v3393_v29, %v7715_v50 }
 0x3c6   : > { %4165 = vrot.lane.b32.xlu0 %v3741_v62, %s5092_s15  ;;  %v3749_v62 = vadd.f32 %v3748_v5, %v3652_v51  ;;  %v3508_v5 = vpop.f32.mrf.mxu1  ;;  %v3942_v51 = vmul.f32 %v3902_v55, %v9094_v59 }
 0x3c9   : > { %3975 = vrot.lane.b32.xlu1 %v3745_v25, %s5093_s23  ;;  %v4048_v47 = vpop.permute.xlu0 %4047  ;;  %v3655_v63 = vpop.f32.mrf.mxu2 }
 0x3ca   : > { %4315 = vrot.lane.b32.xlu2 %v3941_v18, %s5093_s23  ;;  %v3389_v18 = vadd.f32 %v3388_v31, %v7695_v49 }
 0x3cb   : > { %v4050_v22 = vpop.permute.xlu1 %4049 }
 0x3cc   : > { %v7961_v56 = vpop.permute.xlu2 %3911  ;;  %v3398_v46 = vpop.f32.mrf.mxu0 }
 0x3cd   : > { %v3399_v50 = vadd.f32 %v3398_v46, %v7735_v43 }
 0x3ce   : > { %4441 = vrot.lane.b32.xlu0 %v4084_v26, %s5092_s15  ;;  %v3509_v26 = vadd.f32 %v3508_v5, %v3389_v18  ;;  %v3514_v18 = vpop.f32.mrf.mxu1 }
 0x3d0   : > { %v3656_v49 = vadd.f32 %v3655_v63, %v3509_v26  ;;  %v3515_v63 = vadd.f32 %v3514_v18, %v3394_v33 }
 0x3d1   : > { %4167 = vrot.lane.b32.xlu1 %v3745_v25, %s5092_s15  ;;  %v3659_v26 = vpop.f32.mrf.mxu2 }
 0x3d2   : > { %3977 = vrot.lane.b32.xlu2 %v3749_v62, %s5093_s23 }
 0x3d3   : > { %v3908_v15 = vpop.permute.xlu0 %3907 }
 0x3d4   : > { %v7967_v24 = vpop.permute.xlu2 %4057 }
 0x3d6   : > { %4103 = vrot.lane.b32.xlu0 %v3745_v25, %s5094_s24  ;;  %v9095_v25 = vld [vmem:[#allocation52_spill] sm:$0xff] }
 0x3d7   : > { %v4086_v8 = vmul.f32 %v7938_v2, %v9095_v25 }
 0x3d9   : > { %4443 = vrot.lane.b32.xlu1 %v4085_v30, %s5092_s15  ;;  %v3752_v30 = vpop.f32.mrf.mxu3  ;;  %v3663_v43 = vpop.f32.mrf.mxu2 }
 0x3da   : > { %4169 = vrot.lane.b32.xlu2 %v3749_v62, %s5092_s15  ;;  %v3753_v5 = vadd.f32 %v3752_v30, %v3656_v49  ;;  %v3520_v30 = vpop.f32.mrf.mxu1 }
 0x3db   : > { %v7980_v31 = vpop.permute.xlu1 %3909 }
 0x3dc   : > { %v7974_v0 = vpop.permute.xlu2 %4303  ;;  %v7987_v7 = vpop.permute.xlu0 %4053 }
 0x3dd   : > { %9093 = vst [vmem:[#allocation79_spill] sm:$0xff] %v7974_v0 }
 0x3de   : > { %4317 = vrot.lane.b32.xlu0 %v3942_v51, %s5093_s23  ;;  %v9096_v51 = vld [vmem:[#allocation18_spill] sm:$0xff] }
 0x3df   : > { %v3943_v2 = vmul.f32 %v3904_v11, %v9096_v51  ;;  %v9098_v11 = vld [vmem:[#allocation19_spill] sm:$0xff] }
 0x3e0   : > { %v3944_v33 = vmul.f32 %v7945_v35, %v9098_v11 }
 0x3e1   : > { %4105 = vrot.lane.b32.xlu1 %v3749_v62, %s5094_s24  ;;  %v3660_v62 = vadd.f32 %v3659_v26, %v3515_v63  ;;  %v3756_v49 = vpop.f32.mrf.mxu3 }
 0x3e2   : > { %4445 = vrot.lane.b32.xlu2 %v4086_v8, %s5092_s15 }
 0x3e3   : > { %v7994_v29 = vpop.permute.xlu1 %4055  ;;  %v3757_v18 = vadd.f32 %v3756_v49, %v3660_v62  ;;  %v9102_v49 = vld [vmem:[#allocation54_spill] sm:$0xff] }
 0x3e4   : > { %v7985_v55 = vpop.permute.xlu2 %3917 }
 0x3e6   : > { %3979 = vrot.lane.b32.xlu0 %v3753_v5, %s5093_s23 }
 0x3e9   : > { %4319 = vrot.lane.b32.xlu1 %v3943_v2, %s5093_s23  ;;  %v3521_v2 = vadd.f32 %v3520_v30, %v3399_v50  ;;  %v3760_v1 = vpop.f32.mrf.mxu3  ;;  %v3403_v50 = vpop.f32.mrf.mxu0  ;;  %v4088_v30 = vmul.f32 %v4050_v22, %v9102_v49  ;;  %v9105_v22 = vld [vmem:[#allocation53_spill] sm:$0xff] }
 0x3ea   : > { %4107 = vrot.lane.b32.xlu2 %v3753_v5, %s5094_s24 }
 0x3eb   : > { %v7998_v0 = vpop.permute.xlu0 %3913  ;;  %v3664_v46 = vadd.f32 %v3663_v43, %v3521_v2  ;;  %v9104_v43 = vld [vmem:[#allocation24_spill] sm:$0xff] }
 0x3ec   : > { %v7996_v8 = vpop.permute.xlu2 %4433 }
 0x3ed   : > { %9097 = vst [vmem:[#allocation48_spill] sm:$0xff] %v7996_v8  ;;  %v9099_v8 = vld [vmem:[#allocation42_spill] sm:$0xff] }
 0x3ee   : > { %4171 = vrot.lane.b32.xlu0 %v3753_v5, %s5092_s15  ;;  %v4087_v16 = vmul.f32 %v4048_v47, %v9099_v8  ;;  %v3761_v5 = vadd.f32 %v3760_v1, %v3664_v46  ;;  %v3404_v47 = vadd.f32 %v3403_v50, %v7757_v58  ;;  %v3945_v46 = vmul.f32 %v3908_v15, %v9104_v43 }
 0x3ef   : > { %v4089_v58 = vmul.f32 %v7955_v54, %v9105_v22 }
 0x3f1   : > { %3981 = vrot.lane.b32.xlu1 %v3757_v18, %s5093_s23 }
 0x3f2   : > { %4321 = vrot.lane.b32.xlu2 %v3944_v33, %s5093_s23 }
 0x3f3   : > { %v8005_v63 = vpop.permute.xlu1 %3915 }
 0x3f4   : > { %v8007_v26 = vpop.permute.xlu2 %4095  ;;  %v8011_v20 = vpop.permute.xlu0 %4059 }
 0x3f6   : > { %4447 = vrot.lane.b32.xlu0 %v4087_v16, %s5092_s15  ;;  %v3526_v16 = vpop.f32.mrf.mxu1 }
 0x3f9   : > { %4173 = vrot.lane.b32.xlu1 %v3757_v18, %s5092_s15 }
 0x3fa   : > { %3983 = vrot.lane.b32.xlu2 %v3761_v5, %s5093_s23 }
 0x3fb   : > { %v8015_v35 = vpop.permute.xlu1 %4431 }
 0x3fc   : > { %9100 = vst [vmem:[#allocation73_spill] sm:$0xff] %v8015_v35  ;;  %v8017_v62 = vpop.permute.xlu2 %4309  ;;  %v3667_v35 = vpop.f32.mrf.mxu2 }
 0x3fd   : > { %9101 = vst [vmem:[#allocation67_spill] sm:$0xff] %v8017_v62  ;;  %v3527_v62 = vadd.f32 %v3526_v16, %v3404_v47 }
 0x3fe   : > { %4109 = vrot.lane.b32.xlu0 %v3757_v18, %s5094_s24  ;;  %v3408_v18 = vpop.f32.mrf.mxu0  ;;  %v3532_v47 = vpop.f32.mrf.mxu1 }
 0x3ff   : > { %v3668_v50 = vadd.f32 %v3667_v35, %v3527_v62  ;;  %v3409_v44 = vadd.f32 %v3408_v18, %v7781_v21 }
 0x400   : > { %v8022_v33 = vpop.permute.xlu0 %4305 }
 0x401   : > { %9103 = vst [vmem:[#allocation77_spill] sm:$0xff] %v8022_v33  ;;  %4449 = vrot.lane.b32.xlu1 %v4088_v30, %s5092_s15  ;;  %v3764_v30 = vpop.f32.mrf.mxu3  ;;  %v3533_v35 = vadd.f32 %v3532_v47, %v3409_v44  ;;  %v9109_v44 = vld [vmem:[#allocation26_spill] sm:$0xff] }
 0x402   : > { %4175 = vrot.lane.b32.xlu2 %v3761_v5, %s5092_s15  ;;  %v3765_v16 = vadd.f32 %v3764_v30, %v3668_v50 }
 0x403   : > { %v8026_v1 = vpop.permute.xlu1 %4061 }
 0x404   : > { %v8028_v2 = vpop.permute.xlu2 %3971  ;;  %v3671_v62 = vpop.f32.mrf.mxu2 }
 0x405   : > { %v3672_v21 = vadd.f32 %v3671_v62, %v3533_v35  ;;  %v9111_v62 = vld [vmem:[#allocation62_spill] sm:$0xff] }
 0x406   : > { %4323 = vrot.lane.b32.xlu0 %v3945_v46, %s5093_s23  ;;  %v9107_v46 = vld [vmem:[#allocation25_spill] sm:$0xff]  ;;  %v3413_v22 = vpop.f32.mrf.mxu0 }
 0x407   : > { %v3946_v54 = vmul.f32 %v7980_v31, %v9107_v46  ;;  %v3414_v18 = vadd.f32 %v3413_v22, %v7807_v53  ;;  %v3947_v31 = vmul.f32 %v7961_v56, %v9109_v44 }
 0x408   : > { %v8034_v33 = vpop.permute.xlu0 %3967 }
 0x409   : > { %4111 = vrot.lane.b32.xlu1 %v3761_v5, %s5094_s24  ;;  %v3768_v30 = vpop.f32.mrf.mxu3 }
 0x40a   : > { %4451 = vrot.lane.b32.xlu2 %v4089_v58, %s5092_s15  ;;  %v3769_v47 = vadd.f32 %v3768_v30, %v3672_v21  ;;  %v9114_v30 = vld [vmem:[#allocation44_spill] sm:$0xff] }
 0x40b   : > { %v8039_v11 = vpop.permute.xlu1 %4307 }
 0x40c   : > { %9106 = vst [vmem:[#allocation72_spill] sm:$0xff] %v8039_v11  ;;  %v8041_v15 = vpop.permute.xlu2 %4163  ;;  %v3538_v11 = vpop.f32.mrf.mxu1 }
 0x40d   : > { %v3539_v46 = vadd.f32 %v3538_v11, %v3414_v18  ;;  %v3675_v53 = vpop.f32.mrf.mxu2 }
 0x40e   : > { %3985 = vrot.lane.b32.xlu0 %v3765_v16, %s5093_s23  ;;  %v3418_v18 = vpop.f32.mrf.mxu0 }
 0x40f   : > { %v3676_v22 = vadd.f32 %v3675_v53, %v3539_v46 }
 0x410   : > { %v8046_v5 = vpop.permute.xlu0 %4159 }
 0x411   : > { %4325 = vrot.lane.b32.xlu1 %v3946_v54, %s5093_s23 }
 0x412   : > { %4113 = vrot.lane.b32.xlu2 %v3765_v16, %s5094_s24 }
 0x413   : > { %v8051_v58 = vpop.permute.xlu1 %3969 }
 0x414   : > { %v8053_v50 = vpop.permute.xlu2 %4439 }
 0x415   : > { %9108 = vst [vmem:[#allocation80_spill] sm:$0xff] %v8053_v50  ;;  %v3772_v50 = vpop.f32.mrf.mxu3 }
 0x416   : > { %4177 = vrot.lane.b32.xlu0 %v3765_v16, %s5092_s15  ;;  %v4090_v16 = vmul.f32 %v7987_v7, %v9111_v62  ;;  %v3773_v56 = vadd.f32 %v3772_v50, %v3676_v22  ;;  %v4091_v7 = vmul.f32 %v7994_v29, %v9114_v30  ;;  %v3544_v50 = vpop.f32.mrf.mxu1  ;;  %v3423_v44 = vpop.f32.mrf.mxu0 }
 0x417   : > { %v3424_v30 = vadd.f32 %v3423_v44, %v7859_v40 }
 0x418   : > { %v8058_v43 = vpop.permute.xlu0 %4435 }
 0x419   : > { %9110 = vst [vmem:[#allocation2_spill] sm:$0xff] %v8058_v43  ;;  %3987 = vrot.lane.b32.xlu1 %v3769_v47, %s5093_s23  ;;  %v3679_v43 = vpop.f32.mrf.mxu2 }
 0x41a   : > { %4327 = vrot.lane.b32.xlu2 %v3947_v31, %s5093_s23  ;;  %v3419_v31 = vadd.f32 %v3418_v18, %v7833_v10  ;;  %v9117_v10 = vld [vmem:[#allocation43_spill] sm:$0xff] }
 0x41b   : > { %v8062_v54 = vpop.permute.xlu1 %4161  ;;  %v4092_v29 = vmul.f32 %v7967_v24, %v9117_v10 }
 0x41c   : > { %v8064_v35 = vpop.permute.xlu2 %4101 }
 0x41e   : > { %4453 = vrot.lane.b32.xlu0 %v4090_v16, %s5092_s15  ;;  %v3428_v10 = vpop.f32.mrf.mxu0 }
 0x41f   : > { %v3429_v44 = vadd.f32 %v3428_v10, %v7883_v13 }
 0x420   : > { %v8069_v11 = vpop.permute.xlu0 %4097 }
 0x421   : > { %4179 = vrot.lane.b32.xlu1 %v3769_v47, %s5092_s15 }
 0x422   : > { %3989 = vrot.lane.b32.xlu2 %v3773_v56, %s5093_s23 }
 0x423   : > { %v8073_v21 = vpop.permute.xlu1 %4437 }
 0x424   : > { %9112 = vst [vmem:[#allocation3_spill] sm:$0xff] %v8073_v21  ;;  %v8075_v46 = vpop.permute.xlu2 %4315 }
 0x425   : > { %9113 = vst [vmem:[#allocation4_spill] sm:$0xff] %v8075_v46  ;;  %v9116_v46 = vld [vmem:[#allocation30_spill] sm:$0xff] }
 0x426   : > { %4115 = vrot.lane.b32.xlu0 %v3769_v47, %s5094_s24  ;;  %v3948_v21 = vmul.f32 %v7998_v0, %v9116_v46  ;;  %v3545_v47 = vadd.f32 %v3544_v50, %v3419_v31  ;;  %v3550_v31 = vpop.f32.mrf.mxu1 }
 0x428   : > { %v8081_v53 = vpop.permute.xlu0 %4311  ;;  %v3680_v18 = vadd.f32 %v3679_v43, %v3545_v47  ;;  %v3551_v43 = vadd.f32 %v3550_v31, %v3424_v30  ;;  %v3683_v47 = vpop.f32.mrf.mxu2 }
 0x429   : > { %9115 = vst [vmem:[#allocation5_spill] sm:$0xff] %v8081_v53  ;;  %4455 = vrot.lane.b32.xlu1 %v4091_v7, %s5092_s15  ;;  %v3776_v53 = vpop.f32.mrf.mxu3 }
 0x42a   : > { %4181 = vrot.lane.b32.xlu2 %v3773_v56, %s5092_s15  ;;  %v3777_v50 = vadd.f32 %v3776_v53, %v3680_v18  ;;  %v3684_v40 = vadd.f32 %v3683_v47, %v3551_v43  ;;  %v9121_v47 = vld [vmem:[#allocation55_spill] sm:$0xff] }
 0x42b   : > { %v8085_v22 = vpop.permute.xlu1 %4099 }
 0x42c   : > { %v8087_v16 = vpop.permute.xlu2 %3977 }
 0x42e   : > { %4329 = vrot.lane.b32.xlu0 %v3948_v21, %s5093_s23  ;;  %v9119_v21 = vld [vmem:[#allocation33_spill] sm:$0xff] }
 0x42f   : > { %v3949_v24 = vmul.f32 %v8005_v63, %v9119_v21  ;;  %v3950_v63 = vmul.f32 %v7985_v55, %v9036_v38 }
 0x430   : > { %v8094_v7 = vpop.permute.xlu0 %3973  ;;  %v3687_v13 = vpop.f32.mrf.mxu2 }
 0x431   : > { %4117 = vrot.lane.b32.xlu1 %v3773_v56, %s5094_s24  ;;  %v3780_v18 = vpop.f32.mrf.mxu3 }
 0x432   : > { %4457 = vrot.lane.b32.xlu2 %v4092_v29, %s5092_s15  ;;  %v3781_v30 = vadd.f32 %v3780_v18, %v3684_v40  ;;  %v9124_v18 = vld [vmem:[#allocation69_spill] sm:$0xff] }
 0x433   : > { %v8099_v62 = vpop.permute.xlu1 %4313 }
 0x434   : > { %9118 = vst [vmem:[#allocation7_spill] sm:$0xff] %v8099_v62  ;;  %v8101_v0 = vpop.permute.xlu2 %4169  ;;  %v3556_v62 = vpop.f32.mrf.mxu1 }
 0x435   : > { %v3557_v31 = vadd.f32 %v3556_v62, %v3429_v44 }
 0x436   : > { %3991 = vrot.lane.b32.xlu0 %v3777_v50, %s5093_s23 }
 0x437   : > { %v3688_v10 = vadd.f32 %v3687_v13, %v3557_v31 }
 0x438   : > { %v8106_v56 = vpop.permute.xlu0 %4165 }
 0x439   : > { %4331 = vrot.lane.b32.xlu1 %v3949_v24, %s5093_s23 }
 0x43a   : > { %4119 = vrot.lane.b32.xlu2 %v3777_v50, %s5094_s24 }
 0x43b   : > { %v8111_v29 = vpop.permute.xlu1 %3975 }
 0x43c   : > { %v8113_v53 = vpop.permute.xlu2 %4445 }
 0x43d   : > { %9120 = vst [vmem:[#allocation12_spill] sm:$0xff] %v8113_v53  ;;  %v3784_v53 = vpop.f32.mrf.mxu3 }
 0x43e   : > { %4183 = vrot.lane.b32.xlu0 %v3777_v50, %s5092_s15  ;;  %v4093_v50 = vmul.f32 %v8011_v20, %v9121_v47  ;;  %v3785_v55 = vadd.f32 %v3784_v53, %v3688_v10  ;;  %v3433_v20 = vpop.f32.mrf.mxu0 }
 0x43f   : > { %v3434_v53 = vadd.f32 %v3433_v20, %v7905_v23  ;;  %v3691_v23 = vpop.f32.mrf.mxu2 }
 0x440   : > { %v8118_v21 = vpop.permute.xlu0 %4441 }
 0x441   : > { %3993 = vrot.lane.b32.xlu1 %v3781_v30, %s5093_s23 }
 0x442   : > { %4333 = vrot.lane.b32.xlu2 %v3950_v63, %s5093_s23  ;;  %v4094_v63 = vmul.f32 %v8026_v1, %v9124_v18  ;;  %v4143_v1 = vmul.f32 %v8007_v26, %v9079_v3  ;;  %v4016_v26 = vmul.f32 %v8051_v58, %v9081_v45 }
 0x443   : > { %v8122_v24 = vpop.permute.xlu1 %4167 }
 0x444   : > { %v8124_v43 = vpop.permute.xlu2 %4107 }
 0x446   : > { %4459 = vrot.lane.b32.xlu0 %v4093_v50, %s5092_s15  ;;  %v4015_v50 = vmul.f32 %v8034_v33, %v9076_v34  ;;  %v4207_v34 = vmul.f32 %v8046_v5, %v7578_v27  ;;  %v3788_v33 = vpop.f32.mrf.mxu3  ;;  %v4017_v27 = vmul.f32 %v8028_v2, %v9083_v28  ;;  %v4208_v5 = vmul.f32 %v8062_v54, %v7598_v19 }
 0x447   : > { %v4145_v28 = vmul.f32 %v8085_v22, %v9085_v12  ;;  %v4019_v12 = vmul.f32 %v8111_v29, %v9087_v37  ;;  %v4210_v29 = vmul.f32 %v8106_v56, %v7638_v41  ;;  %v4149_v41 = vmul.f32 %v8124_v43, %v9092_v60 }
 0x448   : > { %v8129_v62 = vpop.permute.xlu0 %4103 }
 0x449   : > { %4185 = vrot.lane.b32.xlu1 %v3781_v30, %s5092_s15 }
 0x44a   : > { %3995 = vrot.lane.b32.xlu2 %v3785_v55, %s5093_s23 }
 0x44b   : > { %v8133_v40 = vpop.permute.xlu1 %4443 }
 0x44c   : > { %9122 = vst [vmem:[#allocation13_spill] sm:$0xff] %v8133_v40  ;;  %v8135_v44 = vpop.permute.xlu2 %4321 }
 0x44d   : > { %9123 = vst [vmem:[#allocation14_spill] sm:$0xff] %v8135_v44  ;;  %v3562_v44 = vpop.f32.mrf.mxu1 }
 0x44e   : > { %4121 = vrot.lane.b32.xlu0 %v3781_v30, %s5094_s24  ;;  %v3563_v30 = vadd.f32 %v3562_v44, %v3434_v53 }
 0x450   : > { %v8140_v31 = vpop.permute.xlu0 %4317 }
 0x451   : > { %9125 = vst [vmem:[#allocation15_spill] sm:$0xff] %v8140_v31  ;;  %4461 = vrot.lane.b32.xlu1 %v4094_v63, %s5092_s15  ;;  %v3692_v63 = vadd.f32 %v3691_v23, %v3563_v30  ;;  %v4144_v30 = vmul.f32 %v8069_v11, %v9082_v52  ;;  %v4020_v52 = vmul.f32 %v8087_v16, %v9089_v32 }
 0x452   : > { %4187 = vrot.lane.b32.xlu2 %v3785_v55, %s5092_s15 }
 0x453   : > { %v4106_v13 = vpop.permute.xlu1 %4105  ;;  %v3789_v3 = vadd.f32 %v3788_v33, %v3692_v63  ;;  %v4018_v63 = vmul.f32 %v8094_v7, %v9084_v17  ;;  %v4212_v17 = vmul.f32 %v8101_v0, %v7678_v42 }
 0x454   : > { %v8145_v10 = vpop.permute.xlu2 %3983  ;;  %v4148_v32 = vmul.f32 %v4106_v13, %v9091_v6 }
 0x456   : > { %4367 = vrot.lane.b32.xlu0 %v4015_v50, %s5093_s23 }
 0x458   : > { %v8152_v40 = vpop.permute.xlu0 %3979 }
 0x459   : > { %4123 = vrot.lane.b32.xlu1 %v3785_v55, %s5094_s24  ;;  %v4021_v13 = vmul.f32 %v8152_v40, %v9090_v14 }
 0x45a   : > { %4495 = vrot.lane.b32.xlu2 %v4143_v1, %s5092_s15  ;;  %v4209_v1 = vmul.f32 %v8041_v15, %v7618_v48  ;;  %v4146_v48 = vmul.f32 %v8064_v35, %v9086_v57  ;;  %v4211_v57 = vmul.f32 %v8122_v24, %v7658_v36  ;;  %v4147_v24 = vmul.f32 %v8129_v62, %v9088_v9 }
 0x45b   : > { %v8156_v20 = vpop.permute.xlu1 %4319  ;;  %v4023_v9 = vmul.f32 %v8145_v10, %v9096_v51 }
 0x45c   : > { %v8158_v31 = vpop.permute.xlu2 %4175 }
 0x45d   : > { %v4215_v14 = vmul.f32 %v8158_v31, %v7738_v61 }
 0x45e   : > { %4559 = vrot.lane.b32.xlu0 %v4207_v34, %s5094_s24 }
 0x460   : > { %v8165_v44 = vpop.permute.xlu0 %4171 }
 0x461   : > { %4369 = vrot.lane.b32.xlu1 %v4016_v26, %s5093_s23  ;;  %v4213_v34 = vmul.f32 %v8165_v44, %v7698_v4  ;;  %v9127_v44 = vld [vmem:[#allocation19_spill] sm:$0xff] }
 0x462   : > { %4125 = vrot.lane.b32.xlu2 %v3789_v3, %s5094_s24 }
 0x463   : > { %v3982_v55 = vpop.permute.xlu1 %3981 }
 0x464   : > { %v8169_v53 = vpop.permute.xlu2 %4451  ;;  %v4022_v42 = vmul.f32 %v3982_v55, %v9094_v59 }
 0x466   : > { %3997 = vrot.lane.b32.xlu0 %v3789_v3, %s5093_s23 }
 0x468   : > { %v8176_v50 = vpop.permute.xlu0 %4447 }
 0x469   : > { %4561 = vrot.lane.b32.xlu1 %v4208_v5, %s5094_s24  ;;  %v9129_v5 = vld [vmem:[#allocation74_spill] sm:$0xff] }
 0x46a   : > { %4371 = vrot.lane.b32.xlu2 %v4017_v27, %s5093_s23 }
 0x46b   : > { %v4174_v45 = vpop.permute.xlu1 %4173 }
 0x46c   : > { %v8180_v58 = vpop.permute.xlu2 %4113  ;;  %v4214_v60 = vmul.f32 %v4174_v45, %v7718_v39 }
 0x46d   : > { %v4152_v4 = vmul.f32 %v8180_v58, %v9102_v49 }
 0x46e   : > { %4189 = vrot.lane.b32.xlu0 %v3789_v3, %s5092_s15  ;;  %v9126_v3 = vld [vmem:[#allocation24_spill] sm:$0xff] }
 0x470   : > { %v4110_v2 = vpop.permute.xlu0 %4109 }
 0x471   : > { %4499 = vrot.lane.b32.xlu1 %v4145_v28, %s5092_s15  ;;  %v4150_v33 = vmul.f32 %v4110_v2, %v9095_v25  ;;  %v9128_v25 = vld [vmem:[#allocation25_spill] sm:$0xff]  ;;  %v9130_v28 = vld [vmem:[#allocation46_spill] sm:$0xff] }
 0x472   : > { %4563 = vrot.lane.b32.xlu2 %v4209_v1, %s5094_s24 }
 0x473   : > { %v8189_v19 = vpop.permute.xlu1 %4449 }
 0x474   : > { %v8191_v54 = vpop.permute.xlu2 %4327 }
 0x476   : > { %4497 = vrot.lane.b32.xlu0 %v4144_v30, %s5092_s15  ;;  %v9131_v30 = vld [vmem:[#allocation65_spill] sm:$0xff] }
 0x478   : > { %v8200_v15 = vpop.permute.xlu0 %4323 }
 0x479   : > { %4375 = vrot.lane.b32.xlu1 %v4019_v12, %s5093_s23  ;;  %v9132_v12 = vld [vmem:[#allocation62_spill] sm:$0xff] }
 0x47a   : > { %4501 = vrot.lane.b32.xlu2 %v4146_v48, %s5092_s15 }
 0x47b   : > { %v4112_v22 = vpop.permute.xlu1 %4111 }
 0x47c   : > { %v3990_v23 = vpop.permute.xlu2 %3989  ;;  %v4151_v51 = vmul.f32 %v4112_v22, %v9099_v8 }
 0x47d   : > { %v4026_v27 = vmul.f32 %v3990_v23, %v9128_v25 }
 0x47e   : > { %4373 = vrot.lane.b32.xlu0 %v4018_v63, %s5093_s23 }
 0x480   : > { %v3986_v37 = vpop.permute.xlu0 %3985 }
 0x481   : > { %4567 = vrot.lane.b32.xlu1 %v4211_v57, %s5094_s24  ;;  %v4024_v55 = vmul.f32 %v3986_v37, %v9127_v44  ;;  %v9133_v57 = vld [vmem:[#allocation53_spill] sm:$0xff]  ;;  %v9143_v44 = vld [vmem:[#allocation71_spill] sm:$0xff] }
 0x482   : > { %4377 = vrot.lane.b32.xlu2 %v4020_v52, %s5093_s23 }
 0x483   : > { %v8213_v35 = vpop.permute.xlu1 %4325 }
 0x484   : > { %v4182_v11 = vpop.permute.xlu2 %4181 }
 0x485   : > { %v4218_v48 = vmul.f32 %v4182_v11, %v9131_v30 }
 0x486   : > { %4565 = vrot.lane.b32.xlu0 %v4210_v29, %s5094_s24  ;;  %v9134_v29 = vld [vmem:[#allocation44_spill] sm:$0xff] }
 0x488   : > { %v4178_v16 = vpop.permute.xlu0 %4177 }
 0x489   : > { %4505 = vrot.lane.b32.xlu1 %v4148_v32, %s5092_s15  ;;  %v4216_v2 = vmul.f32 %v4178_v16, %v9130_v28  ;;  %v9135_v16 = vld [vmem:[#allocation72_spill] sm:$0xff] }
 0x48a   : > { %4569 = vrot.lane.b32.xlu2 %v4212_v17, %s5094_s24 }
 0x48b   : > { %v3988_v36 = vpop.permute.xlu1 %3987 }
 0x48c   : > { %v8223_v7 = vpop.permute.xlu2 %4457  ;;  %v4025_v26 = vmul.f32 %v3988_v36, %v9126_v3  ;;  %v9136_v36 = vld [vmem:[#allocation66_spill] sm:$0xff] }
 0x48e   : > { %4503 = vrot.lane.b32.xlu0 %v4147_v24, %s5092_s15 }
 0x490   : > { %v8231_v0 = vpop.permute.xlu0 %4453 }
 0x491   : > { %4381 = vrot.lane.b32.xlu1 %v4022_v42, %s5093_s23  ;;  %v9137_v42 = vld [vmem:[#allocation26_spill] sm:$0xff] }
 0x492   : > { %4507 = vrot.lane.b32.xlu2 %v4149_v41, %s5092_s15 }
 0x493   : > { %v4180_v6 = vpop.permute.xlu1 %4179 }
 0x494   : > { %v4120_v56 = vpop.permute.xlu2 %4119  ;;  %v4217_v45 = vmul.f32 %v4180_v6, %v9129_v5 }
 0x495   : > { %v4155_v17 = vmul.f32 %v4120_v56, %v9134_v29  ;;  %v9151_v29 = vld [vmem:[#allocation78_spill] sm:$0xff] }
 0x496   : > { %4379 = vrot.lane.b32.xlu0 %v4021_v13, %s5093_s23  ;;  %v9138_v13 = vld [vmem:[#allocation2_spill] sm:$0xff] }
 0x498   : > { %v4116_v43 = vpop.permute.xlu0 %4115 }
 0x499   : > { %4573 = vrot.lane.b32.xlu1 %v4214_v60, %s5094_s24  ;;  %v4153_v37 = vmul.f32 %v4116_v43, %v9133_v57  ;;  %v9139_v60 = vld [vmem:[#allocation33_spill] sm:$0xff] }
 0x49a   : > { %4383 = vrot.lane.b32.xlu2 %v4023_v9, %s5093_s23 }
 0x49b   : > { %v8243_v59 = vpop.permute.xlu1 %4455 }
 0x49c   : > { %v8245_v62 = vpop.permute.xlu2 %4333 }
 0x49e   : > { %4571 = vrot.lane.b32.xlu0 %v4213_v34, %s5094_s24  ;;  %v9140_v34 = vld [vmem:[#allocation79_spill] sm:$0xff] }
 0x4a0   : > { %v8253_v39 = vpop.permute.xlu0 %4329 }
 0x4a1   : > { %4511 = vrot.lane.b32.xlu1 %v4151_v51, %s5092_s15 }
 0x4a2   : > { %4575 = vrot.lane.b32.xlu2 %v4215_v14, %s5094_s24  ;;  %v9141_v14 = vld [vmem:[#allocation31_spill] sm:$0xff] }
 0x4a3   : > { %v4118_v40 = vpop.permute.xlu1 %4117  ;;  %v4608_v51 = vsel %vm4607_vm2, %v9141_v14, %v9140_v34 }
 0x4a4   : > { %v3996_v10 = vpop.permute.xlu2 %3995  ;;  %v4154_v22 = vmul.f32 %v4118_v40, %v9132_v12 }
 0x4a5   : > { %v4029_v43 = vmul.f32 %v3996_v10, %v9139_v60  ;;  %v9154_v60 = vld [vmem:[#allocation61_spill] sm:$0xff] }
 0x4a6   : > { %4509 = vrot.lane.b32.xlu0 %v4150_v33, %s5092_s15 }
 0x4a8   : > { %v3992_v61 = vpop.permute.xlu0 %3991 }
 0x4a9   : > { %4387 = vrot.lane.b32.xlu1 %v4025_v26, %s5093_s23  ;;  %v4027_v6 = vmul.f32 %v3992_v61, %v9137_v42 }
 0x4aa   : > { %4513 = vrot.lane.b32.xlu2 %v4152_v4, %s5092_s15  ;;  %v9142_v4 = vld [vmem:[#allocation73_spill] sm:$0xff] }
 0x4ab   : > { %v8264_v8 = vpop.permute.xlu1 %4331 }
 0x4ac   : > { %v8266_v31 = vpop.permute.xlu2 %4187 }
 0x4ae   : > { %4385 = vrot.lane.b32.xlu0 %v4024_v55, %s5093_s23 }
 0x4b0   : > { %v4184_v49 = vpop.permute.xlu0 %4183 }
 0x4b1   : > { %4579 = vrot.lane.b32.xlu1 %v4217_v45, %s5094_s24  ;;  %v4219_v55 = vmul.f32 %v4184_v49, %v9143_v44  ;;  %v9144_v45 = vld [vmem:[#allocation77_spill] sm:$0xff] }
 0x4b2   : > { %4389 = vrot.lane.b32.xlu2 %v4026_v27, %s5093_s23 }
 0x4b3   : > { %v3994_v58 = vpop.permute.xlu1 %3993 }
 0x4b4   : > { %v4496_v1 = vpop.permute.xlu2 %4495  ;;  %v4028_v32 = vmul.f32 %v3994_v58, %v9116_v46  ;;  %v4610_v46 = vsel %vm4607_vm2, %v9136_v36, %v9135_v16  ;;  %v9145_v58 = vld [vmem:[#allocation45_spill] sm:$0xff] }
 0x4b5   : > { %v4609_v49 = vsel %vm4607_vm2, %v9145_v58, %v9144_v45 }
 0x4b6   : > { %4577 = vrot.lane.b32.xlu0 %v4216_v2, %s5094_s24 }
 0x4b8   : > { %v8278_v63 = vpop.permute.xlu0 %4459 }
 0x4b9   : > { %4517 = vrot.lane.b32.xlu1 %v4154_v22, %s5092_s15  ;;  %v9148_v22 = vld [vmem:[#allocation48_spill] sm:$0xff] }
 0x4ba   : > { %4581 = vrot.lane.b32.xlu2 %v4218_v48, %s5094_s24  ;;  %v9147_v48 = vld [vmem:[#allocation43_spill] sm:$0xff] }
 0x4bb   : > { %v4186_v23 = vpop.permute.xlu1 %4185 }
 0x4bc   : > { %v4126_v52 = vpop.permute.xlu2 %4125 }
 0x4bd   : > { %v4158_v25 = vmul.f32 %v4126_v52, %v9124_v18  ;;  %v9149_v52 = vld [vmem:[#allocation75_spill] sm:$0xff] }
 0x4be   : > { %4515 = vrot.lane.b32.xlu0 %v4153_v37, %s5092_s15  ;;  %v4221_v57 = vmul.f32 %v8266_v31, %v9149_v52 }
 0x4c0   : > { %v4122_v11 = vpop.permute.xlu0 %4121 }
 0x4c1   : > { %4393 = vrot.lane.b32.xlu1 %v4028_v32, %s5093_s23  ;;  %v4156_v12 = vmul.f32 %v4122_v11, %v9147_v48 }
 0x4c2   : > { %4519 = vrot.lane.b32.xlu2 %v4155_v17, %s5092_s15 }
 0x4c3   : > { %v8297_v24 = vpop.permute.xlu1 %4461 }
 0x4c4   : > { %v4372_v41 = vpop.permute.xlu2 %4371 }
 0x4c5   : > { %v4627_v56 = vsel %vm4624_vm0, %v4610_v46, %v4372_v41 }
 0x4c6   : > { %v4644_v9 = vsel %vm4641_vm1, %v4627_v56, %v9138_v13  ;;  %4391 = vrot.lane.b32.xlu0 %v4027_v6, %s5093_s23  ;;  %v9152_v6 = vld [vmem:[#allocation64_spill] sm:$0xff] }
 0x4c7   : > { %4678 = vst [vmem:[%s8292_s28 + $0x20] sm:$0xff] %v4644_v9 }
 0x4c8   : > { %v4368_v40 = vpop.permute.xlu0 %4367 }
 0x4c9   : > { %v4625_v33 = vsel %vm4624_vm0, %v4608_v51, %v4368_v40  ;;  %v9155_v40 = vld [vmem:[#allocation80_spill] sm:$0xff] }
 0x4ca   : > { %4395 = vrot.lane.b32.xlu2 %v4029_v43, %s5093_s23  ;;  %v4642_v3 = vsel %vm4641_vm1, %v4625_v33, %v9142_v4  ;;  %v9156_v4 = vld [vmem:[#allocation67_spill] sm:$0xff] }
 0x4cb   : > { %4674 = vst [vmem:[%s8292_s28] sm:$0xff] %v4642_v3  ;;  %v4124_v26 = vpop.permute.xlu1 %4123  ;;  %v9157_v3 = vld [vmem:[#allocation57_spill] sm:$0xff] }
 0x4cc   : > { %v4564_v61 = vpop.permute.xlu2 %4563  ;;  %v4157_v10 = vmul.f32 %v4124_v26, %v9121_v47  ;;  %v9146_v47 = vld [vmem:[#allocation59_spill] sm:$0xff]  ;;  %v4611_v26 = vsel %vm4607_vm2, %v9157_v3, %v9156_v4  ;;  %v9168_v3 = vld [vmem:[#allocation14_spill] sm:$0xff] }
 0x4cd   : > { %v4220_v30 = vmul.f32 %v4186_v23, %v9146_v47  ;;  %v9150_v23 = vld [vmem:[#allocation7_spill] sm:$0xff] }
 0x4ce   : > { %4523 = vrot.lane.b32.xlu1 %v4157_v10, %s5092_s15  ;;  %4583 = vrot.lane.b32.xlu0 %v4219_v55, %s5094_s24  ;;  %v4613_v17 = vsel %vm4607_vm2, %v9151_v29, %v9150_v23  ;;  %v9158_v55 = vld [vmem:[#allocation3_spill] sm:$0xff]  ;;  %v9163_v29 = vld [vmem:[#allocation4_spill] sm:$0xff] }
 0x4d0   : > { %v4560_v27 = vpop.permute.xlu0 %4559 }
 0x4d1   : > { %v4658_v5 = vsel %vm4607_vm2, %v4496_v1, %v4560_v27 }
 0x4d2   : > { %4525 = vrot.lane.b32.xlu2 %v4158_v25, %s5092_s15  ;;  %4675 = vst.msk [vmem:[%s8292_s28 + $0x8] sm:$0xff] %vm4624_vm0, %v4658_v5  ;;  %v9159_v25 = vld [vmem:[#allocation70_spill] sm:$0xff] }
 0x4d3   : > { %v4370_v28 = vpop.permute.xlu1 %4369  ;;  %v4616_v27 = vsel %vm4607_vm2, %v9159_v25, %v8156_v20 }
 0x4d4   : > { %v4502_v2 = vpop.permute.xlu2 %4501  ;;  %v4626_v18 = vsel %vm4624_vm0, %v4609_v49, %v4370_v28 }
 0x4d5   : > { %v4643_v1 = vsel %vm4641_vm1, %v4626_v18, %v9148_v22  ;;  %v9161_v22 = vld [vmem:[#allocation56_spill] sm:$0xff] }
 0x4d6   : > { %4676 = vst [vmem:[%s8292_s28 + $0x10] sm:$0xff] %v4643_v1  ;;  %4585 = vrot.lane.b32.xlu1 %v4220_v30, %s5094_s24  ;;  %4521 = vrot.lane.b32.xlu0 %v4156_v12, %s5092_s15 }
 0x4d8   : > { %v3998_v37 = vpop.permute.xlu0 %3997 }
 0x4d9   : > { %v4030_v16 = vmul.f32 %v3998_v37, %v9036_v38  ;;  %v9162_v37 = vld [vmem:[#allocation12_spill] sm:$0xff] }
 0x4da   : > { %4587 = vrot.lane.b32.xlu2 %v4221_v57, %s5094_s24 }
 0x4db   : > { %v4562_v32 = vpop.permute.xlu1 %4561 }
 0x4dc   : > { %v4378_v11 = vpop.permute.xlu2 %4377 }
 0x4dd   : > { %v4630_v36 = vsel %vm4624_vm0, %v4613_v17, %v4378_v11  ;;  %v9164_v17 = vld [vmem:[#allocation47_spill] sm:$0xff] }
 0x4de   : > { %v4647_v46 = vsel %vm4641_vm1, %v4630_v36, %v8118_v21  ;;  %4397 = vrot.lane.b32.xlu0 %v4030_v16, %s5093_s23  ;;  %v9153_v21 = vld [vmem:[#allocation5_spill] sm:$0xff] }
 0x4df   : > { %4684 = vst [vmem:[%s8292_s28 + $0x50] sm:$0xff] %v4647_v46  ;;  %v4612_v43 = vsel %vm4607_vm2, %v9154_v60, %v9153_v21  ;;  %v9165_v36 = vld [vmem:[#allocation13_spill] sm:$0xff] }
 0x4e0   : > { %v4190_v31 = vpop.permute.xlu0 %4189 }
 0x4e1   : > { %v4222_v56 = vmul.f32 %v4190_v31, %v9152_v6  ;;  %v9166_v31 = vld [vmem:[#allocation76_spill] sm:$0xff] }
 0x4e3   : > { %v4500_v41 = vpop.permute.xlu1 %4499 }
 0x4e4   : > { %v4570_v42 = vpop.permute.xlu2 %4569  ;;  %v4660_v13 = vsel %vm4607_vm2, %v4500_v41, %v4564_v61  ;;  %v4619_v41 = vsel %vm4607_vm2, %v9166_v31, %v8213_v35 }
 0x4e5   : > { %4679 = vst.msk [vmem:[%s8292_s28 + $0x28] sm:$0xff] %vm4624_vm0, %v4660_v13 }
 0x4e6   : > { %4589 = vrot.lane.b32.xlu0 %v4222_v56, %s5094_s24 }
 0x4e8   : > { %v4498_v38 = vpop.permute.xlu0 %4497 }
 0x4e9   : > { %v4659_v9 = vsel %vm4607_vm2, %v4498_v38, %v4562_v32  ;;  %v4614_v32 = vsel %vm4607_vm2, %v9164_v17, %v9163_v29 }
 0x4ea   : > { %4677 = vst.msk [vmem:[%s8292_s28 + $0x18] sm:$0xff] %vm4624_vm0, %v4659_v9 }
 0x4eb   : > { %v4376_v34 = vpop.permute.xlu1 %4375 }
 0x4ec   : > { %v4508_v14 = vpop.permute.xlu2 %4507  ;;  %v4629_v51 = vsel %vm4624_vm0, %v4612_v43, %v4376_v34 }
 0x4ed   : > { %v4646_v33 = vsel %vm4641_vm1, %v4629_v51, %v9155_v40 }
 0x4ee   : > { %4682 = vst [vmem:[%s8292_s28 + $0x40] sm:$0xff] %v4646_v33 }
 0x4f0   : > { %v4374_v61 = vpop.permute.xlu0 %4373 }
 0x4f1   : > { %v4628_v44 = vsel %vm4624_vm0, %v4611_v26, %v4374_v61  ;;  %v9169_v26 = vld [vmem:[#allocation58_spill] sm:$0xff] }
 0x4f2   : > { %v4645_v10 = vsel %vm4641_vm1, %v4628_v44, %v9158_v55  ;;  %v4617_v61 = vsel %vm4607_vm2, %v9169_v26, %v9168_v3 }
 0x4f3   : > { %4680 = vst [vmem:[%s8292_s28 + $0x30] sm:$0xff] %v4645_v10  ;;  %v4568_v5 = vpop.permute.xlu1 %4567  ;;  %v9170_v10 = vld [vmem:[#allocation68_spill] sm:$0xff] }
 0x4f4   : > { %v4384_v45 = vpop.permute.xlu2 %4383  ;;  %v4622_v25 = vsel %vm4607_vm2, %v9170_v10, %v8264_v8 }
 0x4f5   : > { %v4633_v58 = vsel %vm4624_vm0, %v4616_v27, %v4384_v45 }
 0x4f6   : > { %v4650_v49 = vsel %vm4641_vm1, %v4633_v58, %v8176_v50  ;;  %v9160_v50 = vld [vmem:[#allocation15_spill] sm:$0xff] }
 0x4f7   : > { %4690 = vst [vmem:[%s8292_s28 + $0x80] sm:$0xff] %v4650_v49  ;;  %v4615_v1 = vsel %vm4607_vm2, %v9161_v22, %v9160_v50  ;;  %v9172_v50 = vld [vmem:[#allocation81_spill] sm:$0xff] }
 0x4f8   : > { %v4566_v28 = vpop.permute.xlu0 %4565  ;;  %v4620_v22 = vsel %vm4607_vm2, %v9172_v50, %v8191_v54 }
 0x4f9   : > { %v4661_v47 = vsel %vm4607_vm2, %v4502_v2, %v4566_v28 }
 0x4fa   : > { %4681 = vst.msk [vmem:[%s8292_s28 + $0x38] sm:$0xff] %vm4624_vm0, %v4661_v47 }
 0x4fb   : > { %v4506_v30 = vpop.permute.xlu1 %4505 }
 0x4fc   : > { %v4576_v48 = vpop.permute.xlu2 %4575  ;;  %v4663_v20 = vsel %vm4607_vm2, %v4506_v30, %v4570_v42 }
 0x4fd   : > { %4685 = vst.msk [vmem:[%s8292_s28 + $0x58] sm:$0xff] %vm4624_vm0, %v4663_v20 }
 0x500   : > { %v4504_v12 = vpop.permute.xlu0 %4503 }
 0x501   : > { %v4662_v18 = vsel %vm4607_vm2, %v4504_v12, %v4568_v5 }
 0x502   : > { %4683 = vst.msk [vmem:[%s8292_s28 + $0x48] sm:$0xff] %vm4624_vm0, %v4662_v18 }
 0x503   : > { %v4382_v2 = vpop.permute.xlu1 %4381 }
 0x504   : > { %v4514_v52 = vpop.permute.xlu2 %4513  ;;  %v4632_v57 = vsel %vm4624_vm0, %v4615_v1, %v4382_v2 }
 0x505   : > { %v4649_v23 = vsel %vm4641_vm1, %v4632_v57, %v9162_v37 }
 0x506   : > { %4688 = vst [vmem:[%s8292_s28 + $0x70] sm:$0xff] %v4649_v23 }
 0x508   : > { %v4380_v11 = vpop.permute.xlu0 %4379 }
 0x509   : > { %v4631_v16 = vsel %vm4624_vm0, %v4614_v32, %v4380_v11 }
 0x50a   : > { %v4648_v46 = vsel %vm4641_vm1, %v4631_v16, %v9165_v36 }
 0x50b   : > { %4686 = vst [vmem:[%s8292_s28 + $0x60] sm:$0xff] %v4648_v46  ;;  %v4574_v42 = vpop.permute.xlu1 %4573 }
 0x50c   : > { %v4390_v6 = vpop.permute.xlu2 %4389 }
 0x50d   : > { %v4636_v56 = vsel %vm4624_vm0, %v4619_v41, %v4390_v6 }
 0x50e   : > { %v4653_v13 = vsel %vm4641_vm1, %v4636_v56, %v8231_v0  ;;  %v9167_v0 = vld [vmem:[#allocation60_spill] sm:$0xff] }
 0x50f   : > { %4696 = vst [vmem:[%s8292_s28 + $0xb0] sm:$0xff] %v4653_v13  ;;  %v4618_v51 = vsel %vm4607_vm2, %v9167_v0, %v8200_v15 }
 0x510   : > { %v4572_v38 = vpop.permute.xlu0 %4571 }
 0x511   : > { %v4664_v9 = vsel %vm4607_vm2, %v4508_v14, %v4572_v38 }
 0x512   : > { %4687 = vst.msk [vmem:[%s8292_s28 + $0x68] sm:$0xff] %vm4624_vm0, %v4664_v9 }
 0x513   : > { %v4512_v21 = vpop.permute.xlu1 %4511 }
 0x514   : > { %v4582_v60 = vpop.permute.xlu2 %4581  ;;  %v4666_v35 = vsel %vm4607_vm2, %v4512_v21, %v4576_v48 }
 0x515   : > { %4691 = vst.msk [vmem:[%s8292_s28 + $0x88] sm:$0xff] %vm4624_vm0, %v4666_v35 }
 0x518   : > { %v4510_v43 = vpop.permute.xlu0 %4509 }
 0x519   : > { %v4665_v34 = vsel %vm4607_vm2, %v4510_v43, %v4574_v42 }
 0x51a   : > { %4689 = vst.msk [vmem:[%s8292_s28 + $0x78] sm:$0xff] %vm4624_vm0, %v4665_v34 }
 0x51b   : > { %v4388_v14 = vpop.permute.xlu1 %4387 }
 0x51c   : > { %v4520_v40 = vpop.permute.xlu2 %4519  ;;  %v4635_v33 = vsel %vm4624_vm0, %v4618_v51, %v4388_v14 }
 0x51d   : > { %v4652_v4 = vsel %vm4641_vm1, %v4635_v33, %v8169_v53 }
 0x51e   : > { %4694 = vst [vmem:[%s8292_s28 + $0xa0] sm:$0xff] %v4652_v4 }
 0x520   : > { %v4386_v44 = vpop.permute.xlu0 %4385 }
 0x521   : > { %v4634_v55 = vsel %vm4624_vm0, %v4617_v61, %v4386_v44 }
 0x522   : > { %v4651_v15 = vsel %vm4641_vm1, %v4634_v55, %v8189_v19 }
 0x523   : > { %4692 = vst [vmem:[%s8292_s28 + $0x90] sm:$0xff] %v4651_v15  ;;  %v4580_v27 = vpop.permute.xlu1 %4579 }
 0x524   : > { %v4396_v53 = vpop.permute.xlu2 %4395 }
 0x525   : > { %v4639_v5 = vsel %vm4624_vm0, %v4622_v25, %v4396_v53 }
 0x526   : > { %v4656_v45 = vsel %vm4641_vm1, %v4639_v5, %v8278_v63  ;;  %v9171_v63 = vld [vmem:[#allocation63_spill] sm:$0xff] }
 0x527   : > { %4702 = vst [vmem:[%s8292_s28 + $0xe0] sm:$0xff] %v4656_v45  ;;  %v4621_v30 = vsel %vm4607_vm2, %v9171_v63, %v8253_v39 }
 0x528   : > { %v4578_v58 = vpop.permute.xlu0 %4577 }
 0x529   : > { %v4667_v49 = vsel %vm4607_vm2, %v4514_v52, %v4578_v58 }
 0x52a   : > { %4693 = vst.msk [vmem:[%s8292_s28 + $0x98] sm:$0xff] %vm4624_vm0, %v4667_v49 }
 0x52b   : > { %v4518_v19 = vpop.permute.xlu1 %4517 }
 0x52c   : > { %v4669_v28 = vsel %vm4607_vm2, %v4518_v19, %v4582_v60  ;;  %v4526_v12 = vpop.permute.xlu2 %4525 }
 0x52d   : > { %4697 = vst.msk [vmem:[%s8292_s28 + $0xb8] sm:$0xff] %vm4624_vm0, %v4669_v28 }
 0x530   : > { %v4516_v8 = vpop.permute.xlu0 %4515 }
 0x531   : > { %v4668_v47 = vsel %vm4607_vm2, %v4516_v8, %v4580_v27 }
 0x532   : > { %4695 = vst.msk [vmem:[%s8292_s28 + $0xa8] sm:$0xff] %vm4624_vm0, %v4668_v47 }
 0x533   : > { %v4394_v48 = vpop.permute.xlu1 %4393 }
 0x534   : > { %v4638_v20 = vsel %vm4624_vm0, %v4621_v30, %v4394_v48  ;;  %v4588_v52 = vpop.permute.xlu2 %4587 }
 0x535   : > { %v4655_v18 = vsel %vm4641_vm1, %v4638_v20, %v8223_v7 }
 0x536   : > { %4700 = vst [vmem:[%s8292_s28 + $0xd0] sm:$0xff] %v4655_v18 }
 0x538   : > { %v4392_v1 = vpop.permute.xlu0 %4391 }
 0x539   : > { %v4637_v2 = vsel %vm4624_vm0, %v4620_v22, %v4392_v1 }
 0x53a   : > { %v4654_v39 = vsel %vm4641_vm1, %v4637_v2, %v8243_v59  ;;  %v9173_v59 = vld [vmem:[#allocation49_spill] sm:$0xff] }
 0x53b   : > { %4698 = vst [vmem:[%s8292_s28 + $0xc0] sm:$0xff] %v4654_v39  ;;  %v4623_v32 = vsel %vm4607_vm2, %v9173_v59, %v8245_v62 }
 0x540   : > { %v4524_v57 = vpop.permute.xlu1 %4523  ;;  %v4584_v37 = vpop.permute.xlu0 %4583 }
 0x541   : > { %v4672_v7 = vsel %vm4607_vm2, %v4524_v57, %v4588_v52  ;;  %v4670_v23 = vsel %vm4607_vm2, %v4520_v40, %v4584_v37 }
 0x542   : > { %4703 = vst.msk [vmem:[%s8292_s28 + $0xe8] sm:$0xff] %vm4624_vm0, %v4672_v7 }
 0x543   : > { %4699 = vst.msk [vmem:[%s8292_s28 + $0xc8] sm:$0xff] %vm4624_vm0, %v4670_v23 }
 0x548   : > { %v4586_v54 = vpop.permute.xlu1 %4585  ;;  %v4522_v29 = vpop.permute.xlu0 %4521 }
 0x549   : > { %v4671_v17 = vsel %vm4607_vm2, %v4522_v29, %v4586_v54 }
 0x54a   : > { %4701 = vst.msk [vmem:[%s8292_s28 + $0xd8] sm:$0xff] %vm4624_vm0, %v4671_v17 }
 0x550   : > { %v4398_v11 = vpop.permute.xlu0 %4397 }
 0x551   : > { %v4640_v16 = vsel %vm4624_vm0, %v4623_v32, %v4398_v11 }
 0x552   : > { %v4657_v36 = vsel %vm4641_vm1, %v4640_v16, %v8297_v24 }
 0x553   : > { %4704 = vst [vmem:[%s8292_s28 + $0xf0] sm:$0xff] %v4657_v36 }
 0x558   : > { %v4590_v46 = vpop.permute.xlu0 %4589 }
 0x559   : > { %v4673_v31 = vsel %vm4607_vm2, %v4526_v12, %v4590_v46 }
 0x55a   : > { %4705 = vst.msk [vmem:[%s8292_s28 + $0xf8] sm:$0xff] %vm4624_vm0, %v4673_v31 }
 0x55b PF: > { %s12_s9 = sadd.s32 1, %s5084_s9  }
 0x55c   : > { %p9_p4 = scmp.ge.s32.totalorder %s12_s9, 4  }
 0x55e   :  { %11 = sbr.rel (!%p9_p4) target bundleno = 1 (0x1), region = 58 }

</bundles_post_ra>
